<compile_context>
chip_gen: v7x
topology: tpu7x:2x2x1
jax: 0.10.0
libtpu: 0.0.40
codegen_flags: <defaults>
</compile_context>

<pallas_src>
import jax
import jax.numpy as jnp
import numpy as np
from jax.experimental import pallas as pl
from jax.experimental.pallas import tpu as pltpu


_TB = 32        # batch tile (multiple of 8); per-step work is amortized over it
_NC_PAD = 128   # logits padded to one full lane group for an unmasked store


def _make_cnn4_kernel(conv_dims):
    """conv_dims: per layer (ks, pad, H, W, cin, cout, L_in)."""
    TB = _TB
    NL = len(conv_dims)
    assert NL == 4

    def kernel(x_ref,
               cw1, cb1, cw2, cb2, cw3, cb3, cw4, cb4,
               fw1, fb1, fw2, fb2,
               o_ref,
               co1, a2, co2, a3, co3, a4, co4):
        cws = (cw1, cw2, cw3, cw4)
        cbs = (cb1, cb2, cb3, cb4)
        cos = (co1, co2, co3, co4)
        a_in = (x_ref, a2, a3, a4)

        # Zero only the y-padding border rows of the layer-2..4 input buffers
        # (layer 1 arrives pre-padded from the wrapper).  Unconditional every
        # grid step: a handful of vregs, and safe under v7x megacore sharding.
        for li in range(1, NL):
            ks, pd, H, W, cin, cout, L_in = conv_dims[li]
            buf = a_in[li]
            zrow = jnp.zeros((pd * TB, L_in), jnp.bfloat16)
            buf[0:pd * TB, :] = zrow
            buf[(H + pd) * TB:(H + 2 * pd) * TB, :] = zrow

        feat = None
        for li in range(NL):
            ks, pd, H, W, cin, cout, L_in = conv_dims[li]
            src = a_in[li]
            co = cos[li]

            # Conv = sum over the ks vertical taps of one banded matmul each:
            # the horizontal taps + channels live in the contraction (L_in),
            # the output lanes are (x_out, c_out) = W*cout = a full 256.
            acc = None
            for kh in range(ks):
                lhs = src[kh * TB:(kh + H) * TB, :]
                part = jnp.dot(lhs, cws[li][kh],
                               preferred_element_type=jnp.float32)
                acc = part if acc is None else acc + part
            co[...] = acc.astype(jnp.bfloat16)

            # 2x2 / stride-2 max pool, then bias + ReLU (commuted past the
            # pool — exact since max is monotone).  One wide slab per pooled
            # output row.  Odd-x lane blocks of the stored slab are finite
            # don't-care values; the next layer's banded weights are zero
            # there, so they never influence the result.
            last = (li + 1 == NL)
            for yo in range(H // 2):
                top = co[(2 * yo) * TB:(2 * yo + 1) * TB, :]
                bot = co[(2 * yo + 1) * TB:(2 * yo + 2) * TB, :]
                vert = jnp.maximum(top, bot)
                if last:
                    # Final feature map is 1x1: lanes [0:cout] of the pooled
                    # slab are exactly PyTorch's flatten() ordering.
                    hmax = jnp.maximum(vert[:, :cout], vert[:, cout:2 * cout])
                    feat = jnp.maximum(
                        hmax.astype(jnp.float32) + cbs[li][:, :cout], 0.0
                    ).astype(jnp.bfloat16)
                else:
                    shifted = jnp.concatenate(
                        [vert[:, cout:], jnp.zeros((TB, cout), vert.dtype)],
                        axis=1)
                    hmax = jnp.maximum(vert, shifted)
                    act = jnp.maximum(
                        hmax.astype(jnp.float32) + cbs[li][...], 0.0)
                    pd_n = conv_dims[li + 1][1]
                    a_in[li + 1][(pd_n + yo) * TB:(pd_n + yo + 1) * TB, :] = (
                        act.astype(jnp.bfloat16))

        # fc1 -> ReLU -> dropout (identity in eval) -> fc2 -> log_softmax.
        # fw2/fb2 are padded to 128 output lanes (bias -1e30 on pad lanes),
        # so the log_softmax and the output store are fully lane-dense.
        h = jnp.dot(feat, fw1[...], preferred_element_type=jnp.float32) + fb1[...]
        h = jnp.maximum(h, 0.0).astype(jnp.bfloat16)
        logits = jnp.dot(h, fw2[...], preferred_element_type=jnp.float32) + fb2[...]
        mx = jnp.max(logits, axis=1, keepdims=True)
        lse = jnp.log(jnp.sum(jnp.exp(logits - mx), axis=1, keepdims=True)) + mx
        o_ref[...] = (logits - lse).astype(o_ref.dtype)

    return kernel


class CNN4Pallas:
    """JAX/Pallas implementation of the PyTorch CNN4 module's forward pass."""

    def __init__(self, config, key):
        self.config = config
        pset = config['preprocessor']['setting']
        num_channels = 1 if (pset['rgb2gray'] is True or pset['rgb2lab'] is True) else 3
        input_width = config['preprocessor']['resize']['width']
        input_height = config['preprocessor']['resize']['height']
        output_size = config['cnn']['model']['num_classes']

        use_bn = config['cnn']['training']['normalization']['use_batch_normalization']
        assert not use_bn  # TODO(synk): BatchNorm branch not implemented (config disables it).
        assert output_size <= _NC_PAD

        keys = jax.random.split(key, 6)

        def init_conv(k, cout, cin, ks):
            kw_, kb_ = jax.random.split(k)
            bound = 1.0 / np.sqrt(float(cin * ks * ks))
            wgt = jax.random.uniform(kw_, (cout, cin, ks, ks), jnp.float32, -bound, bound)
            bia = jax.random.uniform(kb_, (cout,), jnp.float32, -bound, bound)
            return np.asarray(wgt), np.asarray(bia)

        def init_fc(k, fin, fout):
            kw_, kb_ = jax.random.split(k)
            bound = 1.0 / np.sqrt(float(fin))
            wgt = jax.random.uniform(kw_, (fin, fout), jnp.float32, -bound, bound)
            bia = jax.random.uniform(kb_, (fout,), jnp.float32, -bound, bound)
            return np.asarray(wgt), np.asarray(bia)

        conv_cfg = [(5, 2, num_channels, 16), (3, 1, 16, 32), (3, 1, 32, 64), (3, 1, 64, 128)]
        conv_raw = [init_conv(keys[i], cout, cin, ks)
                    for i, (ks, pd, cin, cout) in enumerate(conv_cfg)]
        self._conv_raw = conv_raw

        # Static geometry (same bookkeeping as the PyTorch __init__).
        h_s, w_s = input_height, input_width
        conv_dims = []
        for li, (ks, pd, cin, cout) in enumerate(conv_cfg):
            assert 2 * pd == ks - 1, "fused kernel assumes 'same' convolutions"
            lane_stride = 1 if li == 0 else 2   # layers >=2 read uncompacted pooled lanes
            conv_dims.append((ks, pd, h_s, w_s, cin, cout, lane_stride * w_s * cin))
            assert h_s % 2 == 0 and w_s % 2 == 0
            h_s = (h_s - 2) // 2 + 1            # maxpool k=2, s=2, p=0
            w_s = (w_s - 2) // 2 + 1
        self._conv_dims = tuple(conv_dims)
        # TODO(synk): in-kernel flatten assumes the final feature map is 1x1
        # (true for the 16x16 config); other resize settings are unsupported.
        assert h_s == 1 and w_s == 1
        feat_dim = conv_cfg[-1][3] * h_s * w_s

        fc1 = init_fc(keys[4], feat_dim, 256)
        fc2 = init_fc(keys[5], 256, output_size)
        self._fc1_raw, self._fc2_raw = fc1, fc2

        # --- banded conv weight construction ---------------------------------
        # mat[kh, lane_in(xi, ci), xo*cout + co] = w[co, ci, kh, kw] with
        # kw = xi - xo + pad (taps falling outside [0, W) are dropped, which
        # implements the horizontal zero padding).  lane_in = stride*xi*cin+ci,
        # stride=2 for layers >= 2 because the previous pooled slab keeps its
        # (uncompacted) even-x lane blocks.
        def banded(w, Wl, lane_stride):
            cout, cin, ks, _ = w.shape
            p = (ks - 1) // 2
            L_in = lane_stride * Wl * cin
            mat = np.zeros((ks, L_in, Wl * cout), np.float32)
            wt = np.transpose(w, (2, 3, 1, 0))          # (kh, kw, cin, cout)
            for kh in range(ks):
                for xo in range(Wl):
                    for kw in range(ks):
                        xi = xo + kw - p
                        if 0 <= xi < Wl:
                            r0 = lane_stride * xi * cin
                            mat[kh, r0:r0 + cin, xo * cout:(xo + 1) * cout] = wt[kh, kw]
            return mat

        self._cw, self._cb = [], []
        for li, ((wgt, bia), (ks, pd, H, W, cin, cout, L_in)) in enumerate(
                zip(conv_raw, conv_dims)):
            stride = 1 if li == 0 else 2
            self._cw.append(jnp.asarray(banded(wgt, W, stride), jnp.bfloat16))
            self._cb.append(jnp.asarray(np.tile(bia, W).reshape(1, W * cout), jnp.float32))

        self._fw1 = jnp.asarray(fc1[0], jnp.bfloat16)
        self._fb1 = jnp.asarray(fc1[1].reshape(1, -1), jnp.float32)
        fw2p = np.zeros((256, _NC_PAD), np.float32)
        fw2p[:, :output_size] = fc2[0]
        fb2p = np.full((1, _NC_PAD), -1e30, np.float32)   # pad classes -> exp()==0
        fb2p[0, :output_size] = fc2[1]
        self._fw2 = jnp.asarray(fw2p, jnp.bfloat16)
        self._fb2 = jnp.asarray(fb2p, jnp.float32)

        self._num_classes = output_size
        self._in_hw = (input_height, input_width)
        self._in_ch = num_channels
        self._kernel = _make_cnn4_kernel(self._conv_dims)

    def __call__(self, x_nchw):
        N = x_nchw.shape[0]
        TB = _TB
        H, W = self._in_hw
        C = self._in_ch
        p1 = self._conv_dims[0][1]
        n_tiles = -(-N // TB)
        Np = n_tiles * TB

        # NCHW -> per-tile rows ordered (y_padded, batch) with lanes (x, c),
        # conv1's vertical zero padding applied here and cast to bf16, so the
        # input block IS conv1's matmul LHS (no in-kernel scatter/zeroing).
        x = jnp.transpose(x_nchw.astype(jnp.float32), (0, 2, 3, 1))     # (N,H,W,C)
        if Np != N:
            x = jnp.pad(x, ((0, Np - N), (0, 0), (0, 0), (0, 0)))
        x = x.reshape(n_tiles, TB, H, W, C)
        x = jnp.transpose(x, (0, 2, 1, 3, 4))                            # (t,H,TB,W,C)
        x = jnp.pad(x, ((0, 0), (p1, p1), (0, 0), (0, 0), (0, 0)))
        x = x.reshape(n_tiles * (H + 2 * p1) * TB, W * C).astype(jnp.bfloat16)

        const2 = lambda i: (0, 0)
        const3 = lambda i: (0, 0, 0)

        in_specs = [pl.BlockSpec(((H + 2 * p1) * TB, W * C), lambda i: (i, 0))]
        args = [x]
        for cw_, cb_ in zip(self._cw, self._cb):
            in_specs.append(pl.BlockSpec(cw_.shape, const3))
            in_specs.append(pl.BlockSpec(cb_.shape, const2))
            args.extend([cw_, cb_])
        for t in (self._fw1, self._fb1, self._fw2, self._fb2):
            in_specs.append(pl.BlockSpec(t.shape, const2))
            args.append(t)

        # Scratch: per layer, conv-output slab co_l (bf16) and, for layers
        # 2..4, the y-padded input buffer a_l (bf16).  ~0.9 MB total.
        scratch = []
        for li, (ks, pd, Hc, Wc, cin, cout, L_in) in enumerate(self._conv_dims):
            if li > 0:
                scratch.append(pltpu.VMEM(((Hc + 2 * pd) * TB, L_in), jnp.bfloat16))
            scratch.append(pltpu.VMEM((Hc * TB, Wc * cout), jnp.bfloat16))

        out = pl.pallas_call(
            self._kernel,
            out_shape=jax.ShapeDtypeStruct((Np, _NC_PAD), jnp.float32),
            grid=(n_tiles,),
            in_specs=in_specs,
            out_specs=pl.BlockSpec((TB, _NC_PAD), lambda i: (i, 0)),
            scratch_shapes=scratch,
            compiler_params=pltpu.CompilerParams(
                dimension_semantics=("parallel",),
                vmem_limit_bytes=32 * 1024 * 1024,
            ),
        )(*args)
        return out[:N, :self._num_classes]


def _reference_forward(model, x_nchw):
    """Pure-JAX f32 reference of CNN4.forward (eval mode) for validation."""
    h = x_nchw
    for wgt, bia in model._conv_raw:
        ks = wgt.shape[-1]
        pd = (ks - 1) // 2
        h = jax.lax.conv_general_dilated(
            h, jnp.asarray(wgt), (1, 1), ((pd, pd), (pd, pd)),
            dimension_numbers=('NCHW', 'OIHW', 'NCHW'))
        h = jnp.maximum(h + jnp.asarray(bia).reshape(1, -1, 1, 1), 0.0)
        h = jax.lax.reduce_window(h, -jnp.inf, jax.lax.max,
                                  (1, 1, 2, 2), (1, 1, 2, 2), 'VALID')
    h = h.reshape(h.shape[0], -1)
    h = jnp.maximum(h @ jnp.asarray(model._fc1_raw[0]) + jnp.asarray(model._fc1_raw[1]), 0.0)
    logits = h @ jnp.asarray(model._fc2_raw[0]) + jnp.asarray(model._fc2_raw[1])
    return jax.nn.log_softmax(logits, axis=1)


if __name__ == "__main__":
    config = {
        'preprocessor': {
            'setting': {'rgb2gray': False, 'rgb2lab': False},
            'resize': {'width': 16, 'height': 16},
        },
        'cnn': {
            'model': {'num_classes': 10, 'dropout_rate': 0.5},
            'training': {'normalization': {'use_batch_normalization': False}},
        },
    }

    key = jax.random.PRNGKey(0)
    k_params, k_x = jax.random.split(key)

    model = CNN4Pallas(config, k_params)
    x = jax.random.normal(k_x, (2, 3, 16, 16), dtype=jnp.float32)  # NCHW like PyTorch

    fwd = jax.jit(lambda inp: model(inp))
    out = jax.block_until_ready(fwd(x))

    assert out.shape == (2, config['cnn']['model']['num_classes'])
    assert bool(jnp.all(jnp.isfinite(out)))
    # log_softmax rows must exponentiate-sum to 1
    assert bool(jnp.allclose(jnp.sum(jnp.exp(out), axis=1), 1.0, atol=1e-4))
    # compare against a pure-JAX f32 reference (bf16 kernel internals -> loose tol)
    ref = jax.block_until_ready(_reference_forward(model, x))
    assert float(jnp.max(jnp.abs(out - ref))) < 0.08
    print("KERNEL_OK")
</pallas_src>

<mosaic_0001>
module attributes {stable_mosaic.version = 11 : i64} {
  func.func @kernel(%arg0: i32, %arg1: memref<640x48xbf16, #tpu.memory_space<vmem>>, %arg2: memref<5x48x256xbf16, #tpu.memory_space<vmem>>, %arg3: memref<1x256xf32, #tpu.memory_space<vmem>>, %arg4: memref<3x256x256xbf16, #tpu.memory_space<vmem>>, %arg5: memref<1x256xf32, #tpu.memory_space<vmem>>, %arg6: memref<3x256x256xbf16, #tpu.memory_space<vmem>>, %arg7: memref<1x256xf32, #tpu.memory_space<vmem>>, %arg8: memref<3x256x256xbf16, #tpu.memory_space<vmem>>, %arg9: memref<1x256xf32, #tpu.memory_space<vmem>>, %arg10: memref<128x256xbf16, #tpu.memory_space<vmem>>, %arg11: memref<1x256xf32, #tpu.memory_space<vmem>>, %arg12: memref<256x128xbf16, #tpu.memory_space<vmem>>, %arg13: memref<1x128xf32, #tpu.memory_space<vmem>>, %arg14: memref<32x128xf32, #tpu.memory_space<vmem>>, %arg15: memref<512x256xbf16, #tpu.memory_space<vmem>>, %arg16: memref<320x256xbf16, #tpu.memory_space<vmem>>, %arg17: memref<256x256xbf16, #tpu.memory_space<vmem>>, %arg18: memref<192x256xbf16, #tpu.memory_space<vmem>>, %arg19: memref<128x256xbf16, #tpu.memory_space<vmem>>, %arg20: memref<128x256xbf16, #tpu.memory_space<vmem>>, %arg21: memref<64x256xbf16, #tpu.memory_space<vmem>>) attributes {dimension_semantics = [#tpu.dimension_semantics<parallel>], iteration_bounds = array<i64: 1>, scalar_prefetch = 0 : i64, scratch_operands = 7 : i64, tpu.core_type = #tpu.core_type<tc>, window_params = [{transform_indices = @transform_0, window_bounds = array<i64: 640, 48>}, {pipeline_mode = #tpu.pipeline_mode<synchronous>, transform_indices = @transform_1, window_bounds = array<i64: 5, 48, 256>}, {pipeline_mode = #tpu.pipeline_mode<synchronous>, transform_indices = @transform_2, window_bounds = array<i64: 1, 256>}, {pipeline_mode = #tpu.pipeline_mode<synchronous>, transform_indices = @transform_3, window_bounds = array<i64: 3, 256, 256>}, {pipeline_mode = #tpu.pipeline_mode<synchronous>, transform_indices = @transform_4, window_bounds = array<i64: 1, 256>}, {pipeline_mode = #tpu.pipeline_mode<synchronous>, transform_indices = @transform_5, window_bounds = array<i64: 3, 256, 256>}, {pipeline_mode = #tpu.pipeline_mode<synchronous>, transform_indices = @transform_6, window_bounds = array<i64: 1, 256>}, {pipeline_mode = #tpu.pipeline_mode<synchronous>, transform_indices = @transform_7, window_bounds = array<i64: 3, 256, 256>}, {pipeline_mode = #tpu.pipeline_mode<synchronous>, transform_indices = @transform_8, window_bounds = array<i64: 1, 256>}, {pipeline_mode = #tpu.pipeline_mode<synchronous>, transform_indices = @transform_9, window_bounds = array<i64: 128, 256>}, {pipeline_mode = #tpu.pipeline_mode<synchronous>, transform_indices = @transform_10, window_bounds = array<i64: 1, 256>}, {pipeline_mode = #tpu.pipeline_mode<synchronous>, transform_indices = @transform_11, window_bounds = array<i64: 256, 128>}, {pipeline_mode = #tpu.pipeline_mode<synchronous>, transform_indices = @transform_12, window_bounds = array<i64: 1, 128>}, {transform_indices = @transform_13, window_bounds = array<i64: 32, 128>}]} {
    %cst = arith.constant 0.000000e+00 : bf16
    %0 = vector.broadcast %cst : bf16 to vector<32x256xbf16>
    %c0 = arith.constant 0 : index
    %c0_0 = arith.constant 0 : index
    %1 = vector.load %arg16[%c0, %c0_0] : memref<320x256xbf16, #tpu.memory_space<vmem>>, vector<32x256xbf16>
    tpu.vector_store %arg16[%c0, %c0_0], %0 {strides = array<i32>} : memref<320x256xbf16, #tpu.memory_space<vmem>>, vector<32x256xbf16>,
    %c288 = arith.constant 288 : index
    %c0_1 = arith.constant 0 : index
    %2 = vector.load %arg16[%c288, %c0_1] : memref<320x256xbf16, #tpu.memory_space<vmem>>, vector<32x256xbf16>
    tpu.vector_store %arg16[%c288, %c0_1], %0 {strides = array<i32>} : memref<320x256xbf16, #tpu.memory_space<vmem>>, vector<32x256xbf16>,
    %cst_2 = arith.constant 0.000000e+00 : bf16
    %3 = vector.broadcast %cst_2 : bf16 to vector<32x256xbf16>
    %c0_3 = arith.constant 0 : index
    %c0_4 = arith.constant 0 : index
    %4 = vector.load %arg18[%c0_3, %c0_4] : memref<192x256xbf16, #tpu.memory_space<vmem>>, vector<32x256xbf16>
    tpu.vector_store %arg18[%c0_3, %c0_4], %3 {strides = array<i32>} : memref<192x256xbf16, #tpu.memory_space<vmem>>, vector<32x256xbf16>,
    %c160 = arith.constant 160 : index
    %c0_5 = arith.constant 0 : index
    %5 = vector.load %arg18[%c160, %c0_5] : memref<192x256xbf16, #tpu.memory_space<vmem>>, vector<32x256xbf16>
    tpu.vector_store %arg18[%c160, %c0_5], %3 {strides = array<i32>} : memref<192x256xbf16, #tpu.memory_space<vmem>>, vector<32x256xbf16>,
    %cst_6 = arith.constant 0.000000e+00 : bf16
    %6 = vector.broadcast %cst_6 : bf16 to vector<32x256xbf16>
    %c0_7 = arith.constant 0 : index
    %c0_8 = arith.constant 0 : index
    %7 = vector.load %arg20[%c0_7, %c0_8] : memref<128x256xbf16, #tpu.memory_space<vmem>>, vector<32x256xbf16>
    tpu.vector_store %arg20[%c0_7, %c0_8], %6 {strides = array<i32>} : memref<128x256xbf16, #tpu.memory_space<vmem>>, vector<32x256xbf16>,
    %c96 = arith.constant 96 : index
    %c0_9 = arith.constant 0 : index
    %8 = vector.load %arg20[%c96, %c0_9] : memref<128x256xbf16, #tpu.memory_space<vmem>>, vector<32x256xbf16>
    tpu.vector_store %arg20[%c96, %c0_9], %6 {strides = array<i32>} : memref<128x256xbf16, #tpu.memory_space<vmem>>, vector<32x256xbf16>,
    %c0_10 = arith.constant 0 : index
    %c0_11 = arith.constant 0 : index
    %9 = vector.load %arg1[%c0_10, %c0_11] : memref<640x48xbf16, #tpu.memory_space<vmem>>, vector<512x48xbf16>
    %c0_12 = arith.constant 0 : index
    %c0_13 = arith.constant 0 : index
    %c0_14 = arith.constant 0 : index
    %10 = vector.load %arg2[%c0_12, %c0_13, %c0_14] : memref<5x48x256xbf16, #tpu.memory_space<vmem>>, vector<1x48x256xbf16>
    %11 = vector.shape_cast %10 : vector<1x48x256xbf16> to vector<48x256xbf16>
    %cst_15 = arith.constant dense<0.000000e+00> : vector<512x256xf32>
    %12 = tpu.matmul %9, %11, %cst_15 {dimension_numbers = #tpu.dot_dimension_numbers<[1], [0], [0], [1], [0, 0, 1, 1], [], []>} : vector<512x48xbf16>, vector<48x256xbf16>, vector<512x256xf32> -> vector<512x256xf32>
    %c32 = arith.constant 32 : index
    %c0_16 = arith.constant 0 : index
    %13 = vector.load %arg1[%c32, %c0_16] : memref<640x48xbf16, #tpu.memory_space<vmem>>, vector<512x48xbf16>
    %c1 = arith.constant 1 : index
    %c0_17 = arith.constant 0 : index
    %c0_18 = arith.constant 0 : index
    %14 = vector.load %arg2[%c1, %c0_17, %c0_18] : memref<5x48x256xbf16, #tpu.memory_space<vmem>>, vector<1x48x256xbf16>
    %15 = vector.shape_cast %14 : vector<1x48x256xbf16> to vector<48x256xbf16>
    %cst_19 = arith.constant dense<0.000000e+00> : vector<512x256xf32>
    %16 = tpu.matmul %13, %15, %cst_19 {dimension_numbers = #tpu.dot_dimension_numbers<[1], [0], [0], [1], [0, 0, 1, 1], [], []>} : vector<512x48xbf16>, vector<48x256xbf16>, vector<512x256xf32> -> vector<512x256xf32>
    %17 = arith.addf %12, %16 : vector<512x256xf32>
    %c64 = arith.constant 64 : index
    %c0_20 = arith.constant 0 : index
    %18 = vector.load %arg1[%c64, %c0_20] : memref<640x48xbf16, #tpu.memory_space<vmem>>, vector<512x48xbf16>
    %c2 = arith.constant 2 : index
    %c0_21 = arith.constant 0 : index
    %c0_22 = arith.constant 0 : index
    %19 = vector.load %arg2[%c2, %c0_21, %c0_22] : memref<5x48x256xbf16, #tpu.memory_space<vmem>>, vector<1x48x256xbf16>
    %20 = vector.shape_cast %19 : vector<1x48x256xbf16> to vector<48x256xbf16>
    %cst_23 = arith.constant dense<0.000000e+00> : vector<512x256xf32>
    %21 = tpu.matmul %18, %20, %cst_23 {dimension_numbers = #tpu.dot_dimension_numbers<[1], [0], [0], [1], [0, 0, 1, 1], [], []>} : vector<512x48xbf16>, vector<48x256xbf16>, vector<512x256xf32> -> vector<512x256xf32>
    %22 = arith.addf %17, %21 : vector<512x256xf32>
    %c96_24 = arith.constant 96 : index
    %c0_25 = arith.constant 0 : index
    %23 = vector.load %arg1[%c96_24, %c0_25] : memref<640x48xbf16, #tpu.memory_space<vmem>>, vector<512x48xbf16>
    %c3 = arith.constant 3 : index
    %c0_26 = arith.constant 0 : index
    %c0_27 = arith.constant 0 : index
    %24 = vector.load %arg2[%c3, %c0_26, %c0_27] : memref<5x48x256xbf16, #tpu.memory_space<vmem>>, vector<1x48x256xbf16>
    %25 = vector.shape_cast %24 : vector<1x48x256xbf16> to vector<48x256xbf16>
    %cst_28 = arith.constant dense<0.000000e+00> : vector<512x256xf32>
    %26 = tpu.matmul %23, %25, %cst_28 {dimension_numbers = #tpu.dot_dimension_numbers<[1], [0], [0], [1], [0, 0, 1, 1], [], []>} : vector<512x48xbf16>, vector<48x256xbf16>, vector<512x256xf32> -> vector<512x256xf32>
    %27 = arith.addf %22, %26 : vector<512x256xf32>
    %c128 = arith.constant 128 : index
    %c0_29 = arith.constant 0 : index
    %28 = vector.load %arg1[%c128, %c0_29] : memref<640x48xbf16, #tpu.memory_space<vmem>>, vector<512x48xbf16>
    %c4 = arith.constant 4 : index
    %c0_30 = arith.constant 0 : index
    %c0_31 = arith.constant 0 : index
    %29 = vector.load %arg2[%c4, %c0_30, %c0_31] : memref<5x48x256xbf16, #tpu.memory_space<vmem>>, vector<1x48x256xbf16>
    %30 = vector.shape_cast %29 : vector<1x48x256xbf16> to vector<48x256xbf16>
    %cst_32 = arith.constant dense<0.000000e+00> : vector<512x256xf32>
    %31 = tpu.matmul %28, %30, %cst_32 {dimension_numbers = #tpu.dot_dimension_numbers<[1], [0], [0], [1], [0, 0, 1, 1], [], []>} : vector<512x48xbf16>, vector<48x256xbf16>, vector<512x256xf32> -> vector<512x256xf32>
    %32 = arith.addf %27, %31 : vector<512x256xf32>
    %33 = arith.truncf %32 : vector<512x256xf32> to vector<512x256xbf16>
    %c0_33 = arith.constant 0 : index
    %c0_34 = arith.constant 0 : index
    %34 = vector.load %arg15[%c0_33, %c0_34] : memref<512x256xbf16, #tpu.memory_space<vmem>>, vector<512x256xbf16>
    tpu.vector_store %arg15[%c0_33, %c0_34], %33 {strides = array<i32>} : memref<512x256xbf16, #tpu.memory_space<vmem>>, vector<512x256xbf16>,
    %c0_35 = arith.constant 0 : index
    %c0_36 = arith.constant 0 : index
    %35 = vector.load %arg15[%c0_35, %c0_36] : memref<512x256xbf16, #tpu.memory_space<vmem>>, vector<32x256xbf16>
    %c32_37 = arith.constant 32 : index
    %c0_38 = arith.constant 0 : index
    %36 = vector.load %arg15[%c32_37, %c0_38] : memref<512x256xbf16, #tpu.memory_space<vmem>>, vector<32x256xbf16>
    %37 = arith.maximumf %35, %36 : vector<32x256xbf16>
    %38 = vector.extract_strided_slice %37 {offsets = [0, 16], sizes = [32, 240], strides = [1, 1]} : vector<32x256xbf16> to vector<32x240xbf16>
    %cst_39 = arith.constant 0.000000e+00 : bf16
    %39 = vector.broadcast %cst_39 : bf16 to vector<32x16xbf16>
    %40 = tpu.concatenate %38, %39 in 1 : vector<32x240xbf16>, vector<32x16xbf16> -> vector<32x256xbf16>
    %41 = arith.maximumf %37, %40 : vector<32x256xbf16>
    %42 = arith.extf %41 : vector<32x256xbf16> to vector<32x256xf32>
    %c0_40 = arith.constant 0 : index
    %c0_41 = arith.constant 0 : index
    %43 = vector.load %arg3[%c0_40, %c0_41] : memref<1x256xf32, #tpu.memory_space<vmem>>, vector<1x256xf32>
    %44 = vector.broadcast %43 : vector<1x256xf32> to vector<32x256xf32>
    %45 = arith.addf %42, %44 : vector<32x256xf32>
    %cst_42 = arith.constant 0.000000e+00 : f32
    %46 = vector.broadcast %cst_42 : f32 to vector<32x256xf32>
    %47 = arith.maximumf %45, %46 : vector<32x256xf32>
    %48 = arith.truncf %47 : vector<32x256xf32> to vector<32x256xbf16>
    %c32_43 = arith.constant 32 : index
    %c0_44 = arith.constant 0 : index
    %49 = vector.load %arg16[%c32_43, %c0_44] : memref<320x256xbf16, #tpu.memory_space<vmem>>, vector<32x256xbf16>
    tpu.vector_store %arg16[%c32_43, %c0_44], %48 {strides = array<i32>} : memref<320x256xbf16, #tpu.memory_space<vmem>>, vector<32x256xbf16>,
    %c64_45 = arith.constant 64 : index
    %c0_46 = arith.constant 0 : index
    %50 = vector.load %arg15[%c64_45, %c0_46] : memref<512x256xbf16, #tpu.memory_space<vmem>>, vector<32x256xbf16>
    %c96_47 = arith.constant 96 : index
    %c0_48 = arith.constant 0 : index
    %51 = vector.load %arg15[%c96_47, %c0_48] : memref<512x256xbf16, #tpu.memory_space<vmem>>, vector<32x256xbf16>
    %52 = arith.maximumf %50, %51 : vector<32x256xbf16>
    %53 = vector.extract_strided_slice %52 {offsets = [0, 16], sizes = [32, 240], strides = [1, 1]} : vector<32x256xbf16> to vector<32x240xbf16>
    %cst_49 = arith.constant 0.000000e+00 : bf16
    %54 = vector.broadcast %cst_49 : bf16 to vector<32x16xbf16>
    %55 = tpu.concatenate %53, %54 in 1 : vector<32x240xbf16>, vector<32x16xbf16> -> vector<32x256xbf16>
    %56 = arith.maximumf %52, %55 : vector<32x256xbf16>
    %57 = arith.extf %56 : vector<32x256xbf16> to vector<32x256xf32>
    %c0_50 = arith.constant 0 : index
    %c0_51 = arith.constant 0 : index
    %58 = vector.load %arg3[%c0_50, %c0_51] : memref<1x256xf32, #tpu.memory_space<vmem>>, vector<1x256xf32>
    %59 = vector.broadcast %58 : vector<1x256xf32> to vector<32x256xf32>
    %60 = arith.addf %57, %59 : vector<32x256xf32>
    %cst_52 = arith.constant 0.000000e+00 : f32
    %61 = vector.broadcast %cst_52 : f32 to vector<32x256xf32>
    %62 = arith.maximumf %60, %61 : vector<32x256xf32>
    %63 = arith.truncf %62 : vector<32x256xf32> to vector<32x256xbf16>
    %c64_53 = arith.constant 64 : index
    %c0_54 = arith.constant 0 : index
    %64 = vector.load %arg16[%c64_53, %c0_54] : memref<320x256xbf16, #tpu.memory_space<vmem>>, vector<32x256xbf16>
    tpu.vector_store %arg16[%c64_53, %c0_54], %63 {strides = array<i32>} : memref<320x256xbf16, #tpu.memory_space<vmem>>, vector<32x256xbf16>,
    %c128_55 = arith.constant 128 : index
    %c0_56 = arith.constant 0 : index
    %65 = vector.load %arg15[%c128_55, %c0_56] : memref<512x256xbf16, #tpu.memory_space<vmem>>, vector<32x256xbf16>
    %c160_57 = arith.constant 160 : index
    %c0_58 = arith.constant 0 : index
    %66 = vector.load %arg15[%c160_57, %c0_58] : memref<512x256xbf16, #tpu.memory_space<vmem>>, vector<32x256xbf16>
    %67 = arith.maximumf %65, %66 : vector<32x256xbf16>
    %68 = vector.extract_strided_slice %67 {offsets = [0, 16], sizes = [32, 240], strides = [1, 1]} : vector<32x256xbf16> to vector<32x240xbf16>
    %cst_59 = arith.constant 0.000000e+00 : bf16
    %69 = vector.broadcast %cst_59 : bf16 to vector<32x16xbf16>
    %70 = tpu.concatenate %68, %69 in 1 : vector<32x240xbf16>, vector<32x16xbf16> -> vector<32x256xbf16>
    %71 = arith.maximumf %67, %70 : vector<32x256xbf16>
    %72 = arith.extf %71 : vector<32x256xbf16> to vector<32x256xf32>
    %c0_60 = arith.constant 0 : index
    %c0_61 = arith.constant 0 : index
    %73 = vector.load %arg3[%c0_60, %c0_61] : memref<1x256xf32, #tpu.memory_space<vmem>>, vector<1x256xf32>
    %74 = vector.broadcast %73 : vector<1x256xf32> to vector<32x256xf32>
    %75 = arith.addf %72, %74 : vector<32x256xf32>
    %cst_62 = arith.constant 0.000000e+00 : f32
    %76 = vector.broadcast %cst_62 : f32 to vector<32x256xf32>
    %77 = arith.maximumf %75, %76 : vector<32x256xf32>
    %78 = arith.truncf %77 : vector<32x256xf32> to vector<32x256xbf16>
    %c96_63 = arith.constant 96 : index
    %c0_64 = arith.constant 0 : index
    %79 = vector.load %arg16[%c96_63, %c0_64] : memref<320x256xbf16, #tpu.memory_space<vmem>>, vector<32x256xbf16>
    tpu.vector_store %arg16[%c96_63, %c0_64], %78 {strides = array<i32>} : memref<320x256xbf16, #tpu.memory_space<vmem>>, vector<32x256xbf16>,
    %c192 = arith.constant 192 : index
    %c0_65 = arith.constant 0 : index
    %80 = vector.load %arg15[%c192, %c0_65] : memref<512x256xbf16, #tpu.memory_space<vmem>>, vector<32x256xbf16>
    %c224 = arith.constant 224 : index
    %c0_66 = arith.constant 0 : index
    %81 = vector.load %arg15[%c224, %c0_66] : memref<512x256xbf16, #tpu.memory_space<vmem>>, vector<32x256xbf16>
    %82 = arith.maximumf %80, %81 : vector<32x256xbf16>
    %83 = vector.extract_strided_slice %82 {offsets = [0, 16], sizes = [32, 240], strides = [1, 1]} : vector<32x256xbf16> to vector<32x240xbf16>
    %cst_67 = arith.constant 0.000000e+00 : bf16
    %84 = vector.broadcast %cst_67 : bf16 to vector<32x16xbf16>
    %85 = tpu.concatenate %83, %84 in 1 : vector<32x240xbf16>, vector<32x16xbf16> -> vector<32x256xbf16>
    %86 = arith.maximumf %82, %85 : vector<32x256xbf16>
    %87 = arith.extf %86 : vector<32x256xbf16> to vector<32x256xf32>
    %c0_68 = arith.constant 0 : index
    %c0_69 = arith.constant 0 : index
    %88 = vector.load %arg3[%c0_68, %c0_69] : memref<1x256xf32, #tpu.memory_space<vmem>>, vector<1x256xf32>
    %89 = vector.broadcast %88 : vector<1x256xf32> to vector<32x256xf32>
    %90 = arith.addf %87, %89 : vector<32x256xf32>
    %cst_70 = arith.constant 0.000000e+00 : f32
    %91 = vector.broadcast %cst_70 : f32 to vector<32x256xf32>
    %92 = arith.maximumf %90, %91 : vector<32x256xf32>
    %93 = arith.truncf %92 : vector<32x256xf32> to vector<32x256xbf16>
    %c128_71 = arith.constant 128 : index
    %c0_72 = arith.constant 0 : index
    %94 = vector.load %arg16[%c128_71, %c0_72] : memref<320x256xbf16, #tpu.memory_space<vmem>>, vector<32x256xbf16>
    tpu.vector_store %arg16[%c128_71, %c0_72], %93 {strides = array<i32>} : memref<320x256xbf16, #tpu.memory_space<vmem>>, vector<32x256xbf16>,
    %c256 = arith.constant 256 : index
    %c0_73 = arith.constant 0 : index
    %95 = vector.load %arg15[%c256, %c0_73] : memref<512x256xbf16, #tpu.memory_space<vmem>>, vector<32x256xbf16>
    %c288_74 = arith.constant 288 : index
    %c0_75 = arith.constant 0 : index
    %96 = vector.load %arg15[%c288_74, %c0_75] : memref<512x256xbf16, #tpu.memory_space<vmem>>, vector<32x256xbf16>
    %97 = arith.maximumf %95, %96 : vector<32x256xbf16>
    %98 = vector.extract_strided_slice %97 {offsets = [0, 16], sizes = [32, 240], strides = [1, 1]} : vector<32x256xbf16> to vector<32x240xbf16>
    %cst_76 = arith.constant 0.000000e+00 : bf16
    %99 = vector.broadcast %cst_76 : bf16 to vector<32x16xbf16>
    %100 = tpu.concatenate %98, %99 in 1 : vector<32x240xbf16>, vector<32x16xbf16> -> vector<32x256xbf16>
    %101 = arith.maximumf %97, %100 : vector<32x256xbf16>
    %102 = arith.extf %101 : vector<32x256xbf16> to vector<32x256xf32>
    %c0_77 = arith.constant 0 : index
    %c0_78 = arith.constant 0 : index
    %103 = vector.load %arg3[%c0_77, %c0_78] : memref<1x256xf32, #tpu.memory_space<vmem>>, vector<1x256xf32>
    %104 = vector.broadcast %103 : vector<1x256xf32> to vector<32x256xf32>
    %105 = arith.addf %102, %104 : vector<32x256xf32>
    %cst_79 = arith.constant 0.000000e+00 : f32
    %106 = vector.broadcast %cst_79 : f32 to vector<32x256xf32>
    %107 = arith.maximumf %105, %106 : vector<32x256xf32>
    %108 = arith.truncf %107 : vector<32x256xf32> to vector<32x256xbf16>
    %c160_80 = arith.constant 160 : index
    %c0_81 = arith.constant 0 : index
    %109 = vector.load %arg16[%c160_80, %c0_81] : memref<320x256xbf16, #tpu.memory_space<vmem>>, vector<32x256xbf16>
    tpu.vector_store %arg16[%c160_80, %c0_81], %108 {strides = array<i32>} : memref<320x256xbf16, #tpu.memory_space<vmem>>, vector<32x256xbf16>,
    %c320 = arith.constant 320 : index
    %c0_82 = arith.constant 0 : index
    %110 = vector.load %arg15[%c320, %c0_82] : memref<512x256xbf16, #tpu.memory_space<vmem>>, vector<32x256xbf16>
    %c352 = arith.constant 352 : index
    %c0_83 = arith.constant 0 : index
    %111 = vector.load %arg15[%c352, %c0_83] : memref<512x256xbf16, #tpu.memory_space<vmem>>, vector<32x256xbf16>
    %112 = arith.maximumf %110, %111 : vector<32x256xbf16>
    %113 = vector.extract_strided_slice %112 {offsets = [0, 16], sizes = [32, 240], strides = [1, 1]} : vector<32x256xbf16> to vector<32x240xbf16>
    %cst_84 = arith.constant 0.000000e+00 : bf16
    %114 = vector.broadcast %cst_84 : bf16 to vector<32x16xbf16>
    %115 = tpu.concatenate %113, %114 in 1 : vector<32x240xbf16>, vector<32x16xbf16> -> vector<32x256xbf16>
    %116 = arith.maximumf %112, %115 : vector<32x256xbf16>
    %117 = arith.extf %116 : vector<32x256xbf16> to vector<32x256xf32>
    %c0_85 = arith.constant 0 : index
    %c0_86 = arith.constant 0 : index
    %118 = vector.load %arg3[%c0_85, %c0_86] : memref<1x256xf32, #tpu.memory_space<vmem>>, vector<1x256xf32>
    %119 = vector.broadcast %118 : vector<1x256xf32> to vector<32x256xf32>
    %120 = arith.addf %117, %119 : vector<32x256xf32>
    %cst_87 = arith.constant 0.000000e+00 : f32
    %121 = vector.broadcast %cst_87 : f32 to vector<32x256xf32>
    %122 = arith.maximumf %120, %121 : vector<32x256xf32>
    %123 = arith.truncf %122 : vector<32x256xf32> to vector<32x256xbf16>
    %c192_88 = arith.constant 192 : index
    %c0_89 = arith.constant 0 : index
    %124 = vector.load %arg16[%c192_88, %c0_89] : memref<320x256xbf16, #tpu.memory_space<vmem>>, vector<32x256xbf16>
    tpu.vector_store %arg16[%c192_88, %c0_89], %123 {strides = array<i32>} : memref<320x256xbf16, #tpu.memory_space<vmem>>, vector<32x256xbf16>,
    %c384 = arith.constant 384 : index
    %c0_90 = arith.constant 0 : index
    %125 = vector.load %arg15[%c384, %c0_90] : memref<512x256xbf16, #tpu.memory_space<vmem>>, vector<32x256xbf16>
    %c416 = arith.constant 416 : index
    %c0_91 = arith.constant 0 : index
    %126 = vector.load %arg15[%c416, %c0_91] : memref<512x256xbf16, #tpu.memory_space<vmem>>, vector<32x256xbf16>
    %127 = arith.maximumf %125, %126 : vector<32x256xbf16>
    %128 = vector.extract_strided_slice %127 {offsets = [0, 16], sizes = [32, 240], strides = [1, 1]} : vector<32x256xbf16> to vector<32x240xbf16>
    %cst_92 = arith.constant 0.000000e+00 : bf16
    %129 = vector.broadcast %cst_92 : bf16 to vector<32x16xbf16>
    %130 = tpu.concatenate %128, %129 in 1 : vector<32x240xbf16>, vector<32x16xbf16> -> vector<32x256xbf16>
    %131 = arith.maximumf %127, %130 : vector<32x256xbf16>
    %132 = arith.extf %131 : vector<32x256xbf16> to vector<32x256xf32>
    %c0_93 = arith.constant 0 : index
    %c0_94 = arith.constant 0 : index
    %133 = vector.load %arg3[%c0_93, %c0_94] : memref<1x256xf32, #tpu.memory_space<vmem>>, vector<1x256xf32>
    %134 = vector.broadcast %133 : vector<1x256xf32> to vector<32x256xf32>
    %135 = arith.addf %132, %134 : vector<32x256xf32>
    %cst_95 = arith.constant 0.000000e+00 : f32
    %136 = vector.broadcast %cst_95 : f32 to vector<32x256xf32>
    %137 = arith.maximumf %135, %136 : vector<32x256xf32>
    %138 = arith.truncf %137 : vector<32x256xf32> to vector<32x256xbf16>
    %c224_96 = arith.constant 224 : index
    %c0_97 = arith.constant 0 : index
    %139 = vector.load %arg16[%c224_96, %c0_97] : memref<320x256xbf16, #tpu.memory_space<vmem>>, vector<32x256xbf16>
    tpu.vector_store %arg16[%c224_96, %c0_97], %138 {strides = array<i32>} : memref<320x256xbf16, #tpu.memory_space<vmem>>, vector<32x256xbf16>,
    %c448 = arith.constant 448 : index
    %c0_98 = arith.constant 0 : index
    %140 = vector.load %arg15[%c448, %c0_98] : memref<512x256xbf16, #tpu.memory_space<vmem>>, vector<32x256xbf16>
    %c480 = arith.constant 480 : index
    %c0_99 = arith.constant 0 : index
    %141 = vector.load %arg15[%c480, %c0_99] : memref<512x256xbf16, #tpu.memory_space<vmem>>, vector<32x256xbf16>
    %142 = arith.maximumf %140, %141 : vector<32x256xbf16>
    %143 = vector.extract_strided_slice %142 {offsets = [0, 16], sizes = [32, 240], strides = [1, 1]} : vector<32x256xbf16> to vector<32x240xbf16>
    %cst_100 = arith.constant 0.000000e+00 : bf16
    %144 = vector.broadcast %cst_100 : bf16 to vector<32x16xbf16>
    %145 = tpu.concatenate %143, %144 in 1 : vector<32x240xbf16>, vector<32x16xbf16> -> vector<32x256xbf16>
    %146 = arith.maximumf %142, %145 : vector<32x256xbf16>
    %147 = arith.extf %146 : vector<32x256xbf16> to vector<32x256xf32>
    %c0_101 = arith.constant 0 : index
    %c0_102 = arith.constant 0 : index
    %148 = vector.load %arg3[%c0_101, %c0_102] : memref<1x256xf32, #tpu.memory_space<vmem>>, vector<1x256xf32>
    %149 = vector.broadcast %148 : vector<1x256xf32> to vector<32x256xf32>
    %150 = arith.addf %147, %149 : vector<32x256xf32>
    %cst_103 = arith.constant 0.000000e+00 : f32
    %151 = vector.broadcast %cst_103 : f32 to vector<32x256xf32>
    %152 = arith.maximumf %150, %151 : vector<32x256xf32>
    %153 = arith.truncf %152 : vector<32x256xf32> to vector<32x256xbf16>
    %c256_104 = arith.constant 256 : index
    %c0_105 = arith.constant 0 : index
    %154 = vector.load %arg16[%c256_104, %c0_105] : memref<320x256xbf16, #tpu.memory_space<vmem>>, vector<32x256xbf16>
    tpu.vector_store %arg16[%c256_104, %c0_105], %153 {strides = array<i32>} : memref<320x256xbf16, #tpu.memory_space<vmem>>, vector<32x256xbf16>,
    %c0_106 = arith.constant 0 : index
    %c0_107 = arith.constant 0 : index
    %155 = vector.load %arg16[%c0_106, %c0_107] : memref<320x256xbf16, #tpu.memory_space<vmem>>, vector<256x256xbf16>
    %c0_108 = arith.constant 0 : index
    %c0_109 = arith.constant 0 : index
    %c0_110 = arith.constant 0 : index
    %156 = vector.load %arg4[%c0_108, %c0_109, %c0_110] : memref<3x256x256xbf16, #tpu.memory_space<vmem>>, vector<1x256x256xbf16>
    %157 = vector.shape_cast %156 : vector<1x256x256xbf16> to vector<256x256xbf16>
    %cst_111 = arith.constant dense<0.000000e+00> : vector<256x256xf32>
    %158 = tpu.matmul %155, %157, %cst_111 {dimension_numbers = #tpu.dot_dimension_numbers<[1], [0], [0], [1], [0, 0, 1, 1], [], []>} : vector<256x256xbf16>, vector<256x256xbf16>, vector<256x256xf32> -> vector<256x256xf32>
    %c32_112 = arith.constant 32 : index
    %c0_113 = arith.constant 0 : index
    %159 = vector.load %arg16[%c32_112, %c0_113] : memref<320x256xbf16, #tpu.memory_space<vmem>>, vector<256x256xbf16>
    %c1_114 = arith.constant 1 : index
    %c0_115 = arith.constant 0 : index
    %c0_116 = arith.constant 0 : index
    %160 = vector.load %arg4[%c1_114, %c0_115, %c0_116] : memref<3x256x256xbf16, #tpu.memory_space<vmem>>, vector<1x256x256xbf16>
    %161 = vector.shape_cast %160 : vector<1x256x256xbf16> to vector<256x256xbf16>
    %cst_117 = arith.constant dense<0.000000e+00> : vector<256x256xf32>
    %162 = tpu.matmul %159, %161, %cst_117 {dimension_numbers = #tpu.dot_dimension_numbers<[1], [0], [0], [1], [0, 0, 1, 1], [], []>} : vector<256x256xbf16>, vector<256x256xbf16>, vector<256x256xf32> -> vector<256x256xf32>
    %163 = arith.addf %158, %162 : vector<256x256xf32>
    %c64_118 = arith.constant 64 : index
    %c0_119 = arith.constant 0 : index
    %164 = vector.load %arg16[%c64_118, %c0_119] : memref<320x256xbf16, #tpu.memory_space<vmem>>, vector<256x256xbf16>
    %c2_120 = arith.constant 2 : index
    %c0_121 = arith.constant 0 : index
    %c0_122 = arith.constant 0 : index
    %165 = vector.load %arg4[%c2_120, %c0_121, %c0_122] : memref<3x256x256xbf16, #tpu.memory_space<vmem>>, vector<1x256x256xbf16>
    %166 = vector.shape_cast %165 : vector<1x256x256xbf16> to vector<256x256xbf16>
    %cst_123 = arith.constant dense<0.000000e+00> : vector<256x256xf32>
    %167 = tpu.matmul %164, %166, %cst_123 {dimension_numbers = #tpu.dot_dimension_numbers<[1], [0], [0], [1], [0, 0, 1, 1], [], []>} : vector<256x256xbf16>, vector<256x256xbf16>, vector<256x256xf32> -> vector<256x256xf32>
    %168 = arith.addf %163, %167 : vector<256x256xf32>
    %169 = arith.truncf %168 : vector<256x256xf32> to vector<256x256xbf16>
    %c0_124 = arith.constant 0 : index
    %c0_125 = arith.constant 0 : index
    %170 = vector.load %arg17[%c0_124, %c0_125] : memref<256x256xbf16, #tpu.memory_space<vmem>>, vector<256x256xbf16>
    tpu.vector_store %arg17[%c0_124, %c0_125], %169 {strides = array<i32>} : memref<256x256xbf16, #tpu.memory_space<vmem>>, vector<256x256xbf16>,
    %c0_126 = arith.constant 0 : index
    %c0_127 = arith.constant 0 : index
    %171 = vector.load %arg17[%c0_126, %c0_127] : memref<256x256xbf16, #tpu.memory_space<vmem>>, vector<32x256xbf16>
    %c32_128 = arith.constant 32 : index
    %c0_129 = arith.constant 0 : index
    %172 = vector.load %arg17[%c32_128, %c0_129] : memref<256x256xbf16, #tpu.memory_space<vmem>>, vector<32x256xbf16>
    %173 = arith.maximumf %171, %172 : vector<32x256xbf16>
    %174 = vector.extract_strided_slice %173 {offsets = [0, 32], sizes = [32, 224], strides = [1, 1]} : vector<32x256xbf16> to vector<32x224xbf16>
    %cst_130 = arith.constant 0.000000e+00 : bf16
    %175 = vector.broadcast %cst_130 : bf16 to vector<32x32xbf16>
    %176 = tpu.concatenate %174, %175 in 1 : vector<32x224xbf16>, vector<32x32xbf16> -> vector<32x256xbf16>
    %177 = arith.maximumf %173, %176 : vector<32x256xbf16>
    %178 = arith.extf %177 : vector<32x256xbf16> to vector<32x256xf32>
    %c0_131 = arith.constant 0 : index
    %c0_132 = arith.constant 0 : index
    %179 = vector.load %arg5[%c0_131, %c0_132] : memref<1x256xf32, #tpu.memory_space<vmem>>, vector<1x256xf32>
    %180 = vector.broadcast %179 : vector<1x256xf32> to vector<32x256xf32>
    %181 = arith.addf %178, %180 : vector<32x256xf32>
    %cst_133 = arith.constant 0.000000e+00 : f32
    %182 = vector.broadcast %cst_133 : f32 to vector<32x256xf32>
    %183 = arith.maximumf %181, %182 : vector<32x256xf32>
    %184 = arith.truncf %183 : vector<32x256xf32> to vector<32x256xbf16>
    %c32_134 = arith.constant 32 : index
    %c0_135 = arith.constant 0 : index
    %185 = vector.load %arg18[%c32_134, %c0_135] : memref<192x256xbf16, #tpu.memory_space<vmem>>, vector<32x256xbf16>
    tpu.vector_store %arg18[%c32_134, %c0_135], %184 {strides = array<i32>} : memref<192x256xbf16, #tpu.memory_space<vmem>>, vector<32x256xbf16>,
    %c64_136 = arith.constant 64 : index
    %c0_137 = arith.constant 0 : index
    %186 = vector.load %arg17[%c64_136, %c0_137] : memref<256x256xbf16, #tpu.memory_space<vmem>>, vector<32x256xbf16>
    %c96_138 = arith.constant 96 : index
    %c0_139 = arith.constant 0 : index
    %187 = vector.load %arg17[%c96_138, %c0_139] : memref<256x256xbf16, #tpu.memory_space<vmem>>, vector<32x256xbf16>
    %188 = arith.maximumf %186, %187 : vector<32x256xbf16>
    %189 = vector.extract_strided_slice %188 {offsets = [0, 32], sizes = [32, 224], strides = [1, 1]} : vector<32x256xbf16> to vector<32x224xbf16>
    %cst_140 = arith.constant 0.000000e+00 : bf16
    %190 = vector.broadcast %cst_140 : bf16 to vector<32x32xbf16>
    %191 = tpu.concatenate %189, %190 in 1 : vector<32x224xbf16>, vector<32x32xbf16> -> vector<32x256xbf16>
    %192 = arith.maximumf %188, %191 : vector<32x256xbf16>
    %193 = arith.extf %192 : vector<32x256xbf16> to vector<32x256xf32>
    %c0_141 = arith.constant 0 : index
    %c0_142 = arith.constant 0 : index
    %194 = vector.load %arg5[%c0_141, %c0_142] : memref<1x256xf32, #tpu.memory_space<vmem>>, vector<1x256xf32>
    %195 = vector.broadcast %194 : vector<1x256xf32> to vector<32x256xf32>
    %196 = arith.addf %193, %195 : vector<32x256xf32>
    %cst_143 = arith.constant 0.000000e+00 : f32
    %197 = vector.broadcast %cst_143 : f32 to vector<32x256xf32>
    %198 = arith.maximumf %196, %197 : vector<32x256xf32>
    %199 = arith.truncf %198 : vector<32x256xf32> to vector<32x256xbf16>
    %c64_144 = arith.constant 64 : index
    %c0_145 = arith.constant 0 : index
    %200 = vector.load %arg18[%c64_144, %c0_145] : memref<192x256xbf16, #tpu.memory_space<vmem>>, vector<32x256xbf16>
    tpu.vector_store %arg18[%c64_144, %c0_145], %199 {strides = array<i32>} : memref<192x256xbf16, #tpu.memory_space<vmem>>, vector<32x256xbf16>,
    %c128_146 = arith.constant 128 : index
    %c0_147 = arith.constant 0 : index
    %201 = vector.load %arg17[%c128_146, %c0_147] : memref<256x256xbf16, #tpu.memory_space<vmem>>, vector<32x256xbf16>
    %c160_148 = arith.constant 160 : index
    %c0_149 = arith.constant 0 : index
    %202 = vector.load %arg17[%c160_148, %c0_149] : memref<256x256xbf16, #tpu.memory_space<vmem>>, vector<32x256xbf16>
    %203 = arith.maximumf %201, %202 : vector<32x256xbf16>
    %204 = vector.extract_strided_slice %203 {offsets = [0, 32], sizes = [32, 224], strides = [1, 1]} : vector<32x256xbf16> to vector<32x224xbf16>
    %cst_150 = arith.constant 0.000000e+00 : bf16
    %205 = vector.broadcast %cst_150 : bf16 to vector<32x32xbf16>
    %206 = tpu.concatenate %204, %205 in 1 : vector<32x224xbf16>, vector<32x32xbf16> -> vector<32x256xbf16>
    %207 = arith.maximumf %203, %206 : vector<32x256xbf16>
    %208 = arith.extf %207 : vector<32x256xbf16> to vector<32x256xf32>
    %c0_151 = arith.constant 0 : index
    %c0_152 = arith.constant 0 : index
    %209 = vector.load %arg5[%c0_151, %c0_152] : memref<1x256xf32, #tpu.memory_space<vmem>>, vector<1x256xf32>
    %210 = vector.broadcast %209 : vector<1x256xf32> to vector<32x256xf32>
    %211 = arith.addf %208, %210 : vector<32x256xf32>
    %cst_153 = arith.constant 0.000000e+00 : f32
    %212 = vector.broadcast %cst_153 : f32 to vector<32x256xf32>
    %213 = arith.maximumf %211, %212 : vector<32x256xf32>
    %214 = arith.truncf %213 : vector<32x256xf32> to vector<32x256xbf16>
    %c96_154 = arith.constant 96 : index
    %c0_155 = arith.constant 0 : index
    %215 = vector.load %arg18[%c96_154, %c0_155] : memref<192x256xbf16, #tpu.memory_space<vmem>>, vector<32x256xbf16>
    tpu.vector_store %arg18[%c96_154, %c0_155], %214 {strides = array<i32>} : memref<192x256xbf16, #tpu.memory_space<vmem>>, vector<32x256xbf16>,
    %c192_156 = arith.constant 192 : index
    %c0_157 = arith.constant 0 : index
    %216 = vector.load %arg17[%c192_156, %c0_157] : memref<256x256xbf16, #tpu.memory_space<vmem>>, vector<32x256xbf16>
    %c224_158 = arith.constant 224 : index
    %c0_159 = arith.constant 0 : index
    %217 = vector.load %arg17[%c224_158, %c0_159] : memref<256x256xbf16, #tpu.memory_space<vmem>>, vector<32x256xbf16>
    %218 = arith.maximumf %216, %217 : vector<32x256xbf16>
    %219 = vector.extract_strided_slice %218 {offsets = [0, 32], sizes = [32, 224], strides = [1, 1]} : vector<32x256xbf16> to vector<32x224xbf16>
    %cst_160 = arith.constant 0.000000e+00 : bf16
    %220 = vector.broadcast %cst_160 : bf16 to vector<32x32xbf16>
    %221 = tpu.concatenate %219, %220 in 1 : vector<32x224xbf16>, vector<32x32xbf16> -> vector<32x256xbf16>
    %222 = arith.maximumf %218, %221 : vector<32x256xbf16>
    %223 = arith.extf %222 : vector<32x256xbf16> to vector<32x256xf32>
    %c0_161 = arith.constant 0 : index
    %c0_162 = arith.constant 0 : index
    %224 = vector.load %arg5[%c0_161, %c0_162] : memref<1x256xf32, #tpu.memory_space<vmem>>, vector<1x256xf32>
    %225 = vector.broadcast %224 : vector<1x256xf32> to vector<32x256xf32>
    %226 = arith.addf %223, %225 : vector<32x256xf32>
    %cst_163 = arith.constant 0.000000e+00 : f32
    %227 = vector.broadcast %cst_163 : f32 to vector<32x256xf32>
    %228 = arith.maximumf %226, %227 : vector<32x256xf32>
    %229 = arith.truncf %228 : vector<32x256xf32> to vector<32x256xbf16>
    %c128_164 = arith.constant 128 : index
    %c0_165 = arith.constant 0 : index
    %230 = vector.load %arg18[%c128_164, %c0_165] : memref<192x256xbf16, #tpu.memory_space<vmem>>, vector<32x256xbf16>
    tpu.vector_store %arg18[%c128_164, %c0_165], %229 {strides = array<i32>} : memref<192x256xbf16, #tpu.memory_space<vmem>>, vector<32x256xbf16>,
    %c0_166 = arith.constant 0 : index
    %c0_167 = arith.constant 0 : index
    %231 = vector.load %arg18[%c0_166, %c0_167] : memref<192x256xbf16, #tpu.memory_space<vmem>>, vector<128x256xbf16>
    %c0_168 = arith.constant 0 : index
    %c0_169 = arith.constant 0 : index
    %c0_170 = arith.constant 0 : index
    %232 = vector.load %arg6[%c0_168, %c0_169, %c0_170] : memref<3x256x256xbf16, #tpu.memory_space<vmem>>, vector<1x256x256xbf16>
    %233 = vector.shape_cast %232 : vector<1x256x256xbf16> to vector<256x256xbf16>
    %cst_171 = arith.constant dense<0.000000e+00> : vector<128x256xf32>
    %234 = tpu.matmul %231, %233, %cst_171 {dimension_numbers = #tpu.dot_dimension_numbers<[1], [0], [0], [1], [0, 0, 1, 1], [], []>} : vector<128x256xbf16>, vector<256x256xbf16>, vector<128x256xf32> -> vector<128x256xf32>
    %c32_172 = arith.constant 32 : index
    %c0_173 = arith.constant 0 : index
    %235 = vector.load %arg18[%c32_172, %c0_173] : memref<192x256xbf16, #tpu.memory_space<vmem>>, vector<128x256xbf16>
    %c1_174 = arith.constant 1 : index
    %c0_175 = arith.constant 0 : index
    %c0_176 = arith.constant 0 : index
    %236 = vector.load %arg6[%c1_174, %c0_175, %c0_176] : memref<3x256x256xbf16, #tpu.memory_space<vmem>>, vector<1x256x256xbf16>
    %237 = vector.shape_cast %236 : vector<1x256x256xbf16> to vector<256x256xbf16>
    %cst_177 = arith.constant dense<0.000000e+00> : vector<128x256xf32>
    %238 = tpu.matmul %235, %237, %cst_177 {dimension_numbers = #tpu.dot_dimension_numbers<[1], [0], [0], [1], [0, 0, 1, 1], [], []>} : vector<128x256xbf16>, vector<256x256xbf16>, vector<128x256xf32> -> vector<128x256xf32>
    %239 = arith.addf %234, %238 : vector<128x256xf32>
    %c64_178 = arith.constant 64 : index
    %c0_179 = arith.constant 0 : index
    %240 = vector.load %arg18[%c64_178, %c0_179] : memref<192x256xbf16, #tpu.memory_space<vmem>>, vector<128x256xbf16>
    %c2_180 = arith.constant 2 : index
    %c0_181 = arith.constant 0 : index
    %c0_182 = arith.constant 0 : index
    %241 = vector.load %arg6[%c2_180, %c0_181, %c0_182] : memref<3x256x256xbf16, #tpu.memory_space<vmem>>, vector<1x256x256xbf16>
    %242 = vector.shape_cast %241 : vector<1x256x256xbf16> to vector<256x256xbf16>
    %cst_183 = arith.constant dense<0.000000e+00> : vector<128x256xf32>
    %243 = tpu.matmul %240, %242, %cst_183 {dimension_numbers = #tpu.dot_dimension_numbers<[1], [0], [0], [1], [0, 0, 1, 1], [], []>} : vector<128x256xbf16>, vector<256x256xbf16>, vector<128x256xf32> -> vector<128x256xf32>
    %244 = arith.addf %239, %243 : vector<128x256xf32>
    %245 = arith.truncf %244 : vector<128x256xf32> to vector<128x256xbf16>
    %c0_184 = arith.constant 0 : index
    %c0_185 = arith.constant 0 : index
    %246 = vector.load %arg19[%c0_184, %c0_185] : memref<128x256xbf16, #tpu.memory_space<vmem>>, vector<128x256xbf16>
    tpu.vector_store %arg19[%c0_184, %c0_185], %245 {strides = array<i32>} : memref<128x256xbf16, #tpu.memory_space<vmem>>, vector<128x256xbf16>,
    %c0_186 = arith.constant 0 : index
    %c0_187 = arith.constant 0 : index
    %247 = vector.load %arg19[%c0_186, %c0_187] : memref<128x256xbf16, #tpu.memory_space<vmem>>, vector<32x256xbf16>
    %c32_188 = arith.constant 32 : index
    %c0_189 = arith.constant 0 : index
    %248 = vector.load %arg19[%c32_188, %c0_189] : memref<128x256xbf16, #tpu.memory_space<vmem>>, vector<32x256xbf16>
    %249 = arith.maximumf %247, %248 : vector<32x256xbf16>
    %250 = vector.extract_strided_slice %249 {offsets = [0, 64], sizes = [32, 192], strides = [1, 1]} : vector<32x256xbf16> to vector<32x192xbf16>
    %cst_190 = arith.constant 0.000000e+00 : bf16
    %251 = vector.broadcast %cst_190 : bf16 to vector<32x64xbf16>
    %252 = tpu.concatenate %250, %251 in 1 : vector<32x192xbf16>, vector<32x64xbf16> -> vector<32x256xbf16>
    %253 = arith.maximumf %249, %252 : vector<32x256xbf16>
    %254 = arith.extf %253 : vector<32x256xbf16> to vector<32x256xf32>
    %c0_191 = arith.constant 0 : index
    %c0_192 = arith.constant 0 : index
    %255 = vector.load %arg7[%c0_191, %c0_192] : memref<1x256xf32, #tpu.memory_space<vmem>>, vector<1x256xf32>
    %256 = vector.broadcast %255 : vector<1x256xf32> to vector<32x256xf32>
    %257 = arith.addf %254, %256 : vector<32x256xf32>
    %cst_193 = arith.constant 0.000000e+00 : f32
    %258 = vector.broadcast %cst_193 : f32 to vector<32x256xf32>
    %259 = arith.maximumf %257, %258 : vector<32x256xf32>
    %260 = arith.truncf %259 : vector<32x256xf32> to vector<32x256xbf16>
    %c32_194 = arith.constant 32 : index
    %c0_195 = arith.constant 0 : index
    %261 = vector.load %arg20[%c32_194, %c0_195] : memref<128x256xbf16, #tpu.memory_space<vmem>>, vector<32x256xbf16>
    tpu.vector_store %arg20[%c32_194, %c0_195], %260 {strides = array<i32>} : memref<128x256xbf16, #tpu.memory_space<vmem>>, vector<32x256xbf16>,
    %c64_196 = arith.constant 64 : index
    %c0_197 = arith.constant 0 : index
    %262 = vector.load %arg19[%c64_196, %c0_197] : memref<128x256xbf16, #tpu.memory_space<vmem>>, vector<32x256xbf16>
    %c96_198 = arith.constant 96 : index
    %c0_199 = arith.constant 0 : index
    %263 = vector.load %arg19[%c96_198, %c0_199] : memref<128x256xbf16, #tpu.memory_space<vmem>>, vector<32x256xbf16>
    %264 = arith.maximumf %262, %263 : vector<32x256xbf16>
    %265 = vector.extract_strided_slice %264 {offsets = [0, 64], sizes = [32, 192], strides = [1, 1]} : vector<32x256xbf16> to vector<32x192xbf16>
    %cst_200 = arith.constant 0.000000e+00 : bf16
    %266 = vector.broadcast %cst_200 : bf16 to vector<32x64xbf16>
    %267 = tpu.concatenate %265, %266 in 1 : vector<32x192xbf16>, vector<32x64xbf16> -> vector<32x256xbf16>
    %268 = arith.maximumf %264, %267 : vector<32x256xbf16>
    %269 = arith.extf %268 : vector<32x256xbf16> to vector<32x256xf32>
    %c0_201 = arith.constant 0 : index
    %c0_202 = arith.constant 0 : index
    %270 = vector.load %arg7[%c0_201, %c0_202] : memref<1x256xf32, #tpu.memory_space<vmem>>, vector<1x256xf32>
    %271 = vector.broadcast %270 : vector<1x256xf32> to vector<32x256xf32>
    %272 = arith.addf %269, %271 : vector<32x256xf32>
    %cst_203 = arith.constant 0.000000e+00 : f32
    %273 = vector.broadcast %cst_203 : f32 to vector<32x256xf32>
    %274 = arith.maximumf %272, %273 : vector<32x256xf32>
    %275 = arith.truncf %274 : vector<32x256xf32> to vector<32x256xbf16>
    %c64_204 = arith.constant 64 : index
    %c0_205 = arith.constant 0 : index
    %276 = vector.load %arg20[%c64_204, %c0_205] : memref<128x256xbf16, #tpu.memory_space<vmem>>, vector<32x256xbf16>
    tpu.vector_store %arg20[%c64_204, %c0_205], %275 {strides = array<i32>} : memref<128x256xbf16, #tpu.memory_space<vmem>>, vector<32x256xbf16>,
    %c0_206 = arith.constant 0 : index
    %c0_207 = arith.constant 0 : index
    %277 = vector.load %arg20[%c0_206, %c0_207] : memref<128x256xbf16, #tpu.memory_space<vmem>>, vector<64x256xbf16>
    %c0_208 = arith.constant 0 : index
    %c0_209 = arith.constant 0 : index
    %c0_210 = arith.constant 0 : index
    %278 = vector.load %arg8[%c0_208, %c0_209, %c0_210] : memref<3x256x256xbf16, #tpu.memory_space<vmem>>, vector<1x256x256xbf16>
    %279 = vector.shape_cast %278 : vector<1x256x256xbf16> to vector<256x256xbf16>
    %cst_211 = arith.constant dense<0.000000e+00> : vector<64x256xf32>
    %280 = tpu.matmul %277, %279, %cst_211 {dimension_numbers = #tpu.dot_dimension_numbers<[1], [0], [0], [1], [0, 0, 1, 1], [], []>} : vector<64x256xbf16>, vector<256x256xbf16>, vector<64x256xf32> -> vector<64x256xf32>
    %c32_212 = arith.constant 32 : index
    %c0_213 = arith.constant 0 : index
    %281 = vector.load %arg20[%c32_212, %c0_213] : memref<128x256xbf16, #tpu.memory_space<vmem>>, vector<64x256xbf16>
    %c1_214 = arith.constant 1 : index
    %c0_215 = arith.constant 0 : index
    %c0_216 = arith.constant 0 : index
    %282 = vector.load %arg8[%c1_214, %c0_215, %c0_216] : memref<3x256x256xbf16, #tpu.memory_space<vmem>>, vector<1x256x256xbf16>
    %283 = vector.shape_cast %282 : vector<1x256x256xbf16> to vector<256x256xbf16>
    %cst_217 = arith.constant dense<0.000000e+00> : vector<64x256xf32>
    %284 = tpu.matmul %281, %283, %cst_217 {dimension_numbers = #tpu.dot_dimension_numbers<[1], [0], [0], [1], [0, 0, 1, 1], [], []>} : vector<64x256xbf16>, vector<256x256xbf16>, vector<64x256xf32> -> vector<64x256xf32>
    %285 = arith.addf %280, %284 : vector<64x256xf32>
    %c64_218 = arith.constant 64 : index
    %c0_219 = arith.constant 0 : index
    %286 = vector.load %arg20[%c64_218, %c0_219] : memref<128x256xbf16, #tpu.memory_space<vmem>>, vector<64x256xbf16>
    %c2_220 = arith.constant 2 : index
    %c0_221 = arith.constant 0 : index
    %c0_222 = arith.constant 0 : index
    %287 = vector.load %arg8[%c2_220, %c0_221, %c0_222] : memref<3x256x256xbf16, #tpu.memory_space<vmem>>, vector<1x256x256xbf16>
    %288 = vector.shape_cast %287 : vector<1x256x256xbf16> to vector<256x256xbf16>
    %cst_223 = arith.constant dense<0.000000e+00> : vector<64x256xf32>
    %289 = tpu.matmul %286, %288, %cst_223 {dimension_numbers = #tpu.dot_dimension_numbers<[1], [0], [0], [1], [0, 0, 1, 1], [], []>} : vector<64x256xbf16>, vector<256x256xbf16>, vector<64x256xf32> -> vector<64x256xf32>
    %290 = arith.addf %285, %289 : vector<64x256xf32>
    %291 = arith.truncf %290 : vector<64x256xf32> to vector<64x256xbf16>
    %c0_224 = arith.constant 0 : index
    %c0_225 = arith.constant 0 : index
    %292 = vector.load %arg21[%c0_224, %c0_225] : memref<64x256xbf16, #tpu.memory_space<vmem>>, vector<64x256xbf16>
    tpu.vector_store %arg21[%c0_224, %c0_225], %291 {strides = array<i32>} : memref<64x256xbf16, #tpu.memory_space<vmem>>, vector<64x256xbf16>,
    %c0_226 = arith.constant 0 : index
    %c0_227 = arith.constant 0 : index
    %293 = vector.load %arg21[%c0_226, %c0_227] : memref<64x256xbf16, #tpu.memory_space<vmem>>, vector<32x256xbf16>
    %c32_228 = arith.constant 32 : index
    %c0_229 = arith.constant 0 : index
    %294 = vector.load %arg21[%c32_228, %c0_229] : memref<64x256xbf16, #tpu.memory_space<vmem>>, vector<32x256xbf16>
    %295 = arith.maximumf %293, %294 : vector<32x256xbf16>
    %296 = vector.extract_strided_slice %295 {offsets = [0, 0], sizes = [32, 128], strides = [1, 1]} : vector<32x256xbf16> to vector<32x128xbf16>
    %297 = vector.extract_strided_slice %295 {offsets = [0, 128], sizes = [32, 128], strides = [1, 1]} : vector<32x256xbf16> to vector<32x128xbf16>
    %298 = arith.maximumf %296, %297 : vector<32x128xbf16>
    %299 = arith.extf %298 : vector<32x128xbf16> to vector<32x128xf32>
    %c0_230 = arith.constant 0 : index
    %c0_231 = arith.constant 0 : index
    %300 = vector.load %arg9[%c0_230, %c0_231] : memref<1x256xf32, #tpu.memory_space<vmem>>, vector<1x128xf32>
    %301 = vector.broadcast %300 : vector<1x128xf32> to vector<32x128xf32>
    %302 = arith.addf %299, %301 : vector<32x128xf32>
    %cst_232 = arith.constant 0.000000e+00 : f32
    %303 = vector.broadcast %cst_232 : f32 to vector<32x128xf32>
    %304 = arith.maximumf %302, %303 : vector<32x128xf32>
    %305 = arith.truncf %304 : vector<32x128xf32> to vector<32x128xbf16>
    %c0_233 = arith.constant 0 : index
    %c0_234 = arith.constant 0 : index
    %306 = vector.load %arg10[%c0_233, %c0_234] : memref<128x256xbf16, #tpu.memory_space<vmem>>, vector<128x256xbf16>
    %cst_235 = arith.constant dense<0.000000e+00> : vector<32x256xf32>
    %307 = tpu.matmul %305, %306, %cst_235 {dimension_numbers = #tpu.dot_dimension_numbers<[1], [0], [0], [1], [0, 0, 1, 1], [], []>} : vector<32x128xbf16>, vector<128x256xbf16>, vector<32x256xf32> -> vector<32x256xf32>
    %c0_236 = arith.constant 0 : index
    %c0_237 = arith.constant 0 : index
    %308 = vector.load %arg11[%c0_236, %c0_237] : memref<1x256xf32, #tpu.memory_space<vmem>>, vector<1x256xf32>
    %309 = vector.broadcast %308 : vector<1x256xf32> to vector<32x256xf32>
    %310 = arith.addf %307, %309 : vector<32x256xf32>
    %cst_238 = arith.constant 0.000000e+00 : f32
    %311 = vector.broadcast %cst_238 : f32 to vector<32x256xf32>
    %312 = arith.maximumf %310, %311 : vector<32x256xf32>
    %313 = arith.truncf %312 : vector<32x256xf32> to vector<32x256xbf16>
    %c0_239 = arith.constant 0 : index
    %c0_240 = arith.constant 0 : index
    %314 = vector.load %arg12[%c0_239, %c0_240] : memref<256x128xbf16, #tpu.memory_space<vmem>>, vector<256x128xbf16>
    %cst_241 = arith.constant dense<0.000000e+00> : vector<32x128xf32>
    %315 = tpu.matmul %313, %314, %cst_241 {dimension_numbers = #tpu.dot_dimension_numbers<[1], [0], [0], [1], [0, 0, 1, 1], [], []>} : vector<32x256xbf16>, vector<256x128xbf16>, vector<32x128xf32> -> vector<32x128xf32>
    %c0_242 = arith.constant 0 : index
    %c0_243 = arith.constant 0 : index
    %316 = vector.load %arg13[%c0_242, %c0_243] : memref<1x128xf32, #tpu.memory_space<vmem>>, vector<1x128xf32>
    %317 = vector.broadcast %316 : vector<1x128xf32> to vector<32x128xf32>
    %318 = arith.addf %315, %317 : vector<32x128xf32>
    %cst_244 = arith.constant dense<0xFF800000> : vector<32xf32>
    %319 = vector.multi_reduction <maximumf>, %318, %cst_244 [1] : vector<32x128xf32> to vector<32xf32>
    %320 = vector.shape_cast %319 : vector<32xf32> to vector<32x1xf32>
    %321 = vector.broadcast %320 : vector<32x1xf32> to vector<32x128xf32>
    %322 = arith.subf %318, %321 : vector<32x128xf32>
    %323 = math.exp %322 : vector<32x128xf32>
    %cst_245 = arith.constant dense<0.000000e+00> : vector<32xf32>
    %324 = vector.multi_reduction <add>, %323, %cst_245 [1] : vector<32x128xf32> to vector<32xf32>
    %325 = vector.shape_cast %324 : vector<32xf32> to vector<32x1xf32>
    %326 = math.log %325 : vector<32x1xf32>
    %327 = arith.addf %326, %320 : vector<32x1xf32>
    %328 = vector.broadcast %327 : vector<32x1xf32> to vector<32x128xf32>
    %329 = arith.subf %318, %328 : vector<32x128xf32>
    %c0_246 = arith.constant 0 : index
    %c0_247 = arith.constant 0 : index
    %330 = vector.load %arg14[%c0_246, %c0_247] : memref<32x128xf32, #tpu.memory_space<vmem>>, vector<32x128xf32>
    tpu.vector_store %arg14[%c0_246, %c0_247], %329 {strides = array<i32>} : memref<32x128xf32, #tpu.memory_space<vmem>>, vector<32x128xf32>,
    return
  }
  func.func @transform_0(%arg0: i32) -> (i32, i32) {
    %c0_i32 = arith.constant 0 : i32
    %c0_i32_0 = arith.constant 0 : i32
    return %arg0, %c0_i32 : i32, i32
  }
  func.func @transform_1(%arg0: i32) -> (i32, i32, i32) {
    %c0_i32 = arith.constant 0 : i32
    %c0_i32_0 = arith.constant 0 : i32
    %c0_i32_1 = arith.constant 0 : i32
    %c0_i32_2 = arith.constant 0 : i32
    return %c0_i32, %c0_i32_0, %c0_i32_1 : i32, i32, i32
  }
  func.func @transform_2(%arg0: i32) -> (i32, i32) {
    %c0_i32 = arith.constant 0 : i32
    %c0_i32_0 = arith.constant 0 : i32
    %c0_i32_1 = arith.constant 0 : i32
    return %c0_i32, %c0_i32_0 : i32, i32
  }
  func.func @transform_3(%arg0: i32) -> (i32, i32, i32) {
    %c0_i32 = arith.constant 0 : i32
    %c0_i32_0 = arith.constant 0 : i32
    %c0_i32_1 = arith.constant 0 : i32
    %c0_i32_2 = arith.constant 0 : i32
    return %c0_i32, %c0_i32_0, %c0_i32_1 : i32, i32, i32
  }
  func.func @transform_4(%arg0: i32) -> (i32, i32) {
    %c0_i32 = arith.constant 0 : i32
    %c0_i32_0 = arith.constant 0 : i32
    %c0_i32_1 = arith.constant 0 : i32
    return %c0_i32, %c0_i32_0 : i32, i32
  }
  func.func @transform_5(%arg0: i32) -> (i32, i32, i32) {
    %c0_i32 = arith.constant 0 : i32
    %c0_i32_0 = arith.constant 0 : i32
    %c0_i32_1 = arith.constant 0 : i32
    %c0_i32_2 = arith.constant 0 : i32
    return %c0_i32, %c0_i32_0, %c0_i32_1 : i32, i32, i32
  }
  func.func @transform_6(%arg0: i32) -> (i32, i32) {
    %c0_i32 = arith.constant 0 : i32
    %c0_i32_0 = arith.constant 0 : i32
    %c0_i32_1 = arith.constant 0 : i32
    return %c0_i32, %c0_i32_0 : i32, i32
  }
  func.func @transform_7(%arg0: i32) -> (i32, i32, i32) {
    %c0_i32 = arith.constant 0 : i32
    %c0_i32_0 = arith.constant 0 : i32
    %c0_i32_1 = arith.constant 0 : i32
    %c0_i32_2 = arith.constant 0 : i32
    return %c0_i32, %c0_i32_0, %c0_i32_1 : i32, i32, i32
  }
  func.func @transform_8(%arg0: i32) -> (i32, i32) {
    %c0_i32 = arith.constant 0 : i32
    %c0_i32_0 = arith.constant 0 : i32
    %c0_i32_1 = arith.constant 0 : i32
    return %c0_i32, %c0_i32_0 : i32, i32
  }
  func.func @transform_9(%arg0: i32) -> (i32, i32) {
    %c0_i32 = arith.constant 0 : i32
    %c0_i32_0 = arith.constant 0 : i32
    %c0_i32_1 = arith.constant 0 : i32
    return %c0_i32, %c0_i32_0 : i32, i32
  }
  func.func @transform_10(%arg0: i32) -> (i32, i32) {
    %c0_i32 = arith.constant 0 : i32
    %c0_i32_0 = arith.constant 0 : i32
    %c0_i32_1 = arith.constant 0 : i32
    return %c0_i32, %c0_i32_0 : i32, i32
  }
  func.func @transform_11(%arg0: i32) -> (i32, i32) {
    %c0_i32 = arith.constant 0 : i32
    %c0_i32_0 = arith.constant 0 : i32
    %c0_i32_1 = arith.constant 0 : i32
    return %c0_i32, %c0_i32_0 : i32, i32
  }
  func.func @transform_12(%arg0: i32) -> (i32, i32) {
    %c0_i32 = arith.constant 0 : i32
    %c0_i32_0 = arith.constant 0 : i32
    %c0_i32_1 = arith.constant 0 : i32
    return %c0_i32, %c0_i32_0 : i32, i32
  }
  func.func @transform_13(%arg0: i32) -> (i32, i32) {
    %c0_i32 = arith.constant 0 : i32
    %c0_i32_0 = arith.constant 0 : i32
    return %arg0, %c0_i32 : i32, i32
  }
}

</mosaic_0001>

<bundles_post_ra>
// kernel: _lambda_.1
= control target key start
LH: loop header
LB: loop body
LE: loop exit
PB: predicated region body
PF: predicated region fallthrough
CT: control target
= control target key end

     0   :  { %v14025_v1 = vmov 0   ;;  %vm340_vm0 = vcmask 392192   ;;  %s10945_s15 = smov 112   ;;  %vm3855_vm1 = vcmask 916480   ;;  %s10946_s25 = smov 96   ;;  %vm5867_vm2 = vcmask 785408   ;;  %s14011_s1 = inlined_call_operand.vmem [shape: bf16[5,48,256], index: 1, kind: input, shape index: {}]   ;;  %s14012_s0 = inlined_call_operand.vmem [shape: bf16[640,48], index: 0, kind: input, shape index: {}]   ;;  %s14013_s3 = inlined_call_operand.vmem [shape: bf16[3,256,256], index: 3, kind: input, shape index: {}]   ;;  %s14014_s2 = inlined_call_operand.vmem [shape: f32[1,256], index: 2, kind: input, shape index: {}]   ;;  %s14015_s5 = inlined_call_operand.vmem [shape: bf16[3,256,256], index: 5, kind: input, shape index: {}]   ;;  %s14016_s4 = inlined_call_operand.vmem [shape: f32[1,256], index: 4, kind: input, shape index: {}]   ;;  %s14017_s7 = inlined_call_operand.vmem [shape: bf16[3,256,256], index: 7, kind: input, shape index: {}]   ;;  %s14018_s6 = inlined_call_operand.vmem [shape: f32[1,256], index: 6, kind: input, shape index: {}]   ;;  %s14019_s9 = inlined_call_operand.vmem [shape: bf16[128,256], index: 9, kind: input, shape index: {}]   ;;  %s14020_s11 = inlined_call_operand.vmem [shape: bf16[256,128], index: 11, kind: input, shape index: {}]   ;;  %s14021_s8 = inlined_call_operand.vmem [shape: f32[1,256], index: 8, kind: input, shape index: {}]   ;;  %s14022_s10 = inlined_call_operand.vmem [shape: f32[1,256], index: 10, kind: input, shape index: {}]   ;;  %s14023_s12 = inlined_call_operand.vmem [shape: f32[1,128], index: 12, kind: input, shape index: {}]   ;;  %s14024_s13 = inlined_call_operand.vmem [shape: f32[32,128], index: 13, kind: output, shape index: {}]  }
   0x1   :  { %v10281_v0 = vld [vmem:[%s14011_s1 + $0x34] ss:$8 sps:$4 sm:$0xff]   ;;  %469 = vmatprep.mubr.bf16.mxu0 %v14025_v1  ;;  %3264 = vmatprep.mubr.bf16.mxu1 %v14025_v1  ;;  %v10283_v2 = vld [vmem:[%s14011_s1 + $0x30] ss:$8 sps:$4 sm:$0xff]   ;;  %v10284_v3 = vld [vmem:[%s14011_s1 + $0x44] ss:$8 sps:$4 sm:$0xff]  }
   0x2   :  { %437 = vmatprep.subr.bf16.mxu0 %v10281_v0  ;;  %v10286_v4 = vld [vmem:[%s14011_s1 + $0x40] ss:$8 sps:$4 sm:$0xff]   ;;  %v10287_v5 = vld [vmem:[%s14011_s1 + $0x54] ss:$8 sps:$4 sm:$0xff]   ;;  %v10289_v6 = vld [vmem:[%s14011_s1 + $0x50] ss:$8 sps:$4 sm:$0xff]  }
   0x3   :  { %438 = vmatpush1.bf16.msra.mxu0 %v10283_v2  ;;  %v10293_v7 = vld [vmem:[%s14011_s1 + $0x4] ss:$8 sps:$4 sm:$0xff]   ;;  %v11044_v8 = vld [vmem:[%s14012_s0 + $0x10] sm:$0xff]   ;;  %v10291_v9 = vld [vmem:[%s14011_s1] ss:$8 sps:$4 sm:$0xff]   ;;  %s10947_s29 = smov 64  }
   0x4   :  { %439 = vmatprep.subr.bf16.mxu0 %v10284_v3  ;;  %v10304_v10 = vld [vmem:[%s14011_s1 + $0x10] ss:$8 sps:$4 sm:$0xff]   ;;  %v10306_v11 = vld [vmem:[%s14011_s1 + $0x14] ss:$8 sps:$4 sm:$0xff]   ;;  %v11069_v13 = vld [vmem:[%s14012_s0 + $0x20] sm:$0xff]   ;;  %vm7214_vm3 = vcmask 523264  }
   0x5   :  { %v11061_v12 = vld [vmem:[%s14012_s0 + $0x18] sm:$0xff]   ;;  %v11077_v14 = vld [vmem:[%s14012_s0 + $0x28] sm:$0xff]   ;;  %v11085_v15 = vld [vmem:[%s14012_s0 + $0x30] sm:$0xff]  }
   0x6   :  { %v11093_v16 = vld [vmem:[%s14012_s0 + $0x38] sm:$0xff]   ;;  %v10318_v17 = vld [vmem:[%s14011_s1 + $0x20] ss:$8 sps:$4 sm:$0xff]   ;;  %v10320_v18 = vld [vmem:[%s14011_s1 + $0x24] ss:$8 sps:$4 sm:$0xff]  }
   0x7   :  { %440 = vmatpush1.bf16.msra.mxu0 %v10286_v4  ;;  %v11107_v19 = vld [vmem:[%s14012_s0 + $0x40] sm:$0xff]   ;;  %v11115_v20 = vld [vmem:[%s14012_s0 + $0x48] sm:$0xff]   ;;  %v11123_v21 = vld [vmem:[%s14012_s0 + $0x50] sm:$0xff]  }
   0x8   :  { %441 = vmatprep.subr.bf16.mxu0 %v10287_v5  ;;  %v11131_v22 = vld [vmem:[%s14012_s0 + $0x58] sm:$0xff]   ;;  %v11139_v23 = vld [vmem:[%s14012_s0 + $0x60] sm:$0xff]   ;;  %v11147_v24 = vld [vmem:[%s14012_s0 + $0x68] sm:$0xff]  }
   0x9   :  { %v11155_v25 = vld [vmem:[%s14012_s0 + $0x70] sm:$0xff]   ;;  %v11163_v26 = vld [vmem:[%s14012_s0 + $0x78] sm:$0xff]   ;;  %v11171_v27 = vld [vmem:[%s14012_s0 + $0x80] sm:$0xff]  }
   0xa   :  { %v11179_v28 = vld [vmem:[%s14012_s0 + $0x88] sm:$0xff]   ;;  %v11187_v29 = vld [vmem:[%s14012_s0 + $0x90] sm:$0xff]   ;;  %v11198_v31 = vld [vmem:[%s14012_s0 + $0x98] sm:$0xff]  }
   0xb   :  { %442 = vmatpush1.bf16.msra.mxu0 %v10289_v6  ;;  %v10334_v30 = vld [vmem:[%s14011_s1 + $0x64] ss:$8 sps:$4 sm:$0xff]   ;;  %v11222_v34 = vld [vmem:[%s14012_s0 + $0xb0] sm:$0xff]   ;;  %v11230_v35 = vld [vmem:[%s14012_s0 + $0xb8] sm:$0xff]  }
   0xc   :  { %836 = vmatprep.subr.bf16.mxu0 %v10293_v7  ;;  %v11206_v32 = vld [vmem:[%s14012_s0 + $0xa0] sm:$0xff]   ;;  %v11214_v33 = vld [vmem:[%s14012_s0 + $0xa8] sm:$0xff]   ;;  %v11254_v38 = vld [vmem:[%s14012_s0 + $0xd0] sm:$0xff]  }
   0xd   :  { %v11238_v36 = vld [vmem:[%s14012_s0 + $0xc0] sm:$0xff]   ;;  %v11246_v37 = vld [vmem:[%s14012_s0 + $0xc8] sm:$0xff]   ;;  %v11262_v39 = vld [vmem:[%s14012_s0 + $0xd8] sm:$0xff]  }
   0xe   :  { %8693 = vmatmul.mubr.msk.bf16.vlgmr.msra.gmra.mrb[0].mxu0 %vm340_vm0, %v11044_v8  ;;  %v11270_v40 = vld [vmem:[%s14012_s0 + $0xe0] sm:$0xff]   ;;  %v11278_v41 = vld [vmem:[%s14012_s0 + $0xe8] sm:$0xff]   ;;  %v11286_v42 = vld [vmem:[%s14012_s0 + $0xf0] sm:$0xff]  }
   0xf   :  { %837 = vmatpush1.bf16.msra.mxu0 %v10291_v9  ;;  %479 = vmatprep.mubr.bf16.mxu0 %v14025_v1  ;;  %v11294_v43 = vld [vmem:[%s14012_s0 + $0xf8] sm:$0xff]   ;;  %v10329_v44 = vld [vmem:[%s14012_s0 + $0x100] sm:$0xff]   ;;  %v10330_v45 = vld [vmem:[%s14012_s0 + $0x108] sm:$0xff]  }
  0x10   :  { %838 = vmatprep.subr.bf16.mxu0 %v10306_v11  ;;  %v10331_v46 = vld [vmem:[%s14012_s0] sm:$0xff]   ;;  %v10338_v48 = vld [vmem:[%s14011_s1 + $0x74] ss:$8 sps:$4 sm:$0xff]   ;;  %v10336_v49 = vld [vmem:[%s14011_s1 + $0x70] ss:$8 sps:$4 sm:$0xff]  }
  0x11   :  { %v10332_v47 = vld [vmem:[%s14011_s1 + $0x60] ss:$8 sps:$4 sm:$0xff]   ;;  %v10341_v52 = vld [vmem:[%s14011_s1 + $0x84] ss:$8 sps:$4 sm:$0xff]   ;;  %v10345_v53 = vld [vmem:[%s14011_s1 + $0x94] ss:$8 sps:$4 sm:$0xff]  }
  0x12   :  { %v10335_v50 = vld [vmem:[%s14012_s0 + $0x8] sm:$0xff]   ;;  %v10342_v54 = vld [vmem:[%s14012_s0 + $0x20] sm:$0xff]   ;;  %v10343_v55 = vld [vmem:[%s14011_s1 + $0x90] ss:$8 sps:$4 sm:$0xff]  }
  0x13   :  { %839 = vmatpush1.bf16.msra.mxu0 %v10304_v10  ;;  %v10339_v51 = vld [vmem:[%s14011_s1 + $0x80] ss:$8 sps:$4 sm:$0xff]   ;;  %v10358_v56 = vld [vmem:[%s14011_s1 + $0xa4] ss:$8 sps:$4 sm:$0xff]   ;;  %v10347_v59 = vld [vmem:[%s14012_s0 + $0x30] sm:$0xff]  }
  0x14   :  { %840 = vmatprep.subr.bf16.mxu0 %v10320_v18  ;;  %v10356_v57 = vld [vmem:[%s14011_s1 + $0xa0] ss:$8 sps:$4 sm:$0xff]   ;;  %v10348_v60 = vld [vmem:[%s14012_s0 + $0x38] sm:$0xff]   ;;  %v10351_v2 = vld [vmem:[%s14012_s0 + $0x50] sm:$0xff]  }
  0x15   :  { %v10346_v58 = vld [vmem:[%s14012_s0 + $0x28] sm:$0xff]   ;;  %v10349_v61 = vld [vmem:[%s14012_s0 + $0x40] sm:$0xff]   ;;  %v10370_v63 = vld [vmem:[%s14011_s1 + $0xb0] ss:$8 sps:$4 sm:$0xff]  }
  0x16   :  { %8694 = vmatmul.mubr.msk.bf16.gmra.mrb[4].mxu0 %vm340_vm0, %v11061_v12  ;;  %v10350_v62 = vld [vmem:[%s14012_s0 + $0x48] sm:$0xff]   ;;  %v10372_v0 = vld [vmem:[%s14011_s1 + $0xb4] ss:$8 sps:$4 sm:$0xff]   ;;  %v10353_v4 = vld [vmem:[%s14012_s0 + $0x60] sm:$0xff]  }
  0x17   :  { %489 = vmatprep.mubr.bf16.mxu0 %v14025_v1  ;;  %841 = vmatpush1.bf16.msra.mxu0 %v10318_v17  ;;  %v10352_v3 = vld [vmem:[%s14012_s0 + $0x58] sm:$0xff]   ;;  %v10354_v5 = vld [vmem:[%s14012_s0 + $0x68] sm:$0xff]   ;;  %v10355_v6 = vld [vmem:[%s14012_s0 + $0x70] sm:$0xff]  }
  0x18   :  { %1546 = vmatprep.subr.bf16.mxu0 %v10334_v30  ;;  %v10359_v7 = vld [vmem:[%s14012_s0 + $0x78] sm:$0xff]   ;;  %v10361_v9 = vld [vmem:[%s14012_s0 + $0x88] sm:$0xff]   ;;  %v10362_v10 = vld [vmem:[%s14012_s0 + $0x90] sm:$0xff]  }
  0x19   :  { %v10363_v11 = vld [vmem:[%s14012_s0 + $0x98] sm:$0xff]   ;;  %v11551_v17 = vld [vmem:[%s14011_s1 + $0xe4] ss:$8 sps:$4 sm:$0xff]   ;;  %v11556_v18 = vld [vmem:[%s14011_s1 + $0xe0] ss:$8 sps:$4 sm:$0xff]  }
  0x1a   :  { %v10404_v30 = vld [vmem:[%s14012_s0 + $0x70] sm:$0xff]  }
  0x1e   :  { %8695 = vmatmul.mubr.msk.bf16.gmra.mrb[8].mxu0 %vm340_vm0, %v11069_v13 }
  0x1f   :  { %499 = vmatprep.mubr.bf16.mxu0 %v14025_v1 }
  0x26   :  { %8696 = vmatmul.mubr.msk.bf16.gmra.mrb[12].mxu0 %vm340_vm0, %v11077_v14 }
  0x27   :  { %509 = vmatprep.mubr.bf16.mxu0 %v14025_v1 }
  0x2e   :  { %8697 = vmatmul.mubr.msk.bf16.gmra.mrb[16].mxu0 %vm340_vm0, %v11085_v15 }
  0x2f   :  { %519 = vmatprep.mubr.bf16.mxu0 %v14025_v1 }
  0x36   :  { %8698 = vmatmul.mubr.msk.bf16.gmra.mrb[20].mxu0 %vm340_vm0, %v11093_v16 }
  0x37   :  { %529 = vmatprep.mubr.bf16.mxu0 %v14025_v1 }
  0x3e   :  { %8699 = vmatmul.mubr.msk.bf16.gmra.mrb[24].mxu0 %vm340_vm0, %v11107_v19 }
  0x3f   :  { %539 = vmatprep.mubr.bf16.mxu0 %v14025_v1 }
  0x46   :  { %8700 = vmatmul.mubr.msk.bf16.gmra.mrb[28].mxu0 %vm340_vm0, %v11115_v20 }
  0x47   :  { %549 = vmatprep.mubr.bf16.mxu0 %v14025_v1 }
  0x4e   :  { %8701 = vmatmul.mubr.msk.bf16.gmra.mrb[32].mxu0 %vm340_vm0, %v11123_v21 }
  0x4f   :  { %559 = vmatprep.mubr.bf16.mxu0 %v14025_v1 }
  0x56   :  { %8702 = vmatmul.mubr.msk.bf16.gmra.mrb[36].mxu0 %vm340_vm0, %v11131_v22 }
  0x57   :  { %569 = vmatprep.mubr.bf16.mxu0 %v14025_v1 }
  0x5e   :  { %8703 = vmatmul.mubr.msk.bf16.gmra.mrb[40].mxu0 %vm340_vm0, %v11139_v23 }
  0x5f   :  { %579 = vmatprep.mubr.bf16.mxu0 %v14025_v1 }
  0x66   :  { %8704 = vmatmul.mubr.msk.bf16.gmra.mrb[44].mxu0 %vm340_vm0, %v11147_v24 }
  0x67   :  { %589 = vmatprep.mubr.bf16.mxu0 %v14025_v1 }
  0x6e   :  { %8705 = vmatmul.mubr.msk.bf16.gmra.mrb[48].mxu0 %vm340_vm0, %v11155_v25 }
  0x6f   :  { %599 = vmatprep.mubr.bf16.mxu0 %v14025_v1 }
  0x76   :  { %8706 = vmatmul.mubr.msk.bf16.gmra.mrb[52].mxu0 %vm340_vm0, %v11163_v26 }
  0x77   :  { %609 = vmatprep.mubr.bf16.mxu0 %v14025_v1 }
  0x7e   :  { %8707 = vmatmul.mubr.msk.bf16.gmra.mrb[56].mxu0 %vm340_vm0, %v11171_v27 }
  0x7f   :  { %619 = vmatprep.mubr.bf16.mxu0 %v14025_v1 }
  0x86   :  { %8708 = vmatmul.mubr.msk.bf16.gmra.mrb[60].mxu0 %vm340_vm0, %v11179_v28 }
  0x87   :  { %629 = vmatprep.mubr.bf16.mxu0 %v14025_v1 }
  0x8e   :  { %8709 = vmatmul.mubr.msk.bf16.gmra.mrb[64].mxu0 %vm340_vm0, %v11187_v29 }
  0x8f   :  { %639 = vmatprep.mubr.bf16.mxu0 %v14025_v1 }
  0x96   :  { %8710 = vmatmul.mubr.msk.bf16.gmra.mrb[68].mxu0 %vm340_vm0, %v11198_v31 }
  0x97   :  { %649 = vmatprep.mubr.bf16.mxu0 %v14025_v1 }
  0x9e   :  { %8711 = vmatmul.mubr.msk.bf16.gmra.mrb[72].mxu0 %vm340_vm0, %v11206_v32 }
  0x9f   :  { %659 = vmatprep.mubr.bf16.mxu0 %v14025_v1 }
  0xa6   :  { %8712 = vmatmul.mubr.msk.bf16.gmra.mrb[76].mxu0 %vm340_vm0, %v11214_v33 }
  0xa7   :  { %669 = vmatprep.mubr.bf16.mxu0 %v14025_v1 }
  0xae   :  { %8713 = vmatmul.mubr.msk.bf16.gmra.mrb[80].mxu0 %vm340_vm0, %v11222_v34 }
  0xaf   :  { %679 = vmatprep.mubr.bf16.mxu0 %v14025_v1 }
  0xb6   :  { %8714 = vmatmul.mubr.msk.bf16.gmra.mrb[84].mxu0 %vm340_vm0, %v11230_v35 }
  0xb7   :  { %689 = vmatprep.mubr.bf16.mxu0 %v14025_v1 }
  0xbe   :  { %8715 = vmatmul.mubr.msk.bf16.gmra.mrb[88].mxu0 %vm340_vm0, %v11238_v36 }
  0xbf   :  { %699 = vmatprep.mubr.bf16.mxu0 %v14025_v1 }
  0xc6   :  { %8716 = vmatmul.mubr.msk.bf16.gmra.mrb[92].mxu0 %vm340_vm0, %v11246_v37 }
  0xc7   :  { %709 = vmatprep.mubr.bf16.mxu0 %v14025_v1 }
  0xce   :  { %8717 = vmatmul.mubr.msk.bf16.gmra.mrb[96].mxu0 %vm340_vm0, %v11254_v38 }
  0xcf   :  { %719 = vmatprep.mubr.bf16.mxu0 %v14025_v1 }
  0xd6   :  { %8718 = vmatmul.mubr.msk.bf16.gmra.mrb[100].mxu0 %vm340_vm0, %v11262_v39 }
  0xd7   :  { %729 = vmatprep.mubr.bf16.mxu0 %v14025_v1 }
  0xde   :  { %8719 = vmatmul.mubr.msk.bf16.gmra.mrb[104].mxu0 %vm340_vm0, %v11270_v40 }
  0xdf   :  { %739 = vmatprep.mubr.bf16.mxu0 %v14025_v1 }
  0xe6   :  { %8720 = vmatmul.mubr.msk.bf16.gmra.mrb[108].mxu0 %vm340_vm0, %v11278_v41 }
  0xe7   :  { %749 = vmatprep.mubr.bf16.mxu0 %v14025_v1 }
  0xee   :  { %8721 = vmatmul.mubr.msk.bf16.gmra.mrb[112].mxu0 %vm340_vm0, %v11286_v42 }
  0xef   :  { %759 = vmatprep.mubr.bf16.mxu0 %v14025_v1 }
  0xf6   :  { %8722 = vmatmul.mubr.msk.bf16.gmra.mrb[116].mxu0 %vm340_vm0, %v11294_v43 }
  0xf7   :  { %769 = vmatprep.mubr.bf16.mxu0 %v14025_v1 }
  0xfe   :  { %8723 = vmatmul.mubr.msk.bf16.gmra.mrb[120].mxu0 %vm340_vm0, %v10329_v44  ;;  %v10418_v44 = vld [vmem:[%s14012_s0 + $0xa8] sm:$0xff]  }
  0xff   :  { %779 = vmatprep.mubr.bf16.mxu0 %v14025_v1 }
 0x106   :  { %8724 = vmatmul.mubr.msk.bf16.gmra.mrb[124].mxu0 %vm340_vm0, %v10330_v45  ;;  %v10381_v45 = vld [vmem:[%s14012_s0 + $0x110] sm:$0xff]  }
 0x107   :  { %868 = vmatprep.mubr.bf16.mxu0 %v14025_v1 }
 0x10e   :  { %8733 = vmatmul.mubr.msk.bf16.vlgmr.msra.gmra.mrb[0].mxu0 %vm340_vm0, %v10331_v46  ;;  %v10420_v46 = vld [vmem:[%s14012_s0 + $0xb0] sm:$0xff]  }
 0x10f   :  { %1547 = vmatpush1.bf16.msra.mxu0 %v10332_v47  ;;  %878 = vmatprep.mubr.bf16.mxu0 %v14025_v1  ;;  %v10382_v47 = vld [vmem:[%s14012_s0 + $0x118] sm:$0xff]  }
 0x110   :  { %1548 = vmatprep.subr.bf16.mxu0 %v10338_v48  ;;  %v10422_v48 = vld [vmem:[%s14012_s0 + $0xb8] sm:$0xff]  }
 0x113   :  { %1549 = vmatpush1.bf16.msra.mxu0 %v10336_v49  ;;  %v10386_v49 = vld [vmem:[%s14012_s0 + $0x30] sm:$0xff]  }
 0x114   :  { %1550 = vmatprep.subr.bf16.mxu0 %v10341_v52  ;;  %v10426_v52 = vld [vmem:[%s14012_s0 + $0xc8] sm:$0xff]  }
 0x116   :  { %8734 = vmatmul.mubr.msk.bf16.gmra.mrb[4].mxu0 %vm340_vm0, %v10335_v50  ;;  %v10424_v50 = vld [vmem:[%s14012_s0 + $0xc0] sm:$0xff]  }
 0x117   :  { %888 = vmatprep.mubr.bf16.mxu0 %v14025_v1  ;;  %1551 = vmatpush1.bf16.msra.mxu0 %v10339_v51  ;;  %v10393_v51 = vld [vmem:[%s14012_s0 + $0x38] sm:$0xff]  }
 0x118   :  { %2384 = vmatprep.subr.bf16.mxu0 %v10345_v53  ;;  %v10395_v53 = vld [vmem:[%s14012_s0 + $0x40] sm:$0xff]  }
 0x11e   :  { %8735 = vmatmul.mubr.msk.bf16.gmra.mrb[8].mxu0 %vm340_vm0, %v11044_v8  ;;  %v10360_v8 = vld [vmem:[%s14012_s0 + $0x80] sm:$0xff]  }
 0x11f   :  { %898 = vmatprep.mubr.bf16.mxu0 %v14025_v1 }
 0x126   :  { %8736 = vmatmul.mubr.msk.bf16.gmra.mrb[12].mxu0 %vm340_vm0, %v11061_v12  ;;  %v10383_v12 = vld [vmem:[%s14011_s1 + $0xc4] ss:$8 sps:$4 sm:$0xff]  }
 0x127   :  { %908 = vmatprep.mubr.bf16.mxu0 %v14025_v1  ;;  %9535 = vmatprep.subr.bf16.mxu1 %v10383_v12 }
 0x12e   :  { %8737 = vmatmul.mubr.msk.bf16.gmra.mrb[16].mxu0 %vm340_vm0, %v11069_v13  ;;  %v11527_v13 = vld [vmem:[%s14011_s1 + $0xc0] ss:$8 sps:$4 sm:$0xff]  }
 0x12f   :  { %918 = vmatprep.mubr.bf16.mxu0 %v14025_v1  ;;  %9538 = vmatpush1.bf16.msra.mxu1 %v11527_v13 }
 0x136   :  { %8738 = vmatmul.mubr.msk.bf16.gmra.mrb[20].mxu0 %vm340_vm0, %v11077_v14  ;;  %v10364_v14 = vld [vmem:[%s14012_s0 + $0xa0] sm:$0xff]  }
 0x137   :  { %928 = vmatprep.mubr.bf16.mxu0 %v14025_v1 }
 0x13e   :  { %8739 = vmatmul.mubr.msk.bf16.gmra.mrb[24].mxu0 %vm340_vm0, %v11085_v15  ;;  %v11537_v15 = vld [vmem:[%s14011_s1 + $0xd4] ss:$8 sps:$4 sm:$0xff]  }
 0x13f   :  { %938 = vmatprep.mubr.bf16.mxu0 %v14025_v1  ;;  %9536 = vmatprep.subr.bf16.mxu1 %v11537_v15 }
 0x146   :  { %8740 = vmatmul.mubr.msk.bf16.gmra.mrb[28].mxu0 %vm340_vm0, %v11093_v16  ;;  %v11542_v16 = vld [vmem:[%s14011_s1 + $0xd0] ss:$8 sps:$4 sm:$0xff]  }
 0x147   :  { %948 = vmatprep.mubr.bf16.mxu0 %v14025_v1  ;;  %9539 = vmatpush1.bf16.msra.mxu1 %v11542_v16 }
 0x148   :  { %9537 = vmatprep.subr.bf16.mxu1 %v11551_v17 }
 0x14b   :  { %9540 = vmatpush1.bf16.msra.mxu1 %v11556_v18 }
 0x14e   :  { %8741 = vmatmul.mubr.msk.bf16.gmra.mrb[32].mxu0 %vm340_vm0, %v11107_v19  ;;  %v10365_v19 = vld [vmem:[%s14012_s0 + $0xa8] sm:$0xff]  }
 0x14f   :  { %958 = vmatprep.mubr.bf16.mxu0 %v14025_v1 }
 0x156   :  { %8742 = vmatmul.mubr.msk.bf16.gmra.mrb[36].mxu0 %vm340_vm0, %v11115_v20  ;;  %v10394_v20 = vld [vmem:[%s14012_s0 + $0x48] sm:$0xff]  }
 0x157   :  { %968 = vmatprep.mubr.bf16.mxu0 %v14025_v1  ;;  %8962 = vmatmul.mubr.msk.bf16.vlgmr.msra.gmra.mrb[0].mxu1 %vm340_vm0, %v10394_v20 }
 0x158   :  { %3274 = vmatprep.mubr.bf16.mxu1 %v14025_v1 }
 0x15e   :  { %8743 = vmatmul.mubr.msk.bf16.gmra.mrb[40].mxu0 %vm340_vm0, %v11123_v21  ;;  %v10366_v21 = vld [vmem:[%s14012_s0 + $0xb0] sm:$0xff]  }
 0x15f   :  { %978 = vmatprep.mubr.bf16.mxu0 %v14025_v1 }
 0x166   :  { %8744 = vmatmul.mubr.msk.bf16.gmra.mrb[44].mxu0 %vm340_vm0, %v11131_v22  ;;  %v10396_v22 = vld [vmem:[%s14012_s0 + $0x50] sm:$0xff]  }
 0x167   :  { %988 = vmatprep.mubr.bf16.mxu0 %v14025_v1  ;;  %8963 = vmatmul.mubr.msk.bf16.gmra.mrb[4].mxu1 %vm340_vm0, %v10396_v22 }
 0x168   :  { %3284 = vmatprep.mubr.bf16.mxu1 %v14025_v1 }
 0x16e   :  { %8745 = vmatmul.mubr.msk.bf16.gmra.mrb[48].mxu0 %vm340_vm0, %v11139_v23  ;;  %v10367_v23 = vld [vmem:[%s14012_s0 + $0xb8] sm:$0xff]  }
 0x16f   :  { %998 = vmatprep.mubr.bf16.mxu0 %v14025_v1 }
 0x176   :  { %8746 = vmatmul.mubr.msk.bf16.gmra.mrb[52].mxu0 %vm340_vm0, %v11147_v24  ;;  %v10398_v24 = vld [vmem:[%s14012_s0 + $0x58] sm:$0xff]  }
 0x177   :  { %1008 = vmatprep.mubr.bf16.mxu0 %v14025_v1  ;;  %8964 = vmatmul.mubr.msk.bf16.gmra.mrb[8].mxu1 %vm340_vm0, %v10398_v24 }
 0x178   :  { %3294 = vmatprep.mubr.bf16.mxu1 %v14025_v1 }
 0x17e   :  { %8747 = vmatmul.mubr.msk.bf16.gmra.mrb[56].mxu0 %vm340_vm0, %v11155_v25  ;;  %v10368_v25 = vld [vmem:[%s14012_s0 + $0xc0] sm:$0xff]  }
 0x17f   :  { %1018 = vmatprep.mubr.bf16.mxu0 %v14025_v1 }
 0x186   :  { %8748 = vmatmul.mubr.msk.bf16.gmra.mrb[60].mxu0 %vm340_vm0, %v11163_v26  ;;  %v10400_v26 = vld [vmem:[%s14012_s0 + $0x60] sm:$0xff]  }
 0x187   :  { %1028 = vmatprep.mubr.bf16.mxu0 %v14025_v1  ;;  %8965 = vmatmul.mubr.msk.bf16.gmra.mrb[12].mxu1 %vm340_vm0, %v10400_v26 }
 0x188   :  { %3304 = vmatprep.mubr.bf16.mxu1 %v14025_v1 }
 0x18e   :  { %8749 = vmatmul.mubr.msk.bf16.gmra.mrb[64].mxu0 %vm340_vm0, %v11171_v27  ;;  %v10369_v27 = vld [vmem:[%s14012_s0 + $0xc8] sm:$0xff]  }
 0x18f   :  { %1038 = vmatprep.mubr.bf16.mxu0 %v14025_v1 }
 0x196   :  { %8750 = vmatmul.mubr.msk.bf16.gmra.mrb[68].mxu0 %vm340_vm0, %v11179_v28  ;;  %v10402_v28 = vld [vmem:[%s14012_s0 + $0x68] sm:$0xff]  }
 0x197   :  { %1048 = vmatprep.mubr.bf16.mxu0 %v14025_v1  ;;  %8966 = vmatmul.mubr.msk.bf16.gmra.mrb[16].mxu1 %vm340_vm0, %v10402_v28 }
 0x198   :  { %3314 = vmatprep.mubr.bf16.mxu1 %v14025_v1 }
 0x19e   :  { %8751 = vmatmul.mubr.msk.bf16.gmra.mrb[72].mxu0 %vm340_vm0, %v11187_v29  ;;  %v10373_v29 = vld [vmem:[%s14012_s0 + $0xd0] sm:$0xff]  }
 0x19f   :  { %1058 = vmatprep.mubr.bf16.mxu0 %v14025_v1  ;;  %8967 = vmatmul.mubr.msk.bf16.gmra.mrb[20].mxu1 %vm340_vm0, %v10404_v30 }
 0x1a0   :  { %3324 = vmatprep.mubr.bf16.mxu1 %v14025_v1 }
 0x1a6   :  { %8752 = vmatmul.mubr.msk.bf16.gmra.mrb[76].mxu0 %vm340_vm0, %v11198_v31  ;;  %v10374_v31 = vld [vmem:[%s14012_s0 + $0xd8] sm:$0xff]  }
 0x1a7   :  { %1068 = vmatprep.mubr.bf16.mxu0 %v14025_v1 }
 0x1ae   :  { %8753 = vmatmul.mubr.msk.bf16.gmra.mrb[80].mxu0 %vm340_vm0, %v11206_v32  ;;  %v10406_v32 = vld [vmem:[%s14012_s0 + $0x78] sm:$0xff]  }
 0x1af   :  { %1078 = vmatprep.mubr.bf16.mxu0 %v14025_v1  ;;  %8968 = vmatmul.mubr.msk.bf16.gmra.mrb[24].mxu1 %vm340_vm0, %v10406_v32 }
 0x1b0   :  { %3334 = vmatprep.mubr.bf16.mxu1 %v14025_v1 }
 0x1b6   :  { %8754 = vmatmul.mubr.msk.bf16.gmra.mrb[84].mxu0 %vm340_vm0, %v11214_v33  ;;  %v10375_v33 = vld [vmem:[%s14012_s0 + $0xe0] sm:$0xff]  }
 0x1b7   :  { %1088 = vmatprep.mubr.bf16.mxu0 %v14025_v1 }
 0x1be   :  { %8755 = vmatmul.mubr.msk.bf16.gmra.mrb[88].mxu0 %vm340_vm0, %v11222_v34  ;;  %v10408_v34 = vld [vmem:[%s14012_s0 + $0x80] sm:$0xff]  }
 0x1bf   :  { %1098 = vmatprep.mubr.bf16.mxu0 %v14025_v1  ;;  %8969 = vmatmul.mubr.msk.bf16.gmra.mrb[28].mxu1 %vm340_vm0, %v10408_v34 }
 0x1c0   :  { %3344 = vmatprep.mubr.bf16.mxu1 %v14025_v1 }
 0x1c6   :  { %8756 = vmatmul.mubr.msk.bf16.gmra.mrb[92].mxu0 %vm340_vm0, %v11230_v35  ;;  %v10376_v35 = vld [vmem:[%s14012_s0 + $0xe8] sm:$0xff]  }
 0x1c7   :  { %1108 = vmatprep.mubr.bf16.mxu0 %v14025_v1 }
 0x1ce   :  { %8757 = vmatmul.mubr.msk.bf16.gmra.mrb[96].mxu0 %vm340_vm0, %v11238_v36  ;;  %v10410_v36 = vld [vmem:[%s14012_s0 + $0x88] sm:$0xff]  }
 0x1cf   :  { %1118 = vmatprep.mubr.bf16.mxu0 %v14025_v1  ;;  %8970 = vmatmul.mubr.msk.bf16.gmra.mrb[32].mxu1 %vm340_vm0, %v10410_v36 }
 0x1d0   :  { %3354 = vmatprep.mubr.bf16.mxu1 %v14025_v1 }
 0x1d6   :  { %8758 = vmatmul.mubr.msk.bf16.gmra.mrb[100].mxu0 %vm340_vm0, %v11246_v37  ;;  %v10377_v37 = vld [vmem:[%s14012_s0 + $0xf0] sm:$0xff]  }
 0x1d7   :  { %1128 = vmatprep.mubr.bf16.mxu0 %v14025_v1 }
 0x1de   :  { %8759 = vmatmul.mubr.msk.bf16.gmra.mrb[104].mxu0 %vm340_vm0, %v11254_v38  ;;  %v10412_v38 = vld [vmem:[%s14012_s0 + $0x90] sm:$0xff]  }
 0x1df   :  { %1138 = vmatprep.mubr.bf16.mxu0 %v14025_v1  ;;  %8971 = vmatmul.mubr.msk.bf16.gmra.mrb[36].mxu1 %vm340_vm0, %v10412_v38 }
 0x1e0   :  { %3364 = vmatprep.mubr.bf16.mxu1 %v14025_v1 }
 0x1e6   :  { %8760 = vmatmul.mubr.msk.bf16.gmra.mrb[108].mxu0 %vm340_vm0, %v11262_v39  ;;  %v10378_v39 = vld [vmem:[%s14012_s0 + $0xf8] sm:$0xff]  }
 0x1e7   :  { %1148 = vmatprep.mubr.bf16.mxu0 %v14025_v1 }
 0x1ee   :  { %8761 = vmatmul.mubr.msk.bf16.gmra.mrb[112].mxu0 %vm340_vm0, %v11270_v40  ;;  %v10414_v40 = vld [vmem:[%s14012_s0 + $0x98] sm:$0xff]  }
 0x1ef   :  { %1158 = vmatprep.mubr.bf16.mxu0 %v14025_v1  ;;  %8972 = vmatmul.mubr.msk.bf16.gmra.mrb[40].mxu1 %vm340_vm0, %v10414_v40  ;;  %v10425_v40 = vld [vmem:[%s14012_s0 + $0xb8] sm:$0xff]  }
 0x1f0   :  { %3374 = vmatprep.mubr.bf16.mxu1 %v14025_v1 }
 0x1f6   :  { %8762 = vmatmul.mubr.msk.bf16.gmra.mrb[116].mxu0 %vm340_vm0, %v11278_v41  ;;  %v10379_v41 = vld [vmem:[%s14012_s0 + $0x100] sm:$0xff]  }
 0x1f7   :  { %1168 = vmatprep.mubr.bf16.mxu0 %v14025_v1 }
 0x1fe   :  { %8763 = vmatmul.mubr.msk.bf16.gmra.mrb[120].mxu0 %vm340_vm0, %v11286_v42  ;;  %v10416_v42 = vld [vmem:[%s14012_s0 + $0xa0] sm:$0xff]  }
 0x1ff   :  { %1178 = vmatprep.mubr.bf16.mxu0 %v14025_v1  ;;  %8973 = vmatmul.mubr.msk.bf16.gmra.mrb[44].mxu1 %vm340_vm0, %v10416_v42 }
 0x200   :  { %3384 = vmatprep.mubr.bf16.mxu1 %v14025_v1 }
 0x206   :  { %8764 = vmatmul.mubr.msk.bf16.gmra.mrb[124].mxu0 %vm340_vm0, %v11294_v43  ;;  %v10380_v43 = vld [vmem:[%s14012_s0 + $0x108] sm:$0xff]  }
 0x207   :  { %1578 = vmatprep.mubr.bf16.mxu0 %v14025_v1  ;;  %8974 = vmatmul.mubr.msk.bf16.gmra.mrb[48].mxu1 %vm340_vm0, %v10418_v44 }
 0x208   :  { %3394 = vmatprep.mubr.bf16.mxu1 %v14025_v1 }
 0x20e   :  { %8809 = vmatmul.mubr.msk.bf16.vlgmr.msra.gmra.mrb[0].mxu0 %vm340_vm0, %v10342_v54  ;;  %v10428_v54 = vld [vmem:[%s14012_s0 + $0xd0] sm:$0xff]  }
 0x20f   :  { %2385 = vmatpush1.bf16.msra.mxu0 %v10343_v55  ;;  %1588 = vmatprep.mubr.bf16.mxu0 %v14025_v1  ;;  %v10397_v55 = vld [vmem:[%s14012_s0 + $0x48] sm:$0xff]  }
 0x210   :  { %2386 = vmatprep.subr.bf16.mxu0 %v10358_v56  ;;  %8975 = vmatmul.mubr.msk.bf16.gmra.mrb[52].mxu1 %vm340_vm0, %v10420_v46  ;;  %v10430_v56 = vld [vmem:[%s14012_s0 + $0xd8] sm:$0xff]  }
 0x211   :  { %3404 = vmatprep.mubr.bf16.mxu1 %v14025_v1 }
 0x213   :  { %2387 = vmatpush1.bf16.msra.mxu0 %v10356_v57  ;;  %v10399_v57 = vld [vmem:[%s14012_s0 + $0x50] sm:$0xff]  }
 0x214   :  { %2388 = vmatprep.subr.bf16.mxu0 %v10372_v0  ;;  %v10438_v0 = vld [vmem:[%s14012_s0 + $0xf8] sm:$0xff]  }
 0x216   :  { %8810 = vmatmul.mubr.msk.bf16.gmra.mrb[4].mxu0 %vm340_vm0, %v10346_v58  ;;  %v10432_v58 = vld [vmem:[%s14012_s0 + $0xe0] sm:$0xff]  }
 0x217   :  { %1598 = vmatprep.mubr.bf16.mxu0 %v14025_v1  ;;  %2389 = vmatpush1.bf16.msra.mxu0 %v10370_v63  ;;  %v10405_v63 = vld [vmem:[%s14012_s0 + $0x68] sm:$0xff]  }
 0x218   :  { %3222 = vmatprep.subr.bf16.mxu0 %v10383_v12  ;;  %8976 = vmatmul.mubr.msk.bf16.gmra.mrb[56].mxu1 %vm340_vm0, %v10422_v48 }
 0x219   :  { %3414 = vmatprep.mubr.bf16.mxu1 %v14025_v1 }
 0x21e   :  { %8811 = vmatmul.mubr.msk.bf16.gmra.mrb[8].mxu0 %vm340_vm0, %v10347_v59  ;;  %v10401_v59 = vld [vmem:[%s14012_s0 + $0x58] sm:$0xff]  }
 0x21f   :  { %1608 = vmatprep.mubr.bf16.mxu0 %v14025_v1 }
 0x220   :  { %8977 = vmatmul.mubr.msk.bf16.gmra.mrb[60].mxu1 %vm340_vm0, %v10424_v50  ;;  %v10429_v50 = vld [vmem:[%s14012_s0 + $0xc8] sm:$0xff]  }
 0x221   :  { %3424 = vmatprep.mubr.bf16.mxu1 %v14025_v1 }
 0x226   :  { %8812 = vmatmul.mubr.msk.bf16.gmra.mrb[12].mxu0 %vm340_vm0, %v10348_v60  ;;  %v10434_v60 = vld [vmem:[%s14012_s0 + $0xe8] sm:$0xff]  }
 0x227   :  { %1618 = vmatprep.mubr.bf16.mxu0 %v14025_v1 }
 0x228   :  { %8978 = vmatmul.mubr.msk.bf16.gmra.mrb[64].mxu1 %vm340_vm0, %v10426_v52 }
 0x229   :  { %3434 = vmatprep.mubr.bf16.mxu1 %v14025_v1 }
 0x22e   :  { %8813 = vmatmul.mubr.msk.bf16.gmra.mrb[16].mxu0 %vm340_vm0, %v10349_v61  ;;  %v10403_v61 = vld [vmem:[%s14012_s0 + $0x60] sm:$0xff]  }
 0x22f   :  { %1628 = vmatprep.mubr.bf16.mxu0 %v14025_v1 }
 0x230   :  { %8979 = vmatmul.mubr.msk.bf16.gmra.mrb[68].mxu1 %vm340_vm0, %v10428_v54 }
 0x231   :  { %3444 = vmatprep.mubr.bf16.mxu1 %v14025_v1 }
 0x236   :  { %8814 = vmatmul.mubr.msk.bf16.gmra.mrb[20].mxu0 %vm340_vm0, %v10350_v62  ;;  %v10436_v62 = vld [vmem:[%s14012_s0 + $0xf0] sm:$0xff]  }
 0x237   :  { %1638 = vmatprep.mubr.bf16.mxu0 %v14025_v1 }
 0x238   :  { %8980 = vmatmul.mubr.msk.bf16.gmra.mrb[72].mxu1 %vm340_vm0, %v10430_v56 }
 0x239   :  { %3454 = vmatprep.mubr.bf16.mxu1 %v14025_v1 }
 0x23e   :  { %8815 = vmatmul.mubr.msk.bf16.gmra.mrb[24].mxu0 %vm340_vm0, %v10351_v2  ;;  %v10407_v2 = vld [vmem:[%s14012_s0 + $0x70] sm:$0xff]  }
 0x23f   :  { %1648 = vmatprep.mubr.bf16.mxu0 %v14025_v1 }
 0x240   :  { %8981 = vmatmul.mubr.msk.bf16.gmra.mrb[76].mxu1 %vm340_vm0, %v10432_v58 }
 0x241   :  { %3464 = vmatprep.mubr.bf16.mxu1 %v14025_v1 }
 0x246   :  { %8816 = vmatmul.mubr.msk.bf16.gmra.mrb[28].mxu0 %vm340_vm0, %v10352_v3  ;;  %v10440_v3 = vld [vmem:[%s14012_s0 + $0x100] sm:$0xff]  }
 0x247   :  { %1658 = vmatprep.mubr.bf16.mxu0 %v14025_v1 }
 0x248   :  { %8982 = vmatmul.mubr.msk.bf16.gmra.mrb[80].mxu1 %vm340_vm0, %v10434_v60  ;;  %v10433_v60 = vld [vmem:[%s14012_s0 + $0xd8] sm:$0xff]  }
 0x249   :  { %3474 = vmatprep.mubr.bf16.mxu1 %v14025_v1 }
 0x24e   :  { %8817 = vmatmul.mubr.msk.bf16.gmra.mrb[32].mxu0 %vm340_vm0, %v10353_v4  ;;  %v10409_v4 = vld [vmem:[%s14012_s0 + $0x78] sm:$0xff]  }
 0x24f   :  { %1668 = vmatprep.mubr.bf16.mxu0 %v14025_v1 }
 0x250   :  { %8983 = vmatmul.mubr.msk.bf16.gmra.mrb[84].mxu1 %vm340_vm0, %v10436_v62 }
 0x251   :  { %3484 = vmatprep.mubr.bf16.mxu1 %v14025_v1 }
 0x256   :  { %8818 = vmatmul.mubr.msk.bf16.gmra.mrb[36].mxu0 %vm340_vm0, %v10354_v5  ;;  %v10442_v5 = vld [vmem:[%s14012_s0 + $0x108] sm:$0xff]  }
 0x257   :  { %1678 = vmatprep.mubr.bf16.mxu0 %v14025_v1 }
 0x258   :  { %8984 = vmatmul.mubr.msk.bf16.gmra.mrb[88].mxu1 %vm340_vm0, %v10438_v0 }
 0x259   :  { %3494 = vmatprep.mubr.bf16.mxu1 %v14025_v1 }
 0x25e   :  { %8819 = vmatmul.mubr.msk.bf16.gmra.mrb[40].mxu0 %vm340_vm0, %v10355_v6  ;;  %v10411_v6 = vld [vmem:[%s14012_s0 + $0x80] sm:$0xff]  }
 0x25f   :  { %1688 = vmatprep.mubr.bf16.mxu0 %v14025_v1 }
 0x260   :  { %8985 = vmatmul.mubr.msk.bf16.gmra.mrb[92].mxu1 %vm340_vm0, %v10440_v3 }
 0x261   :  { %3504 = vmatprep.mubr.bf16.mxu1 %v14025_v1 }
 0x266   :  { %8820 = vmatmul.mubr.msk.bf16.gmra.mrb[44].mxu0 %vm340_vm0, %v10359_v7  ;;  %v10444_v7 = vld [vmem:[%s14012_s0 + $0x110] sm:$0xff]  }
 0x267   :  { %1698 = vmatprep.mubr.bf16.mxu0 %v14025_v1 }
 0x268   :  { %8986 = vmatmul.mubr.msk.bf16.gmra.mrb[96].mxu1 %vm340_vm0, %v10442_v5 }
 0x269   :  { %3514 = vmatprep.mubr.bf16.mxu1 %v14025_v1 }
 0x26e   :  { %8821 = vmatmul.mubr.msk.bf16.gmra.mrb[48].mxu0 %vm340_vm0, %v10360_v8  ;;  %v10413_v8 = vld [vmem:[%s14012_s0 + $0x88] sm:$0xff]  }
 0x26f   :  { %1708 = vmatprep.mubr.bf16.mxu0 %v14025_v1 }
 0x270   :  { %8987 = vmatmul.mubr.msk.bf16.gmra.mrb[100].mxu1 %vm340_vm0, %v10444_v7  ;;  %v10437_v7 = vld [vmem:[%s14012_s0 + $0xe8] sm:$0xff]  }
 0x271   :  { %3524 = vmatprep.mubr.bf16.mxu1 %v14025_v1 }
 0x276   :  { %8822 = vmatmul.mubr.msk.bf16.gmra.mrb[52].mxu0 %vm340_vm0, %v10361_v9  ;;  %v10446_v9 = vld [vmem:[%s14012_s0 + $0x118] sm:$0xff]  }
 0x277   :  { %1718 = vmatprep.mubr.bf16.mxu0 %v14025_v1 }
 0x278   :  { %8988 = vmatmul.mubr.msk.bf16.gmra.mrb[104].mxu1 %vm340_vm0, %v10446_v9 }
 0x279   :  { %3534 = vmatprep.mubr.bf16.mxu1 %v14025_v1 }
 0x27e   :  { %8823 = vmatmul.mubr.msk.bf16.gmra.mrb[56].mxu0 %vm340_vm0, %v10362_v10  ;;  %v11835_v10 = vpop.f32.mrb[0].mxu1 }
 0x27f   :  { %1728 = vmatprep.mubr.bf16.mxu0 %v14025_v1  ;;  %v11840_v12 = vpop.f32.mrb[1].mxu1 }
 0x286   :  { %8824 = vmatmul.mubr.msk.bf16.gmra.mrb[60].mxu0 %vm340_vm0, %v10363_v11  ;;  %v10415_v11 = vld [vmem:[%s14012_s0 + $0x90] sm:$0xff]  }
 0x287   :  { %1738 = vmatprep.mubr.bf16.mxu0 %v14025_v1 }
 0x28e   :  { %8825 = vmatmul.mubr.msk.bf16.gmra.mrb[64].mxu0 %vm340_vm0, %v10364_v14 }
 0x28f   :  { %1748 = vmatprep.mubr.bf16.mxu0 %v14025_v1 }
 0x296   :  { %8826 = vmatmul.mubr.msk.bf16.gmra.mrb[68].mxu0 %vm340_vm0, %v10365_v19 }
 0x297   :  { %1758 = vmatprep.mubr.bf16.mxu0 %v14025_v1 }
 0x29e   :  { %8827 = vmatmul.mubr.msk.bf16.gmra.mrb[72].mxu0 %vm340_vm0, %v10366_v21  ;;  %v10450_v21 = vld [vmem:[%s14012_s0 + $0x128] sm:$0xff]  }
 0x29f   :  { %1768 = vmatprep.mubr.bf16.mxu0 %v14025_v1 }
 0x2a6   :  { %8828 = vmatmul.mubr.msk.bf16.gmra.mrb[76].mxu0 %vm340_vm0, %v10367_v23  ;;  %v10419_v23 = vld [vmem:[%s14012_s0 + $0xa0] sm:$0xff]  }
 0x2a7   :  { %1778 = vmatprep.mubr.bf16.mxu0 %v14025_v1 }
 0x2ae   :  { %8829 = vmatmul.mubr.msk.bf16.gmra.mrb[80].mxu0 %vm340_vm0, %v10368_v25 }
 0x2af   :  { %1788 = vmatprep.mubr.bf16.mxu0 %v14025_v1 }
 0x2b6   :  { %8830 = vmatmul.mubr.msk.bf16.gmra.mrb[84].mxu0 %vm340_vm0, %v10369_v27  ;;  %v10452_v27 = vld [vmem:[%s14012_s0 + $0x130] sm:$0xff]  }
 0x2b7   :  { %1798 = vmatprep.mubr.bf16.mxu0 %v14025_v1 }
 0x2be   :  { %8831 = vmatmul.mubr.msk.bf16.gmra.mrb[88].mxu0 %vm340_vm0, %v10373_v29  ;;  %v10421_v29 = vld [vmem:[%s14012_s0 + $0xa8] sm:$0xff]  }
 0x2bf   :  { %1808 = vmatprep.mubr.bf16.mxu0 %v14025_v1 }
 0x2c6   :  { %8832 = vmatmul.mubr.msk.bf16.gmra.mrb[92].mxu0 %vm340_vm0, %v10374_v31 }
 0x2c7   :  { %1818 = vmatprep.mubr.bf16.mxu0 %v14025_v1 }
 0x2ce   :  { %8833 = vmatmul.mubr.msk.bf16.gmra.mrb[96].mxu0 %vm340_vm0, %v10375_v33  ;;  %v10454_v33 = vld [vmem:[%s14012_s0 + $0x138] sm:$0xff]  }
 0x2cf   :  { %1828 = vmatprep.mubr.bf16.mxu0 %v14025_v1 }
 0x2d6   :  { %8834 = vmatmul.mubr.msk.bf16.gmra.mrb[100].mxu0 %vm340_vm0, %v10376_v35  ;;  %v10423_v35 = vld [vmem:[%s14012_s0 + $0xb0] sm:$0xff]  }
 0x2d7   :  { %1838 = vmatprep.mubr.bf16.mxu0 %v14025_v1 }
 0x2de   :  { %8835 = vmatmul.mubr.msk.bf16.gmra.mrb[104].mxu0 %vm340_vm0, %v10377_v37 }
 0x2df   :  { %1848 = vmatprep.mubr.bf16.mxu0 %v14025_v1 }
 0x2e6   :  { %8836 = vmatmul.mubr.msk.bf16.gmra.mrb[108].mxu0 %vm340_vm0, %v10378_v39 }
 0x2e7   :  { %1858 = vmatprep.mubr.bf16.mxu0 %v14025_v1 }
 0x2ee   :  { %8837 = vmatmul.mubr.msk.bf16.gmra.mrb[112].mxu0 %vm340_vm0, %v10379_v41 }
 0x2ef   :  { %1868 = vmatprep.mubr.bf16.mxu0 %v14025_v1 }
 0x2f6   :  { %8838 = vmatmul.mubr.msk.bf16.gmra.mrb[116].mxu0 %vm340_vm0, %v10380_v43 }
 0x2f7   :  { %1878 = vmatprep.mubr.bf16.mxu0 %v14025_v1 }
 0x2fe   :  { %8839 = vmatmul.mubr.msk.bf16.gmra.mrb[120].mxu0 %vm340_vm0, %v10381_v45  ;;  %v10427_v45 = vld [vmem:[%s14012_s0 + $0xc0] sm:$0xff]  }
 0x2ff   :  { %1888 = vmatprep.mubr.bf16.mxu0 %v14025_v1 }
 0x306   :  { %8840 = vmatmul.mubr.msk.bf16.gmra.mrb[124].mxu0 %vm340_vm0, %v10382_v47 }
 0x307   :  { %2416 = vmatprep.mubr.bf16.mxu0 %v14025_v1 }
 0x30e   :  { %8885 = vmatmul.mubr.msk.bf16.vlgmr.msra.gmra.mrb[0].mxu0 %vm340_vm0, %v10386_v49 }
 0x30f   :  { %3223 = vmatpush1.bf16.msra.mxu0 %v11527_v13  ;;  %2426 = vmatprep.mubr.bf16.mxu0 %v14025_v1  ;;  %v11842_v13 = vpop.f32.mrb[2].mxu1 }
 0x310   :  { %3224 = vmatprep.subr.bf16.mxu0 %v11537_v15  ;;  %v11844_v14 = vpop.f32.mrb[3].mxu1  ;;  %v10448_v15 = vld [vmem:[%s14012_s0 + $0x120] sm:$0xff]  }
 0x311   :  { %8989 = vmatmul.mubr.msk.bf16.gmra.mrb[108].mxu1 %vm340_vm0, %v10448_v15 }
 0x312   :  { %3544 = vmatprep.mubr.bf16.mxu1 %v14025_v1 }
 0x313   :  { %3225 = vmatpush1.bf16.msra.mxu0 %v11542_v16  ;;  %v11853_v16 = vpop.f32.mrb[4].mxu1 }
 0x314   :  { %3226 = vmatprep.subr.bf16.mxu0 %v11551_v17  ;;  %v10417_v17 = vld [vmem:[%s14012_s0 + $0x98] sm:$0xff]  }
 0x316   :  { %8886 = vmatmul.mubr.msk.bf16.gmra.mrb[4].mxu0 %vm340_vm0, %v10393_v51 }
 0x317   :  { %2436 = vmatprep.mubr.bf16.mxu0 %v14025_v1  ;;  %3227 = vmatpush1.bf16.msra.mxu0 %v11556_v18  ;;  %v11858_v18 = vpop.f32.mrb[5].mxu1 }
 0x318   :  { %v11860_v19 = vpop.f32.mrb[6].mxu1 }
 0x319   :  { %v11862_v20 = vpop.f32.mrb[7].mxu1  ;;  %8990 = vmatmul.mubr.msk.bf16.gmra.mrb[112].mxu1 %vm340_vm0, %v10450_v21 }
 0x31a   :  { %3554 = vmatprep.mubr.bf16.mxu1 %v14025_v1  ;;  %v11871_v22 = vpop.f32.mrb[8].mxu1 }
 0x31b   :  { %v11876_v24 = vpop.f32.mrb[9].mxu1 }
 0x31c   :  { %v11878_v25 = vpop.f32.mrb[10].mxu1 }
 0x31d   :  { %v11880_v26 = vpop.f32.mrb[11].mxu1 }
 0x31e   :  { %8887 = vmatmul.mubr.msk.bf16.gmra.mrb[8].mxu0 %vm340_vm0, %v10395_v53  ;;  %v11889_v28 = vpop.f32.mrb[12].mxu1 }
 0x31f   :  { %2446 = vmatprep.mubr.bf16.mxu0 %v14025_v1  ;;  %v11894_v30 = vpop.f32.mrb[13].mxu1 }
 0x320   :  { %v11896_v31 = vpop.f32.mrb[14].mxu1 }
 0x321   :  { %8991 = vmatmul.mubr.msk.bf16.gmra.mrb[116].mxu1 %vm340_vm0, %v10452_v27  ;;  %v11898_v32 = vpop.f32.mrb[15].mxu1 }
 0x322   :  { %3564 = vmatprep.mubr.bf16.mxu1 %v14025_v1  ;;  %v11906_v34 = vpop.f32.mrb[16].mxu1 }
 0x323   :  { %v11911_v36 = vpop.f32.mrb[17].mxu1 }
 0x324   :  { %v11913_v37 = vpop.f32.mrb[18].mxu1 }
 0x325   :  { %v11915_v38 = vpop.f32.mrb[19].mxu1 }
 0x326   :  { %8888 = vmatmul.mubr.msk.bf16.gmra.mrb[12].mxu0 %vm340_vm0, %v10397_v55  ;;  %v11919_v39 = vpop.f32.mrb[20].mxu1  ;;  %v10431_v55 = vld [vmem:[%s14012_s0 + $0xd0] sm:$0xff]  }
 0x327   :  { %2456 = vmatprep.mubr.bf16.mxu0 %v14025_v1  ;;  %v11924_v41 = vpop.f32.mrb[21].mxu1 }
 0x328   :  { %v11926_v42 = vpop.f32.mrb[22].mxu1 }
 0x329   :  { %8992 = vmatmul.mubr.msk.bf16.gmra.mrb[120].mxu1 %vm340_vm0, %v10454_v33  ;;  %v11928_v43 = vpop.f32.mrb[23].mxu1  ;;  %v10441_v33 = vld [vmem:[%s14012_s0 + $0xf8] sm:$0xff]  }
 0x32a   :  { %v11932_v44 = vpop.f32.mrb[24].mxu1 }
 0x32b   :  { %v11937_v46 = vpop.f32.mrb[25].mxu1 }
 0x32c   :  { %v11939_v47 = vpop.f32.mrb[26].mxu1 }
 0x32d   :  { %v11941_v48 = vpop.f32.mrb[27].mxu1 }
 0x32e   :  { %8889 = vmatmul.mubr.msk.bf16.gmra.mrb[16].mxu0 %vm340_vm0, %v10399_v57  ;;  %v11945_v49 = vpop.f32.mrb[28].mxu1 }
 0x32f   :  { %2466 = vmatprep.mubr.bf16.mxu0 %v14025_v1  ;;  %v11950_v51 = vpop.f32.mrb[29].mxu1 }
 0x330   :  { %v11952_v52 = vpop.f32.mrb[30].mxu1 }
 0x331   :  { %v11954_v53 = vpop.f32.mrb[31].mxu1 }
 0x332   :  { %v11958_v54 = vpop.f32.mrb[32].mxu1 }
 0x333   :  { %v11963_v56 = vpop.f32.mrb[33].mxu1 }
 0x334   :  { %v11965_v57 = vpop.f32.mrb[34].mxu1 }
 0x335   :  { %v11967_v58 = vpop.f32.mrb[35].mxu1 }
 0x336   :  { %8890 = vmatmul.mubr.msk.bf16.gmra.mrb[20].mxu0 %vm340_vm0, %v10401_v59  ;;  %v11971_v59 = vpop.f32.mrb[36].mxu1 }
 0x337   :  { %2476 = vmatprep.mubr.bf16.mxu0 %v14025_v1 }
 0x33e   :  { %8891 = vmatmul.mubr.msk.bf16.gmra.mrb[24].mxu0 %vm340_vm0, %v10403_v61  ;;  %v11976_v61 = vpop.f32.mrb[37].mxu1 }
 0x33f   :  { %2486 = vmatprep.mubr.bf16.mxu0 %v14025_v1  ;;  %v11978_v62 = vpop.f32.mrb[38].mxu1 }
 0x346   :  { %8892 = vmatmul.mubr.msk.bf16.gmra.mrb[28].mxu0 %vm340_vm0, %v10405_v63  ;;  %v11980_v63 = vpop.f32.mrb[39].mxu1 }
 0x347   :  { %2496 = vmatprep.mubr.bf16.mxu0 %v14025_v1  ;;  %v11984_v0 = vpop.f32.mrb[40].mxu1 }
 0x348   :  { %v11989_v3 = vpop.f32.mrb[41].mxu1 }
 0x34e   :  { %8893 = vmatmul.mubr.msk.bf16.gmra.mrb[32].mxu0 %vm340_vm0, %v10407_v2  ;;  %v10435_v2 = vld [vmem:[%s14012_s0 + $0xe0] sm:$0xff]  }
 0x34f   :  { %2506 = vmatprep.mubr.bf16.mxu0 %v14025_v1 }
 0x356   :  { %8894 = vmatmul.mubr.msk.bf16.gmra.mrb[36].mxu0 %vm340_vm0, %v10409_v4  ;;  %v11991_v4 = vpop.f32.mrb[42].mxu1 }
 0x357   :  { %2516 = vmatprep.mubr.bf16.mxu0 %v14025_v1  ;;  %v11993_v5 = vpop.f32.mrb[43].mxu1 }
 0x35e   :  { %8895 = vmatmul.mubr.msk.bf16.gmra.mrb[40].mxu0 %vm340_vm0, %v10411_v6  ;;  %v11997_v6 = vpop.f32.mrb[44].mxu1 }
 0x35f   :  { %2526 = vmatprep.mubr.bf16.mxu0 %v14025_v1 }
 0x366   :  { %8896 = vmatmul.mubr.msk.bf16.gmra.mrb[44].mxu0 %vm340_vm0, %v10413_v8  ;;  %v12002_v8 = vpop.f32.mrb[45].mxu1 }
 0x367   :  { %2536 = vmatprep.mubr.bf16.mxu0 %v14025_v1  ;;  %v12004_v9 = vpop.f32.mrb[46].mxu1 }
 0x36e   :  { %8897 = vmatmul.mubr.msk.bf16.gmra.mrb[48].mxu0 %vm340_vm0, %v10415_v11  ;;  %v12006_v11 = vpop.f32.mrb[47].mxu1 }
 0x36f   :  { %2546 = vmatprep.mubr.bf16.mxu0 %v14025_v1  ;;  %v12010_v15 = vpop.f32.mrb[48].mxu1 }
 0x370   :  { %v12015_v21 = vpop.f32.mrb[49].mxu1 }
 0x376   :  { %8898 = vmatmul.mubr.msk.bf16.gmra.mrb[52].mxu0 %vm340_vm0, %v10417_v17  ;;  %v10439_v17 = vld [vmem:[%s14012_s0 + $0xf0] sm:$0xff]  }
 0x377   :  { %2556 = vmatprep.mubr.bf16.mxu0 %v14025_v1 }
 0x37e   :  { %8899 = vmatmul.mubr.msk.bf16.gmra.mrb[56].mxu0 %vm340_vm0, %v10419_v23  ;;  %v12017_v23 = vpop.f32.mrb[50].mxu1 }
 0x37f   :  { %2566 = vmatprep.mubr.bf16.mxu0 %v14025_v1  ;;  %14046 = vst [vmem:[#allocation9_spill] sm:$0xff] %v12017_v23  ;;  %v12019_v27 = vpop.f32.mrb[51].mxu1 }
 0x380   :  { %14047 = vst [vmem:[#allocation10_spill] sm:$0xff] %v12019_v27  ;;  %v14062_v27 = vmov 0  }
 0x386   :  { %8900 = vmatmul.mubr.msk.bf16.gmra.mrb[60].mxu0 %vm340_vm0, %v10421_v29  ;;  %v12023_v29 = vpop.f32.mrb[52].mxu1 }
 0x387   :  { %2576 = vmatprep.mubr.bf16.mxu0 %v14025_v1  ;;  %14048 = vst [vmem:[#allocation11_spill] sm:$0xff] %v12023_v29 }
 0x38e   :  { %8901 = vmatmul.mubr.msk.bf16.gmra.mrb[64].mxu0 %vm340_vm0, %v10423_v35  ;;  %v12028_v35 = vpop.f32.mrb[53].mxu1 }
 0x38f   :  { %2586 = vmatprep.mubr.bf16.mxu0 %v14025_v1  ;;  %14049 = vst [vmem:[#allocation12_spill] sm:$0xff] %v12028_v35 }
 0x396   :  { %8902 = vmatmul.mubr.msk.bf16.gmra.mrb[68].mxu0 %vm340_vm0, %v10425_v40  ;;  %v12030_v40 = vpop.f32.mrb[54].mxu1 }
 0x397   :  { %2596 = vmatprep.mubr.bf16.mxu0 %v14025_v1  ;;  %14050 = vst [vmem:[#allocation13_spill] sm:$0xff] %v12030_v40 }
 0x39e   :  { %8903 = vmatmul.mubr.msk.bf16.gmra.mrb[72].mxu0 %vm340_vm0, %v10427_v45  ;;  %v12032_v45 = vpop.f32.mrb[55].mxu1 }
 0x39f   :  { %2606 = vmatprep.mubr.bf16.mxu0 %v14025_v1  ;;  %14051 = vst [vmem:[#allocation14_spill] sm:$0xff] %v12032_v45 }
 0x3a6   :  { %8904 = vmatmul.mubr.msk.bf16.gmra.mrb[76].mxu0 %vm340_vm0, %v10429_v50  ;;  %v12036_v50 = vpop.f32.mrb[56].mxu1 }
 0x3a7   :  { %2616 = vmatprep.mubr.bf16.mxu0 %v14025_v1  ;;  %14052 = vst [vmem:[#allocation15_spill] sm:$0xff] %v12036_v50 }
 0x3ae   :  { %8905 = vmatmul.mubr.msk.bf16.gmra.mrb[80].mxu0 %vm340_vm0, %v10431_v55  ;;  %v10443_v55 = vld [vmem:[%s14012_s0 + $0x100] sm:$0xff]  }
 0x3af   :  { %2626 = vmatprep.mubr.bf16.mxu0 %v14025_v1 }
 0x3b6   :  { %8906 = vmatmul.mubr.msk.bf16.gmra.mrb[84].mxu0 %vm340_vm0, %v10433_v60  ;;  %v12041_v60 = vpop.f32.mrb[57].mxu1 }
 0x3b7   :  { %2636 = vmatprep.mubr.bf16.mxu0 %v14025_v1  ;;  %14053 = vst [vmem:[#allocation16_spill] sm:$0xff] %v12041_v60  ;;  %v10447_v60 = vld [vmem:[%s14012_s0 + $0x110] sm:$0xff]  }
 0x3be   :  { %8907 = vmatmul.mubr.msk.bf16.gmra.mrb[88].mxu0 %vm340_vm0, %v10435_v2  ;;  %v12043_v2 = vpop.f32.mrb[58].mxu1 }
 0x3bf   :  { %2646 = vmatprep.mubr.bf16.mxu0 %v14025_v1  ;;  %14054 = vst [vmem:[#allocation17_spill] sm:$0xff] %v12043_v2 }
 0x3c6   :  { %8908 = vmatmul.mubr.msk.bf16.gmra.mrb[92].mxu0 %vm340_vm0, %v10437_v7  ;;  %v12045_v7 = vpop.f32.mrb[59].mxu1 }
 0x3c7   :  { %2656 = vmatprep.mubr.bf16.mxu0 %v14025_v1  ;;  %14055 = vst [vmem:[#allocation18_spill] sm:$0xff] %v12045_v7 }
 0x3ce   :  { %8909 = vmatmul.mubr.msk.bf16.gmra.mrb[96].mxu0 %vm340_vm0, %v10439_v17  ;;  %v12049_v17 = vpop.f32.mrb[60].mxu1 }
 0x3cf   :  { %2666 = vmatprep.mubr.bf16.mxu0 %v14025_v1  ;;  %14056 = vst [vmem:[#allocation19_spill] sm:$0xff] %v12049_v17  ;;  %v12054_v50 = vpop.f32.mrb[61].mxu1 }
 0x3d0   :  { %14057 = vst [vmem:[#allocation20_spill] sm:$0xff] %v12054_v50  ;;  %v12056_v45 = vpop.f32.mrb[62].mxu1 }
 0x3d1   :  { %14058 = vst [vmem:[#allocation21_spill] sm:$0xff] %v12056_v45  ;;  %v12058_v40 = vpop.f32.mrb[63].mxu1 }
 0x3d2   :  { %14059 = vst [vmem:[#allocation22_spill] sm:$0xff] %v12058_v40 }
 0x3d6   :  { %8910 = vmatmul.mubr.msk.bf16.gmra.mrb[100].mxu0 %vm340_vm0, %v10441_v33  ;;  %v10445_v33 = vld [vmem:[%s14012_s0 + $0x108] sm:$0xff]  }
 0x3d7   :  { %2676 = vmatprep.mubr.bf16.mxu0 %v14025_v1 }
 0x3de   :  { %8911 = vmatmul.mubr.msk.bf16.gmra.mrb[104].mxu0 %vm340_vm0, %v10443_v55  ;;  %v12062_v55 = vpop.f32.mrb[64].mxu1 }
 0x3df   :  { %2686 = vmatprep.mubr.bf16.mxu0 %v14025_v1  ;;  %14060 = vst [vmem:[#allocation23_spill] sm:$0xff] %v12062_v55  ;;  %v12068_v35 = vpop.f32.mrb[65].mxu1 }
 0x3e0   :  { %14061 = vst [vmem:[#allocation24_spill] sm:$0xff] %v12068_v35  ;;  %v12071_v40 = vpop.f32.mrb[66].mxu1 }
 0x3e1   :  { %v12074_v29 = vpop.f32.mrb[67].mxu1 }
 0x3e2   :  { %v12079_v35 = vpop.f32.mrb[68].mxu1 }
 0x3e6   :  { %8912 = vmatmul.mubr.msk.bf16.gmra.mrb[108].mxu0 %vm340_vm0, %v10445_v33 }
 0x3e7   :  { %2696 = vmatprep.mubr.bf16.mxu0 %v14025_v1 }
 0x3e9   :  { %v2428_v7 = vpop.f32.mrb[4].mxu0 }
 0x3ea   :  { %v9541_v2 = vadd.f32 %v11835_v10, %v2428_v7  ;;  %v2430_v17 = vpop.f32.mrb[5].mxu0 }
 0x3eb   :  { %v9542_v45 = vadd.f32 %v11840_v12, %v2430_v17  ;;  %v2432_v50 = vpop.f32.mrb[6].mxu0 }
 0x3ec   :  { %v9543_v33 = vadd.f32 %v11842_v13, %v2432_v50  ;;  %v2434_v1 = vpop.f32.mrb[7].mxu0  ;;  %v10449_v13 = vld [vmem:[%s14012_s0 + $0x118] sm:$0xff]   ;;  %v12087_v50 = vpop.f32.mrb[69].mxu1 }
 0x3ed   :  { %v9544_v55 = vadd.f32 %v11844_v14, %v2434_v1 }
 0x3ee   :  { %v3705_v10 = vpack.c.bf16 %v9543_v33, %v9541_v2  ;;  %8913 = vmatmul.mubr.msk.bf16.gmra.mrb[112].mxu0 %vm340_vm0, %v10447_v60  ;;  %v10451_v33 = vld [vmem:[%s14012_s0 + $0x120] sm:$0xff]  }
 0x3ef   :  { %v3706_v7 = vpack.c.bf16 %v9544_v55, %v9542_v45  ;;  %2706 = vmatprep.mubr.bf16.mxu0 %v14062_v27  ;;  %v12092_v45 = vpop.f32.mrb[70].mxu1 }
 0x3f0   :  { %14065 = vst [vmem:[#allocation27_spill] sm:$0xff] %v12092_v45  ;;  %v12097_v55 = vpop.f32.mrb[71].mxu1 }
 0x3f1   :  { %v2438_v23 = vpop.f32.mrb[8].mxu0  ;;  %14067 = vst [vmem:[#allocation29_spill] sm:$0xff] %v12097_v55 }
 0x3f2   :  { %v12082_v12 = vadd.f32 %v11853_v16, %v2438_v23  ;;  %v2440_v17 = vpop.f32.mrb[9].mxu0 }
 0x3f3   :  { %v12090_v1 = vadd.f32 %v11858_v18, %v2440_v17  ;;  %v2442_v14 = vpop.f32.mrb[10].mxu0 }
 0x3f4   :  { %14063 = vst [vmem:[#allocation25_spill] sm:$0xff] %v12082_v12  ;;  %v12095_v60 = vadd.f32 %v11860_v19, %v2442_v14  ;;  %v2444_v2 = vpop.f32.mrb[11].mxu0  ;;  %v10456_v19 = vld [vmem:[%s14013_s3 + $0x100] ss:$8 sps:$4 sm:$0xff]   ;;  %v12117_v14 = vpop.f32.mrb[72].mxu1 }
 0x3f5   :  { %14064 = vst [vmem:[#allocation26_spill] sm:$0xff] %v12090_v1  ;;  %v12100_v16 = vadd.f32 %v11862_v20, %v2444_v2  ;;  %v10458_v20 = vld [vmem:[%s14013_s3 + $0x104] ss:$8 sps:$4 sm:$0xff]   ;;  %14069 = vst [vmem:[#allocation31_spill] sm:$0xff] %v12117_v14  ;;  %v12120_v18 = vpop.f32.mrb[73].mxu1 }
 0x3f6   :  { %14066 = vst [vmem:[#allocation28_spill] sm:$0xff] %v12095_v60  ;;  %8914 = vmatmul.mubr.msk.bf16.gmra.mrb[116].mxu0 %vm340_vm0, %v10449_v13  ;;  %4751 = vmatprep.subr.bf16.mxu1 %v10458_v20 }
 0x3f7   :  { %14068 = vst [vmem:[#allocation30_spill] sm:$0xff] %v12100_v16  ;;  %2716 = vmatprep.mubr.bf16.mxu0 %v14062_v27  ;;  %4752 = vmatpush1.bf16.msra.mxu1 %v10456_v19  ;;  %v12123_v16 = vpop.f32.mrb[74].mxu1 }
 0x3f8   :  { %v12126_v55 = vpop.f32.mrb[75].mxu1 }
 0x3f9   :  { %v2448_v17 = vpop.f32.mrb[12].mxu0  ;;  %v12135_v19 = vpop.f32.mrb[76].mxu1 }
 0x3fa   :  { %v9549_v13 = vadd.f32 %v11871_v22, %v2448_v17  ;;  %v2450_v2 = vpop.f32.mrb[13].mxu0 }
 0x3fb   :  { %v9550_v23 = vadd.f32 %v11876_v24, %v2450_v2  ;;  %v2452_v1 = vpop.f32.mrb[14].mxu0 }
 0x3fc   :  { %v9551_v12 = vadd.f32 %v11878_v25, %v2452_v1  ;;  %v2454_v60 = vpop.f32.mrb[15].mxu0 }
 0x3fd   :  { %v9552_v45 = vadd.f32 %v11880_v26, %v2454_v60  ;;  %v10453_v26 = vld [vmem:[%s14012_s0 + $0x128] sm:$0xff]  }
 0x3fe   :  { %v3709_v14 = vpack.c.bf16 %v9551_v12, %v9549_v13  ;;  %8915 = vmatmul.mubr.msk.bf16.gmra.mrb[120].mxu0 %vm340_vm0, %v10451_v33  ;;  %v12141_v12 = vpop.f32.mrb[77].mxu1  ;;  %v10461_v13 = vld [vmem:[%s14013_s3 + $0x114] ss:$8 sps:$4 sm:$0xff]  }
 0x3ff   :  { %v3710_v22 = vpack.c.bf16 %v9552_v45, %v9550_v23  ;;  %2726 = vmatprep.mubr.bf16.mxu0 %v14062_v27  ;;  %4753 = vmatprep.subr.bf16.mxu1 %v10461_v13 }
 0x400   :  { %v12131_v20 = vmax.bf16 %v3709_v14, %v3705_v10 }
 0x401   :  { %v2458_v24 = vpop.f32.mrb[16].mxu0  ;;  %v12133_v17 = vmax.bf16 %v3710_v22, %v3706_v7  ;;  %v12146_v7 = vpop.f32.mrb[78].mxu1 }
 0x402   :  { %14070 = vst [vmem:[#allocation32_spill] sm:$0xff] %v12131_v20  ;;  %v9553_v25 = vadd.f32 %v11889_v28, %v2458_v24  ;;  %v2460_v1 = vpop.f32.mrb[17].mxu0  ;;  %v12149_v28 = vpop.f32.mrb[79].mxu1 }
 0x403   :  { %14071 = vst [vmem:[#allocation33_spill] sm:$0xff] %v12133_v17  ;;  %v9554_v45 = vadd.f32 %v11894_v30, %v2460_v1  ;;  %3853 = vrot.lane.b32.xlu1 %v12133_v17, %s10945_s15  ;;  %v2462_v10 = vpop.f32.mrb[18].mxu0  ;;  %v10459_v30 = vld [vmem:[%s14013_s3 + $0x110] ss:$8 sps:$4 sm:$0xff]   ;;  %v12165_v22 = vpop.f32.mrb[80].mxu1 }
 0x404   :  { %v9555_v60 = vadd.f32 %v11896_v31, %v2462_v10  ;;  %v2464_v23 = vpop.f32.mrb[19].mxu0  ;;  %v10455_v31 = vld [vmem:[%s14012_s0 + $0x40] sm:$0xff]   ;;  %4754 = vmatpush1.bf16.msra.mxu1 %v10459_v30  ;;  %v12168_v1 = vpop.f32.mrb[81].mxu1 }
 0x405   :  { %v9556_v33 = vadd.f32 %v11898_v32, %v2464_v23  ;;  %v12171_v10 = vpop.f32.mrb[82].mxu1 }
 0x406   :  { %v3711_v14 = vpack.c.bf16 %v9555_v60, %v9553_v25  ;;  %8916 = vmatmul.mubr.msk.bf16.gmra.mrb[124].mxu0 %vm340_vm0, %v10453_v26 }
 0x407   :  { %v3712_v2 = vpack.c.bf16 %v9556_v33, %v9554_v45  ;;  %3851 = vrot.lane.b32.xlu1 %v12131_v20, %s10945_s15  ;;  %3254 = vmatprep.mubr.bf16.mxu0 %v14062_v27  ;;  %v12174_v33 = vpop.f32.mrb[83].mxu1 }
 0x409   :  { %v2468_v32 = vpop.f32.mrb[20].mxu0 }
 0x40a   :  { %v9557_v24 = vadd.f32 %v11906_v34, %v2468_v32  ;;  %v2470_v25 = vpop.f32.mrb[21].mxu0  ;;  %v12178_v32 = vpop.f32.mrb[84].mxu1 }
 0x40b   :  { %v9558_v26 = vadd.f32 %v11911_v36, %v2470_v25  ;;  %v2472_v45 = vpop.f32.mrb[22].mxu0  ;;  %v12181_v25 = vpop.f32.mrb[85].mxu1 }
 0x40c   :  { %v9559_v60 = vadd.f32 %v11913_v37, %v2472_v45  ;;  %v2474_v23 = vpop.f32.mrb[23].mxu0  ;;  %14072 = vst [vmem:[#allocation34_spill] sm:$0xff] %v12181_v25  ;;  %v10462_v45 = vld [vmem:[%s14013_s3 + $0x120] ss:$8 sps:$4 sm:$0xff]  }
 0x40d   :  { %v9560_v13 = vadd.f32 %v11915_v38, %v2474_v23  ;;  %v10464_v38 = vld [vmem:[%s14013_s3 + $0x124] ss:$8 sps:$4 sm:$0xff]  }
 0x40e   :  { %v3713_v30 = vpack.c.bf16 %v9559_v60, %v9557_v24  ;;  %8961 = vmatmul.mubr.msk.bf16.vlgmr.msra.gmra.mrb[0].mxu0 %vm340_vm0, %v10455_v31  ;;  %v12190_v31 = vpop.f32.mrb[86].mxu1  ;;  %4755 = vmatprep.subr.bf16.mxu1 %v10464_v38 }
 0x40f   :  { %v3714_v27 = vpack.c.bf16 %v9560_v13, %v9558_v26  ;;  %14073 = vst [vmem:[#allocation35_spill] sm:$0xff] %v12190_v31  ;;  %4756 = vmatpush1.bf16.msra.mxu1 %v10462_v45 }
 0x411   :  { %v2478_v34 = vpop.f32.mrb[24].mxu0 }
 0x412   :  { %v9561_v20 = vadd.f32 %v11919_v39, %v2478_v34  ;;  %v2480_v36 = vpop.f32.mrb[25].mxu0  ;;  %v12193_v39 = vpop.f32.mrb[87].mxu1 }
 0x413   :  { %v9562_v17 = vadd.f32 %v11924_v41, %v2480_v36  ;;  %v2482_v37 = vpop.f32.mrb[26].mxu0  ;;  %v12198_v36 = vpop.f32.mrb[88].mxu1 }
 0x414   :  { %v9563_v24 = vadd.f32 %v11926_v42, %v2482_v37  ;;  %v2484_v26 = vpop.f32.mrb[27].mxu0  ;;  %v12205_v37 = vpop.f32.mrb[89].mxu1 }
 0x415   :  { %v9564_v60 = vadd.f32 %v11928_v43, %v2484_v26  ;;  %v12208_v45 = vpop.f32.mrb[90].mxu1 }
 0x416   :  { %v3715_v41 = vpack.c.bf16 %v9563_v24, %v9561_v20  ;;  %v12211_v38 = vpop.f32.mrb[91].mxu1 }
 0x417   :  { %v3716_v23 = vpack.c.bf16 %v9564_v60, %v9562_v17 }
 0x418   :  { %v12196_v13 = vmax.bf16 %v3715_v41, %v3711_v14  ;;  %v12216_v41 = vpop.f32.mrb[92].mxu1 }
 0x419   :  { %v2488_v34 = vpop.f32.mrb[28].mxu0  ;;  %v12200_v25 = vmax.bf16 %v3716_v23, %v3712_v2 }
 0x41a   :  { %14074 = vst [vmem:[#allocation36_spill] sm:$0xff] %v12196_v13  ;;  %v9565_v31 = vadd.f32 %v11932_v44, %v2488_v34  ;;  %3932 = vrot.lane.b32.xlu1 %v12196_v13, %s10945_s15  ;;  %v2490_v42 = vpop.f32.mrb[29].mxu0  ;;  %v12223_v34 = vpop.f32.mrb[93].mxu1 }
 0x41b   :  { %14075 = vst [vmem:[#allocation37_spill] sm:$0xff] %v12200_v25  ;;  %v9566_v43 = vadd.f32 %v11937_v46, %v2490_v42  ;;  %v2492_v20 = vpop.f32.mrb[30].mxu0  ;;  %v12232_v42 = vpop.f32.mrb[94].mxu1 }
 0x41c   :  { %v9567_v17 = vadd.f32 %v11939_v47, %v2492_v20  ;;  %v2494_v14 = vpop.f32.mrb[31].mxu0  ;;  %v12235_v20 = vpop.f32.mrb[95].mxu1 }
 0x41d   :  { %v9568_v2 = vadd.f32 %v11941_v48, %v2494_v14  ;;  %v10465_v48 = vld [vmem:[%s14013_s3 + $0x130] ss:$8 sps:$4 sm:$0xff]  }
 0x41e   :  { %v3717_v24 = vpack.c.bf16 %v9567_v17, %v9565_v31 }
 0x41f   :  { %v3718_v44 = vpack.c.bf16 %v9568_v2, %v9566_v43 }
 0x420   :  { %v12214_v26 = vmax.bf16 %v3717_v24, %v3713_v30  ;;  %v10467_v30 = vld [vmem:[%s14013_s3 + $0x134] ss:$8 sps:$4 sm:$0xff]  }
 0x421   :  { %v2498_v60 = vpop.f32.mrb[32].mxu0  ;;  %v12218_v23 = vmax.bf16 %v3718_v44, %v3714_v27  ;;  %4757 = vmatprep.subr.bf16.mxu1 %v10467_v30  ;;  %v12238_v44 = vpop.f32.mrb[96].mxu1 }
 0x422   :  { %14076 = vst [vmem:[#allocation38_spill] sm:$0xff] %v12214_v26  ;;  %v9569_v46 = vadd.f32 %v11945_v49, %v2498_v60  ;;  %3936 = vrot.lane.b32.xlu1 %v12214_v26, %s10945_s15  ;;  %v2500_v47 = vpop.f32.mrb[33].mxu0  ;;  %4758 = vmatpush1.bf16.msra.mxu1 %v10465_v48 }
 0x423   :  { %14077 = vst [vmem:[#allocation39_spill] sm:$0xff] %v12218_v23  ;;  %v9570_v31 = vadd.f32 %v11950_v51, %v2500_v47  ;;  %v2502_v27 = vpop.f32.mrb[34].mxu0  ;;  %v12241_v47 = vpop.f32.mrb[97].mxu1 }
 0x424   :  { %v9571_v49 = vadd.f32 %v11952_v52, %v2502_v27  ;;  %v2504_v43 = vpop.f32.mrb[35].mxu0  ;;  %v12244_v27 = vpop.f32.mrb[98].mxu1 }
 0x425   :  { %v9572_v17 = vadd.f32 %v11954_v53, %v2504_v43  ;;  %v12247_v53 = vpop.f32.mrb[99].mxu1 }
 0x426   :  { %v3719_v14 = vpack.c.bf16 %v9571_v49, %v9569_v46  ;;  %v12250_v43 = vpop.f32.mrb[100].mxu1 }
 0x427   :  { %v3720_v2 = vpack.c.bf16 %v9572_v17, %v9570_v31 }
 0x429   :  { %v2508_v24 = vpop.f32.mrb[36].mxu0 }
 0x42a   :  { %v9573_v60 = vadd.f32 %v11958_v54, %v2508_v24  ;;  %v2510_v51 = vpop.f32.mrb[37].mxu0  ;;  %v12259_v24 = vpop.f32.mrb[101].mxu1 }
 0x42b   :  { %v9574_v26 = vadd.f32 %v11963_v56, %v2510_v51  ;;  %v2512_v52 = vpop.f32.mrb[38].mxu0  ;;  %v10468_v56 = vld [vmem:[%s14013_s3 + $0x140] ss:$8 sps:$4 sm:$0xff]  }
 0x42c   :  { %v9575_v30 = vadd.f32 %v11965_v57, %v2512_v52  ;;  %v2514_v13 = vpop.f32.mrb[39].mxu0  ;;  %v10470_v57 = vld [vmem:[%s14013_s3 + $0x144] ss:$8 sps:$4 sm:$0xff]  }
 0x42d   :  { %v9576_v46 = vadd.f32 %v11967_v58, %v2514_v13  ;;  %4759 = vmatprep.subr.bf16.mxu1 %v10470_v57 }
 0x42e   :  { %v3721_v48 = vpack.c.bf16 %v9575_v30, %v9573_v60  ;;  %4760 = vmatpush1.bf16.msra.mxu1 %v10468_v56 }
 0x42f   :  { %v3722_v31 = vpack.c.bf16 %v9576_v46, %v9574_v26  ;;  %v12262_v26 = vpop.f32.mrb[102].mxu1 }
 0x431   :  { %v2518_v49 = vpop.f32.mrb[40].mxu0 }
 0x432   :  { %v9577_v54 = vadd.f32 %v11971_v59, %v2518_v49  ;;  %v2520_v17 = vpop.f32.mrb[41].mxu0  ;;  %v12265_v59 = vpop.f32.mrb[103].mxu1 }
 0x433   :  { %v9578_v58 = vadd.f32 %v11976_v61, %v2520_v17  ;;  %v2522_v13 = vpop.f32.mrb[42].mxu0  ;;  %v12270_v25 = vpop.f32.mrb[104].mxu1 }
 0x434   :  { %v9579_v60 = vadd.f32 %v11978_v62, %v2522_v13  ;;  %v2524_v51 = vpop.f32.mrb[43].mxu0  ;;  %v12277_v57 = vpop.f32.mrb[105].mxu1 }
 0x435   :  { %v9580_v52 = vadd.f32 %v11980_v63, %v2524_v51 }
 0x436   :  { %v3723_v30 = vpack.c.bf16 %v9579_v60, %v9577_v54  ;;  %v12280_v54 = vpop.f32.mrb[106].mxu1 }
 0x437   :  { %v3724_v46 = vpack.c.bf16 %v9580_v52, %v9578_v58  ;;  %v12283_v13 = vpop.f32.mrb[107].mxu1 }
 0x438   :  { %v12268_v49 = vmax.bf16 %v3723_v30, %v3719_v14  ;;  %v12288_v52 = vpop.f32.mrb[108].mxu1 }
 0x439   :  { %v2528_v23 = vpop.f32.mrb[44].mxu0  ;;  %v12272_v61 = vmax.bf16 %v3724_v46, %v3720_v2  ;;  %v10471_v46 = vld [vmem:[%s14013_s3 + $0x150] ss:$8 sps:$4 sm:$0xff]  }
 0x43a   :  { %14078 = vst [vmem:[#allocation40_spill] sm:$0xff] %v12268_v49  ;;  %v9581_v17 = vadd.f32 %v11984_v0, %v2528_v23  ;;  %4014 = vrot.lane.b32.xlu1 %v12268_v49, %s10945_s15  ;;  %v2530_v62 = vpop.f32.mrb[45].mxu0 }
 0x43b   :  { %14079 = vst [vmem:[#allocation41_spill] sm:$0xff] %v12272_v61  ;;  %v9582_v63 = vadd.f32 %v11989_v3, %v2530_v62  ;;  %v2532_v56 = vpop.f32.mrb[46].mxu0 }
 0x43c   :  { %v9583_v14 = vadd.f32 %v11991_v4, %v2532_v56  ;;  %v2534_v58 = vpop.f32.mrb[47].mxu0 }
 0x43d   :  { %v9584_v2 = vadd.f32 %v11993_v5, %v2534_v58  ;;  %v10473_v5 = vld [vmem:[%s14013_s3 + $0x154] ss:$8 sps:$4 sm:$0xff]  }
 0x43e   :  { %v3725_v60 = vpack.c.bf16 %v9583_v14, %v9581_v17  ;;  %4761 = vmatprep.subr.bf16.mxu1 %v10473_v5  ;;  %v14085_v5 = vld [vmem:[#allocation9_spill] sm:$0xff] }
 0x43f   :  { %v3726_v0 = vpack.c.bf16 %v9584_v2, %v9582_v63  ;;  %4762 = vmatpush1.bf16.msra.mxu1 %v10471_v46 }
 0x440   :  { %v12286_v23 = vmax.bf16 %v3725_v60, %v3721_v48  ;;  %v12301_v48 = vpop.f32.mrb[109].mxu1 }
 0x441   :  { %v2538_v51 = vpop.f32.mrb[48].mxu0  ;;  %v12290_v30 = vmax.bf16 %v3726_v0, %v3722_v31  ;;  %v12304_v62 = vpop.f32.mrb[110].mxu1 }
 0x442   :  { %14080 = vst [vmem:[#allocation42_spill] sm:$0xff] %v12286_v23  ;;  %v9585_v3 = vadd.f32 %v11997_v6, %v2538_v51  ;;  %4018 = vrot.lane.b32.xlu1 %v12286_v23, %s10945_s15  ;;  %v2540_v4 = vpop.f32.mrb[49].mxu0  ;;  %v12307_v56 = vpop.f32.mrb[111].mxu1 }
 0x443   :  { %14081 = vst [vmem:[#allocation43_spill] sm:$0xff] %v12290_v30  ;;  %v9586_v17 = vadd.f32 %v12002_v8, %v2540_v4  ;;  %v2542_v31 = vpop.f32.mrb[50].mxu0  ;;  %v12310_v0 = vpop.f32.mrb[112].mxu1 }
 0x444   :  { %v9587_v6 = vadd.f32 %v12004_v9, %v2542_v31  ;;  %v2544_v63 = vpop.f32.mrb[51].mxu0  ;;  %14082 = vst [vmem:[#allocation44_spill] sm:$0xff] %v12310_v0  ;;  %v12313_v4 = vpop.f32.mrb[113].mxu1 }
 0x445   :  { %v9588_v14 = vadd.f32 %v12006_v11, %v2544_v63  ;;  %14083 = vst [vmem:[#allocation45_spill] sm:$0xff] %v12313_v4  ;;  %v12316_v31 = vpop.f32.mrb[114].mxu1 }
 0x446   :  { %v3727_v58 = vpack.c.bf16 %v9587_v6, %v9585_v3  ;;  %14084 = vst [vmem:[#allocation46_spill] sm:$0xff] %v12316_v31  ;;  %v12319_v11 = vpop.f32.mrb[115].mxu1  ;;  %v14087_v3 = vld [vmem:[#allocation10_spill] sm:$0xff] }
 0x447   :  { %v3728_v2 = vpack.c.bf16 %v9588_v14, %v9586_v17  ;;  %14086 = vst [vmem:[#allocation9_spill] sm:$0xff] %v12319_v11  ;;  %v12328_v14 = vpop.f32.mrb[116].mxu1  ;;  %v14094_v31 = vld [vmem:[#allocation14_spill] sm:$0xff] }
 0x448   :  { %14088 = vst [vmem:[#allocation10_spill] sm:$0xff] %v12328_v14 }
 0x449   :  { %v2548_v60 = vpop.f32.mrb[52].mxu0 }
 0x44a   :  { %v9589_v51 = vadd.f32 %v12010_v15, %v2548_v60  ;;  %v2550_v8 = vpop.f32.mrb[53].mxu0  ;;  %v10474_v15 = vld [vmem:[%s14013_s3 + $0x160] ss:$8 sps:$4 sm:$0xff]   ;;  %v14089_v60 = vld [vmem:[#allocation11_spill] sm:$0xff] }
 0x44b   :  { %v9590_v23 = vadd.f32 %v12015_v21, %v2550_v8  ;;  %v2552_v9 = vpop.f32.mrb[54].mxu0  ;;  %v10476_v21 = vld [vmem:[%s14013_s3 + $0x164] ss:$8 sps:$4 sm:$0xff]  }
 0x44c   :  { %v9591_v49 = vadd.f32 %v14085_v5, %v2552_v9  ;;  %v2554_v30 = vpop.f32.mrb[55].mxu0  ;;  %4763 = vmatprep.subr.bf16.mxu1 %v10476_v21  ;;  %v12331_v5 = vpop.f32.mrb[117].mxu1 }
 0x44d   :  { %v9592_v46 = vadd.f32 %v14087_v3, %v2554_v30  ;;  %4764 = vmatpush1.bf16.msra.mxu1 %v10474_v15  ;;  %v14092_v3 = vld [vmem:[#allocation13_spill] sm:$0xff] }
 0x44e   :  { %v3729_v17 = vpack.c.bf16 %v9591_v49, %v9589_v51  ;;  %v14090_v49 = vld [vmem:[#allocation12_spill] sm:$0xff]  ;;  %v12334_v51 = vpop.f32.mrb[118].mxu1 }
 0x44f   :  { %v3730_v6 = vpack.c.bf16 %v9592_v46, %v9590_v23  ;;  %14091 = vst [vmem:[#allocation11_spill] sm:$0xff] %v12334_v51  ;;  %v12337_v11 = vpop.f32.mrb[119].mxu1 }
 0x450   :  { %14093 = vst [vmem:[#allocation12_spill] sm:$0xff] %v12337_v11  ;;  %v12342_v15 = vpop.f32.mrb[120].mxu1  ;;  %v14099_v11 = vld [vmem:[#allocation16_spill] sm:$0xff] }
 0x451   :  { %v2558_v63 = vpop.f32.mrb[56].mxu0 }
 0x452   :  { %v9593_v8 = vadd.f32 %v14089_v60, %v2558_v63  ;;  %v2560_v9 = vpop.f32.mrb[57].mxu0 }
 0x453   :  { %v9594_v23 = vadd.f32 %v14090_v49, %v2560_v9  ;;  %v2562_v30 = vpop.f32.mrb[58].mxu0  ;;  %v14097_v9 = vld [vmem:[#allocation15_spill] sm:$0xff] }
 0x454   :  { %v9595_v46 = vadd.f32 %v14092_v3, %v2562_v30  ;;  %v2564_v61 = vpop.f32.mrb[59].mxu0  ;;  %v12349_v3 = vpop.f32.mrb[121].mxu1 }
 0x455   :  { %v9596_v21 = vadd.f32 %v14094_v31, %v2564_v61  ;;  %14098 = vst [vmem:[#allocation15_spill] sm:$0xff] %v12349_v3  ;;  %v12352_v31 = vpop.f32.mrb[122].mxu1 }
 0x456   :  { %v3731_v4 = vpack.c.bf16 %v9595_v46, %v9593_v8  ;;  %14100 = vst [vmem:[#allocation16_spill] sm:$0xff] %v12352_v31 }
 0x457   :  { %v3732_v14 = vpack.c.bf16 %v9596_v21, %v9594_v23  ;;  %v12355_v23 = vpop.f32.mrb[123].mxu1 }
 0x458   :  { %v12340_v0 = vmax.bf16 %v3731_v4, %v3727_v58  ;;  %v14101_v58 = vld [vmem:[#allocation17_spill] sm:$0xff] }
 0x459   :  { %v2568_v63 = vpop.f32.mrb[60].mxu0  ;;  %v12344_v60 = vmax.bf16 %v3732_v14, %v3728_v2  ;;  %14102 = vst [vmem:[#allocation17_spill] sm:$0xff] %v12355_v23  ;;  %v14103_v2 = vld [vmem:[#allocation18_spill] sm:$0xff] }
 0x45a   :  { %14095 = vst [vmem:[#allocation13_spill] sm:$0xff] %v12340_v0  ;;  %v9597_v49 = vadd.f32 %v14097_v9, %v2568_v63  ;;  %4096 = vrot.lane.b32.xlu1 %v12340_v0, %s10945_s15  ;;  %v2570_v30 = vpop.f32.mrb[61].mxu0  ;;  %v10477_v63 = vld [vmem:[%s14013_s3 + $0x170] ss:$8 sps:$4 sm:$0xff]   ;;  %v14109_v23 = vld [vmem:[#allocation22_spill] sm:$0xff] }
 0x45b   :  { %14096 = vst [vmem:[#allocation14_spill] sm:$0xff] %v12344_v60  ;;  %v9598_v51 = vadd.f32 %v14099_v11, %v2570_v30  ;;  %v2572_v61 = vpop.f32.mrb[62].mxu0  ;;  %v10479_v11 = vld [vmem:[%s14013_s3 + $0x174] ss:$8 sps:$4 sm:$0xff]  }
 0x45c   :  { %v9599_v4 = vadd.f32 %v14101_v58, %v2572_v61  ;;  %v2574_v8 = vpop.f32.mrb[63].mxu0  ;;  %4765 = vmatprep.subr.bf16.mxu1 %v10479_v11  ;;  %v14106_v58 = vld [vmem:[#allocation19_spill] sm:$0xff] }
 0x45d   :  { %v9600_v14 = vadd.f32 %v14103_v2, %v2574_v8  ;;  %4766 = vmatpush1.bf16.msra.mxu1 %v10477_v63  ;;  %v14108_v2 = vld [vmem:[#allocation21_spill] sm:$0xff] }
 0x45e   :  { %v3733_v46 = vpack.c.bf16 %v9599_v4, %v9597_v49  ;;  %v14107_v49 = vld [vmem:[#allocation20_spill] sm:$0xff] }
 0x45f   :  { %v3734_v21 = vpack.c.bf16 %v9600_v14, %v9598_v51 }
 0x460   :  { %v12364_v9 = vmax.bf16 %v3733_v46, %v3729_v17 }
 0x461   :  { %v2578_v30 = vpop.f32.mrb[64].mxu0  ;;  %v12366_v61 = vmax.bf16 %v3734_v21, %v3730_v6  ;;  %v14110_v6 = vld [vmem:[#allocation23_spill] sm:$0xff] }
 0x462   :  { %14104 = vst [vmem:[#allocation18_spill] sm:$0xff] %v12364_v9  ;;  %v9601_v0 = vadd.f32 %v14106_v58, %v2578_v30  ;;  %4100 = vrot.lane.b32.xlu1 %v12364_v9, %s10945_s15  ;;  %v2580_v51 = vpop.f32.mrb[65].mxu0  ;;  %v14111_v30 = vld [vmem:[#allocation24_spill] sm:$0xff] }
 0x463   :  { %14105 = vst [vmem:[#allocation47_spill] sm:$0xff] %v12366_v61  ;;  %v9602_v4 = vadd.f32 %v14107_v49, %v2580_v51  ;;  %v2582_v8 = vpop.f32.mrb[66].mxu0  ;;  %v10480_v49 = vld [vmem:[%s14013_s3 + $0x180] ss:$8 sps:$4 sm:$0xff]  }
 0x464   :  { %v9603_v14 = vadd.f32 %v14108_v2, %v2582_v8  ;;  %v2584_v60 = vpop.f32.mrb[67].mxu0 }
 0x465   :  { %v9604_v17 = vadd.f32 %v14109_v23, %v2584_v60 }
 0x466   :  { %v3735_v46 = vpack.c.bf16 %v9603_v14, %v9601_v0  ;;  %v10482_v0 = vld [vmem:[%s14013_s3 + $0x184] ss:$8 sps:$4 sm:$0xff]  }
 0x467   :  { %v3736_v31 = vpack.c.bf16 %v9604_v17, %v9602_v4  ;;  %4767 = vmatprep.subr.bf16.mxu1 %v10482_v0  ;;  %v14113_v17 = vld [vmem:[#allocation29_spill] sm:$0xff] }
 0x468   :  { %4768 = vmatpush1.bf16.msra.mxu1 %v10480_v49 }
 0x469   :  { %v2588_v11 = vpop.f32.mrb[68].mxu0 }
 0x46a   :  { %v9605_v21 = vadd.f32 %v14110_v6, %v2588_v11  ;;  %v2590_v61 = vpop.f32.mrb[69].mxu0 }
 0x46b   :  { %v9606_v58 = vadd.f32 %v14111_v30, %v2590_v61  ;;  %v2592_v3 = vpop.f32.mrb[70].mxu0 }
 0x46c   :  { %v9607_v9 = vadd.f32 %v12071_v40, %v2592_v3  ;;  %v2594_v63 = vpop.f32.mrb[71].mxu0 }
 0x46d   :  { %v9608_v51 = vadd.f32 %v12074_v29, %v2594_v63  ;;  %v14112_v29 = vld [vmem:[#allocation27_spill] sm:$0xff] }
 0x46e   :  { %v3737_v60 = vpack.c.bf16 %v9607_v9, %v9605_v21 }
 0x46f   :  { %v3738_v23 = vpack.c.bf16 %v9608_v51, %v9606_v58  ;;  %v14114_v58 = vld [vmem:[#allocation31_spill] sm:$0xff] }
 0x471   :  { %v2598_v4 = vpop.f32.mrb[72].mxu0 }
 0x472   :  { %v9609_v61 = vadd.f32 %v12079_v35, %v2598_v4  ;;  %v2600_v8 = vpop.f32.mrb[73].mxu0 }
 0x473   :  { %v9610_v40 = vadd.f32 %v12087_v50, %v2600_v8  ;;  %v2602_v3 = vpop.f32.mrb[74].mxu0 }
 0x474   :  { %v9611_v2 = vadd.f32 %v14112_v29, %v2602_v3  ;;  %v2604_v14 = vpop.f32.mrb[75].mxu0 }
 0x475   :  { %v9612_v11 = vadd.f32 %v14113_v17, %v2604_v14 }
 0x476   :  { %v3739_v6 = vpack.c.bf16 %v9611_v2, %v9609_v61 }
 0x477   :  { %v3740_v30 = vpack.c.bf16 %v9612_v11, %v9610_v40 }
 0x478   :  { %v12388_v63 = vmax.bf16 %v3739_v6, %v3735_v46  ;;  %v10483_v46 = vld [vmem:[%s14013_s3 + $0x190] ss:$8 sps:$4 sm:$0xff]  }
 0x479   :  { %v2608_v9 = vpop.f32.mrb[76].mxu0  ;;  %v12390_v21 = vmax.bf16 %v3740_v30, %v3736_v31  ;;  %v10485_v31 = vld [vmem:[%s14013_s3 + $0x194] ss:$8 sps:$4 sm:$0xff]  }
 0x47a   :  { %v9613_v51 = vadd.f32 %v14114_v58, %v2608_v9  ;;  %4178 = vrot.lane.b32.xlu1 %v12388_v63, %s10945_s15  ;;  %v2610_v35 = vpop.f32.mrb[77].mxu0  ;;  %4769 = vmatprep.subr.bf16.mxu1 %v10485_v31 }
 0x47b   :  { %v9614_v50 = vadd.f32 %v12120_v18, %v2610_v35  ;;  %v2612_v49 = vpop.f32.mrb[78].mxu0  ;;  %4770 = vmatpush1.bf16.msra.mxu1 %v10483_v46 }
 0x47c   :  { %v9615_v0 = vadd.f32 %v12123_v16, %v2612_v49  ;;  %v2614_v4 = vpop.f32.mrb[79].mxu0 }
 0x47d   :  { %v9616_v61 = vadd.f32 %v12126_v55, %v2614_v4 }
 0x47e   :  { %v3741_v8 = vpack.c.bf16 %v9615_v0, %v9613_v51 }
 0x47f   :  { %v3742_v40 = vpack.c.bf16 %v9616_v61, %v9614_v50 }
 0x480   :  { %v12404_v3 = vmax.bf16 %v3741_v8, %v3737_v60 }
 0x481   :  { %v2618_v18 = vpop.f32.mrb[80].mxu0  ;;  %v12406_v29 = vmax.bf16 %v3742_v40, %v3738_v23 }
 0x482   :  { %v9617_v16 = vadd.f32 %v12135_v19, %v2618_v18  ;;  %4182 = vrot.lane.b32.xlu1 %v12404_v3, %s10945_s15  ;;  %v2620_v55 = vpop.f32.mrb[81].mxu0 }
 0x483   :  { %v9618_v2 = vadd.f32 %v12141_v12, %v2620_v55  ;;  %v2622_v14 = vpop.f32.mrb[82].mxu0 }
 0x484   :  { %v9619_v17 = vadd.f32 %v12146_v7, %v2622_v14  ;;  %v2624_v11 = vpop.f32.mrb[83].mxu0  ;;  %v10486_v7 = vld [vmem:[%s14013_s3 + $0x1a0] ss:$8 sps:$4 sm:$0xff]  }
 0x485   :  { %v9620_v6 = vadd.f32 %v12149_v28, %v2624_v11  ;;  %v10488_v28 = vld [vmem:[%s14013_s3 + $0x1a4] ss:$8 sps:$4 sm:$0xff]  }
 0x486   :  { %v3743_v60 = vpack.c.bf16 %v9619_v17, %v9617_v16  ;;  %4771 = vmatprep.subr.bf16.mxu1 %v10488_v28 }
 0x487   :  { %v3744_v30 = vpack.c.bf16 %v9620_v6, %v9618_v2  ;;  %4772 = vmatpush1.bf16.msra.mxu1 %v10486_v7 }
 0x489   :  { %v2628_v9 = vpop.f32.mrb[84].mxu0 }
 0x48a   :  { %v9621_v23 = vadd.f32 %v12165_v22, %v2628_v9  ;;  %v2630_v58 = vpop.f32.mrb[85].mxu0 }
 0x48b   :  { %v9622_v19 = vadd.f32 %v12168_v1, %v2630_v58  ;;  %v2632_v51 = vpop.f32.mrb[86].mxu0 }
 0x48c   :  { %v9623_v35 = vadd.f32 %v12171_v10, %v2632_v51  ;;  %v2634_v50 = vpop.f32.mrb[87].mxu0  ;;  %v14115_v10 = vld [vmem:[#allocation34_spill] sm:$0xff] }
 0x48d   :  { %v9624_v12 = vadd.f32 %v12174_v33, %v2634_v50  ;;  %v14116_v33 = vld [vmem:[#allocation35_spill] sm:$0xff] }
 0x48e   :  { %v3745_v49 = vpack.c.bf16 %v9623_v35, %v9621_v23 }
 0x48f   :  { %v3746_v0 = vpack.c.bf16 %v9624_v12, %v9622_v19 }
 0x491   :  { %v2638_v22 = vpop.f32.mrb[88].mxu0 }
 0x492   :  { %v9625_v1 = vadd.f32 %v12178_v32, %v2638_v22  ;;  %v2640_v4 = vpop.f32.mrb[89].mxu0 }
 0x493   :  { %v9626_v61 = vadd.f32 %v14115_v10, %v2640_v4  ;;  %v2642_v46 = vpop.f32.mrb[90].mxu0 }
 0x494   :  { %v9627_v31 = vadd.f32 %v14116_v33, %v2642_v46  ;;  %v2644_v8 = vpop.f32.mrb[91].mxu0 }
 0x495   :  { %v9628_v40 = vadd.f32 %v12193_v39, %v2644_v8 }
 0x496   :  { %v3747_v18 = vpack.c.bf16 %v9627_v31, %v9625_v1 }
 0x497   :  { %v3748_v16 = vpack.c.bf16 %v9628_v40, %v9626_v61 }
 0x498   :  { %v12428_v55 = vmax.bf16 %v3747_v18, %v3743_v60  ;;  %v10489_v60 = vld [vmem:[%s14013_s3 + $0x1b0] ss:$8 sps:$4 sm:$0xff]  }
 0x499   :  { %v2648_v2 = vpop.f32.mrb[92].mxu0  ;;  %v12430_v14 = vmax.bf16 %v3748_v16, %v3744_v30 }
 0x49a   :  { %v9629_v17 = vadd.f32 %v12198_v36, %v2648_v2  ;;  %4260 = vrot.lane.b32.xlu1 %v12428_v55, %s10945_s15  ;;  %v2650_v32 = vpop.f32.mrb[93].mxu0  ;;  %v10491_v36 = vld [vmem:[%s14013_s3 + $0x1b4] ss:$8 sps:$4 sm:$0xff]   ;;  %v10495_v2 = vld [vmem:[%s14013_s3 + $0x1d0] ss:$8 sps:$4 sm:$0xff]  }
 0x49b   :  { %v9630_v11 = vadd.f32 %v12205_v37, %v2650_v32  ;;  %v2652_v6 = vpop.f32.mrb[94].mxu0  ;;  %4773 = vmatprep.subr.bf16.mxu1 %v10491_v36 }
 0x49c   :  { %v9631_v9 = vadd.f32 %v12208_v45, %v2652_v6  ;;  %v2654_v23 = vpop.f32.mrb[95].mxu0  ;;  %4774 = vmatpush1.bf16.msra.mxu1 %v10489_v60 }
 0x49d   :  { %v9632_v39 = vadd.f32 %v12211_v38, %v2654_v23 }
 0x49e   :  { %v3749_v30 = vpack.c.bf16 %v9631_v9, %v9629_v17 }
 0x49f   :  { %v3750_v58 = vpack.c.bf16 %v9632_v39, %v9630_v11 }
 0x4a0   :  { %v12444_v19 = vmax.bf16 %v3749_v30, %v3745_v49 }
 0x4a1   :  { %v2658_v37 = vpop.f32.mrb[96].mxu0  ;;  %v12446_v51 = vmax.bf16 %v3750_v58, %v3746_v0 }
 0x4a2   :  { %v9633_v45 = vadd.f32 %v12216_v41, %v2658_v37  ;;  %4264 = vrot.lane.b32.xlu1 %v12444_v19, %s10945_s15  ;;  %v2660_v38 = vpop.f32.mrb[97].mxu0 }
 0x4a3   :  { %v9634_v35 = vadd.f32 %v12223_v34, %v2660_v38  ;;  %v2662_v50 = vpop.f32.mrb[98].mxu0  ;;  %v10492_v34 = vld [vmem:[%s14013_s3 + $0x1c0] ss:$8 sps:$4 sm:$0xff]  }
 0x4a4   :  { %v9635_v12 = vadd.f32 %v12232_v42, %v2662_v50  ;;  %v2664_v7 = vpop.f32.mrb[99].mxu0  ;;  %v10494_v42 = vld [vmem:[%s14013_s3 + $0x1c4] ss:$8 sps:$4 sm:$0xff]  }
 0x4a5   :  { %v9636_v28 = vadd.f32 %v12235_v20, %v2664_v7  ;;  %4775 = vmatprep.subr.bf16.mxu1 %v10494_v42 }
 0x4a6   :  { %v3751_v49 = vpack.c.bf16 %v9635_v12, %v9633_v45  ;;  %4776 = vmatpush1.bf16.msra.mxu1 %v10492_v34 }
 0x4a7   :  { %v3752_v22 = vpack.c.bf16 %v9636_v28, %v9634_v35 }
 0x4a9   :  { %v2668_v1 = vpop.f32.mrb[100].mxu0 }
 0x4aa   :  { %v9637_v0 = vadd.f32 %v12238_v44, %v2668_v1  ;;  %v2670_v4 = vpop.f32.mrb[101].mxu0 }
 0x4ab   :  { %v9638_v41 = vadd.f32 %v12241_v47, %v2670_v4  ;;  %v2672_v10 = vpop.f32.mrb[102].mxu0 }
 0x4ac   :  { %v9639_v61 = vadd.f32 %v12244_v27, %v2672_v10  ;;  %v2674_v46 = vpop.f32.mrb[103].mxu0  ;;  %v14118_v10 = vld [vmem:[#allocation45_spill] sm:$0xff] }
 0x4ad   :  { %v9640_v20 = vadd.f32 %v12247_v53, %v2674_v46  ;;  %v10497_v53 = vld [vmem:[%s14013_s3 + $0x1d4] ss:$8 sps:$4 sm:$0xff]   ;;  %v14119_v46 = vld [vmem:[#allocation46_spill] sm:$0xff] }
 0x4ae   :  { %v3753_v33 = vpack.c.bf16 %v9639_v61, %v9637_v0  ;;  %4777 = vmatprep.subr.bf16.mxu1 %v10497_v53  ;;  %v14117_v0 = vld [vmem:[#allocation44_spill] sm:$0xff] }
 0x4af   :  { %v3754_v44 = vpack.c.bf16 %v9640_v20, %v9638_v41  ;;  %4778 = vmatpush1.bf16.msra.mxu1 %v10495_v2  ;;  %v14120_v20 = vld [vmem:[#allocation9_spill] sm:$0xff]  ;;  %v14123_v2 = vld [vmem:[#allocation12_spill] sm:$0xff] }
 0x4b1   :  { %v2678_v31 = vpop.f32.mrb[104].mxu0 }
 0x4b2   :  { %v9641_v47 = vadd.f32 %v12250_v43, %v2678_v31  ;;  %v2680_v8 = vpop.f32.mrb[105].mxu0  ;;  %v10500_v43 = vld [vmem:[%s14013_s3 + $0x1e4] ss:$8 sps:$4 sm:$0xff]  }
 0x4b3   :  { %v9642_v27 = vadd.f32 %v12259_v24, %v2680_v8  ;;  %v2682_v40 = vpop.f32.mrb[106].mxu0  ;;  %4779 = vmatprep.subr.bf16.mxu1 %v10500_v43  ;;  %v14121_v31 = vld [vmem:[#allocation10_spill] sm:$0xff] }
 0x4b4   :  { %v9643_v18 = vadd.f32 %v12262_v26, %v2682_v40  ;;  %v2684_v16 = vpop.f32.mrb[107].mxu0  ;;  %v10498_v26 = vld [vmem:[%s14013_s3 + $0x1e0] ss:$8 sps:$4 sm:$0xff]   ;;  %v14122_v40 = vld [vmem:[#allocation11_spill] sm:$0xff] }
 0x4b5   :  { %v9644_v17 = vadd.f32 %v12265_v59, %v2684_v16  ;;  %4780 = vmatpush1.bf16.msra.mxu1 %v10498_v26 }
 0x4b6   :  { %v3755_v32 = vpack.c.bf16 %v9643_v18, %v9641_v47 }
 0x4b7   :  { %v3756_v24 = vpack.c.bf16 %v9644_v17, %v9642_v27 }
 0x4b8   :  { %v12480_v11 = vmax.bf16 %v3755_v32, %v3751_v49 }
 0x4b9   :  { %v2688_v6 = vpop.f32.mrb[108].mxu0  ;;  %v12482_v9 = vmax.bf16 %v3756_v24, %v3752_v22 }
 0x4ba   :  { %v9645_v59 = vadd.f32 %v12270_v25, %v2688_v6  ;;  %4342 = vrot.lane.b32.xlu1 %v12480_v11, %s10945_s15  ;;  %v2690_v23 = vpop.f32.mrb[109].mxu0 }
 0x4bb   :  { %v9646_v39 = vadd.f32 %v12277_v57, %v2690_v23  ;;  %v2692_v60 = vpop.f32.mrb[110].mxu0 }
 0x4bc   :  { %v9647_v36 = vadd.f32 %v12280_v54, %v2692_v60  ;;  %v2694_v30 = vpop.f32.mrb[111].mxu0  ;;  %v14125_v60 = vld [vmem:[#allocation16_spill] sm:$0xff] }
 0x4bd   :  { %v9648_v58 = vadd.f32 %v12283_v13, %v2694_v30 }
 0x4be   :  { %v3757_v37 = vpack.c.bf16 %v9647_v36, %v9645_v59 }
 0x4bf   :  { %v3758_v45 = vpack.c.bf16 %v9648_v58, %v9646_v39  ;;  %v14126_v58 = vld [vmem:[#allocation17_spill] sm:$0xff] }
 0x4c0   :  { %v12490_v38 = vmax.bf16 %v3757_v37, %v3753_v33 }
 0x4c1   :  { %v2698_v35 = vpop.f32.mrb[112].mxu0  ;;  %v12492_v50 = vmax.bf16 %v3758_v45, %v3754_v44 }
 0x4c2   :  { %v9649_v25 = vadd.f32 %v12288_v52, %v2698_v35  ;;  %4346 = vrot.lane.b32.xlu1 %v12490_v38, %s10945_s15  ;;  %v2700_v57 = vpop.f32.mrb[113].mxu0 }
 0x4c3   :  { %v9650_v12 = vadd.f32 %v12301_v48, %v2700_v57  ;;  %v2702_v7 = vpop.f32.mrb[114].mxu0 }
 0x4c4   :  { %v9651_v54 = vadd.f32 %v12304_v62, %v2702_v7  ;;  %v2704_v28 = vpop.f32.mrb[115].mxu0 }
 0x4c5   :  { %v9652_v13 = vadd.f32 %v12307_v56, %v2704_v28 }
 0x4c6   :  { %v3759_v49 = vpack.c.bf16 %v9651_v54, %v9649_v25  ;;  %v10501_v25 = vld [vmem:[%s14013_s3 + $0x1f0] ss:$8 sps:$4 sm:$0xff]  }
 0x4c7   :  { %v3760_v22 = vpack.c.bf16 %v9652_v13, %v9650_v12 }
 0x4c9   :  { %v2708_v1 = vpop.f32.mrb[116].mxu0 }
 0x4ca   :  { %v9653_v4 = vadd.f32 %v14117_v0, %v2708_v1  ;;  %v2710_v41 = vpop.f32.mrb[117].mxu0  ;;  %v14127_v1 = vld [vmem:[#allocation28_spill] sm:$0xff]  ;;  %v14128_v0 = vld [vmem:[#allocation25_spill] sm:$0xff] }
 0x4cb   :  { %v9654_v52 = vadd.f32 %v14118_v10, %v2710_v41  ;;  %v2712_v61 = vpop.f32.mrb[118].mxu0  ;;  %v14130_v10 = vld [vmem:[#allocation30_spill] sm:$0xff] }
 0x4cc   :  { %v9655_v34 = vadd.f32 %v14119_v46, %v2712_v61  ;;  %v2714_v42 = vpop.f32.mrb[119].mxu0 }
 0x4cd   :  { %v9656_v48 = vadd.f32 %v14120_v20, %v2714_v42  ;;  %v14133_v42 = vld [vmem:[#allocation37_spill] sm:$0xff]  ;;  %v14134_v20 = vld [vmem:[#allocation39_spill] sm:$0xff] }
 0x4ce   :  { %v3761_v33 = vpack.c.bf16 %v9655_v34, %v9653_v4  ;;  %v14129_v4 = vpack.c.bf16 %v14127_v1, %v14128_v0  ;;  %v10506_v34 = vld [vmem:[%s14013_s3 + $0x4] ss:$8 sps:$4 sm:$0xff]   ;;  %v3962_v0 = vld [vmem:[%s14014_s2] sm:$0x3] }
 0x4cf   :  { %v3762_v44 = vpack.c.bf16 %v9656_v48, %v9654_v52  ;;  %v14131_v52 = vld [vmem:[#allocation26_spill] sm:$0xff]  ;;  %v14135_v48 = vld [vmem:[#allocation41_spill] sm:$0xff] }
 0x4d0   :  { %v14132_v61 = vpack.c.bf16 %v14130_v10, %v14131_v52 }
 0x4d1   :  { %v2718_v62 = vpop.f32.mrb[120].mxu0 }
 0x4d2   :  { %v9657_v47 = vadd.f32 %v14121_v31, %v2718_v62  ;;  %v2720_v56 = vpop.f32.mrb[121].mxu0  ;;  %v14138_v62 = vld [vmem:[#allocation47_spill] sm:$0xff]  ;;  %v3882_v31 = vlaneseq }
 0x4d3   :  { %v9658_v8 = vadd.f32 %v12331_v5, %v2720_v56  ;;  %v2722_v27 = vpop.f32.mrb[122].mxu0  ;;  %v14124_v5 = vld [vmem:[#allocation15_spill] sm:$0xff] }
 0x4d4   :  { %v9659_v18 = vadd.f32 %v14122_v40, %v2722_v27  ;;  %v2724_v16 = vpop.f32.mrb[123].mxu0  ;;  %v3883_v56 = vshrl.u32 %v3882_v31, 7  ;;  %v14139_v27 = vld [vmem:[#allocation33_spill] sm:$0xff] }
 0x4d5   :  { %v9660_v53 = vadd.f32 %v14123_v2, %v2724_v16  ;;  %v3880_v2 = vld [vmem:[%s14014_s2] sm:$0x3] }
 0x4d6   :  { %v3763_v17 = vpack.c.bf16 %v9659_v18, %v9657_v47  ;;  %v3854_v47 = vpop.permute.xlu1 %3853  ;;  %v12571_v18 = vsub.s32 1, %v3883_v56 }
 0x4d7   :  { %v3764_v43 = vpack.c.bf16 %v9660_v53, %v9658_v8  ;;  %v3866_v8 = vsel %vm3855_vm1, %v3854_v47, 0 }
 0x4d8   :  { %v12508_v32 = vmax.bf16 %v3763_v17, %v3759_v49  ;;  %v3871_v40 = vmax.bf16 %v3866_v8, %v14139_v27  ;;  %v3971_v27 = vrot.slane %v3962_v0, %v12571_v18 }
 0x4d9   :  { %v2728_v24 = vpop.f32.mrb[124].mxu0  ;;  %v12510_v26 = vmax.bf16 %v3764_v43, %v3760_v22 }
 0x4da   :  { %v9661_v6 = vadd.f32 %v12342_v15, %v2728_v24  ;;  %4424 = vrot.lane.b32.xlu1 %v12508_v32, %s10945_s15  ;;  %v2730_v59 = vpop.f32.mrb[125].mxu0  ;;  %v10503_v15 = vld [vmem:[%s14013_s3 + $0x1f4] ss:$8 sps:$4 sm:$0xff]   ;;  %v3852_v16 = vpop.permute.xlu1 %3851  ;;  %v3877_v43 = vunpack.c.l.bf16 %v3871_v40 }
 0x4db   :  { %v9662_v23 = vadd.f32 %v14124_v5, %v2730_v59  ;;  %v2732_v39 = vpop.f32.mrb[126].mxu0  ;;  %4781 = vmatprep.subr.bf16.mxu1 %v10503_v15  ;;  %v3857_v24 = vsel %vm3855_vm1, %v3852_v16, %v3854_v47  ;;  %v3889_v59 = vrot.slane %v3880_v2, %v12571_v18  ;;  %v3879_v5 = vunpack.c.h.bf16 %v3871_v40 }
 0x4dc   :  { %v9663_v36 = vadd.f32 %v14125_v60, %v2732_v39  ;;  %v2734_v30 = vpop.f32.mrb[127].mxu0  ;;  %4782 = vmatpush1.bf16.msra.mxu1 %v10501_v25 }
 0x4dd   :  { %v9664_v37 = vadd.f32 %v14126_v58, %v2734_v30  ;;  %5104 = vmatprep.subr.bf16.mxu1 %v10506_v34  ;;  %v14140_v30 = vld [vmem:[#allocation32_spill] sm:$0xff]  ;;  %v3897_v15 = vadd.f32 %v3889_v59, %v3877_v43 }
 0x4de   :  { %v3765_v45 = vpack.c.bf16 %v9663_v36, %v9661_v6  ;;  %v3870_v58 = vmax.bf16 %v3857_v24, %v14140_v30 }
 0x4df   :  { %v3766_v35 = vpack.c.bf16 %v9664_v37, %v9662_v23  ;;  %v12579_v23 = vsub.s32 0, %v3883_v56  ;;  %v3905_v31 = vmax.f32 %v3897_v15, 0.0 }
 0x4e0   :  { %v12524_v57 = vmax.bf16 %v3765_v45, %v3761_v33  ;;  %v14136_v33 = vld [vmem:[#allocation43_spill] sm:$0xff]  ;;  %v3878_v10 = vunpack.c.h.bf16 %v3870_v58 }
 0x4e1   :  { %v3256_v12 = vpop.f32.mrb[0].mxu0  ;;  %v12526_v7 = vmax.bf16 %v3766_v35, %v3762_v44  ;;  %v14137_v44 = vld [vmem:[#allocation14_spill] sm:$0xff] }
 0x4e2   :  { %4428 = vrot.lane.b32.xlu1 %v12524_v57, %s10945_s15  ;;  %v3258_v54 = vpop.f32.mrb[1].mxu0 }
 0x4e3   :  { %v3260_v28 = vpop.f32.mrb[2].mxu0 }
 0x4e4   :  { %v3703_v13 = vpack.c.bf16 %v3260_v28, %v3256_v12  ;;  %v3262_v49 = vpop.f32.mrb[3].mxu0  ;;  %v3885_v12 = vrot.slane %v3880_v2, %v12579_v23 }
 0x4e5   :  { %v3704_v22 = vpack.c.bf16 %v3262_v49, %v3258_v54  ;;  %v3899_v54 = vadd.f32 %v3889_v59, %v3879_v5  ;;  %v14141_v5 = vld [vmem:[#allocation36_spill] sm:$0xff] }
 0x4e6   :  { %v3839_v41 = vmax.bf16 %v14129_v4, %v3703_v13  ;;  %v3876_v4 = vunpack.c.l.bf16 %v3870_v58 }
 0x4e7   :  { %v3840_v46 = vmax.bf16 %v14132_v61, %v3704_v22  ;;  %v3907_v8 = vmax.f32 %v3899_v54, 0.0 }
 0x4e8   :  { %v3896_v24 = vadd.f32 %v3885_v12, %v3876_v4 }
 0x4e9   :  { %3849 = vrot.lane.b32.xlu0 %v3840_v46, %s10945_s15  ;;  %v12605_v30 = vpack.c.bf16 %v3907_v8, %v3905_v31  ;;  %v4044_v8 = vld [vmem:[%s14014_s2] sm:$0x3] }
 0x4ed   :  { %3847 = vrot.lane.b32.xlu0 %v3839_v41, %s10945_s15 }
 0x4f1   :  { %3934 = vrot.lane.b32.xlu0 %v14133_v42, %s10945_s15 }
 0x4f5   :  { %3938 = vrot.lane.b32.xlu0 %v14134_v20, %s10945_s15 }
 0x4f9   :  { %4016 = vrot.lane.b32.xlu0 %v14135_v48, %s10945_s15 }
 0x4fd   :  { %4020 = vrot.lane.b32.xlu0 %v14136_v33, %s10945_s15 }
 0x501   :  { %4098 = vrot.lane.b32.xlu0 %v14137_v44, %s10945_s15 }
 0x505   :  { %4102 = vrot.lane.b32.xlu0 %v14138_v62, %s10945_s15 }
 0x509   :  { %4180 = vrot.lane.b32.xlu0 %v12390_v21, %s10945_s15 }
 0x50d   :  { %4184 = vrot.lane.b32.xlu0 %v12406_v29, %s10945_s15 }
 0x511   :  { %4262 = vrot.lane.b32.xlu0 %v12430_v14, %s10945_s15 }
 0x515   :  { %4266 = vrot.lane.b32.xlu0 %v12446_v51, %s10945_s15 }
 0x519   :  { %4344 = vrot.lane.b32.xlu0 %v12482_v9, %s10945_s15 }
 0x51d   :  { %4348 = vrot.lane.b32.xlu0 %v12492_v50, %s10945_s15 }
 0x521   :  { %4426 = vrot.lane.b32.xlu0 %v12510_v26, %s10945_s15 }
 0x525   :  { %4430 = vrot.lane.b32.xlu0 %v12526_v7, %s10945_s15 }
 0x55b   :  { %v3850_v53 = vpop.permute.xlu0 %3849 }
 0x55c   :  { %v3863_v17 = vsel %vm3855_vm1, %v3850_v53, 0 }
 0x55d   :  { %v3869_v6 = vmax.bf16 %v3863_v17, %v3840_v46 }
 0x55f   :  { %v3873_v39 = vunpack.c.l.bf16 %v3869_v6  ;;  %v3875_v60 = vunpack.c.h.bf16 %v3869_v6  ;;  %v3848_v36 = vpop.permute.xlu0 %3847  ;;  %v3898_v6 = vadd.f32 %v3885_v12, %v3878_v10 }
 0x560   :  { %v3856_v37 = vsel %vm3855_vm1, %v3848_v36, %v3850_v53 }
 0x561   :  { %v3868_v45 = vmax.bf16 %v3856_v37, %v3839_v41  ;;  %v3893_v35 = vadd.f32 %v3889_v59, %v3873_v39  ;;  %v3895_v25 = vadd.f32 %v3889_v59, %v3875_v60  ;;  %v3933_v41 = vpop.permute.xlu1 %3932  ;;  %v10509_v60 = vld [vmem:[%s14013_s3 + $0x14] ss:$8 sps:$4 sm:$0xff]   ;;  %v3906_v15 = vmax.f32 %v3898_v6, 0.0 }
 0x562   :  { %v4053_v6 = vrot.slane %v4044_v8, %v12571_v18 }
 0x563   :  { %v3872_v28 = vunpack.c.l.bf16 %v3868_v45  ;;  %v3874_v13 = vunpack.c.h.bf16 %v3868_v45  ;;  %v3935_v49 = vpop.permute.xlu0 %3934  ;;  %v3901_v22 = vmax.f32 %v3893_v35, 0.0  ;;  %v3903_v1 = vmax.f32 %v3895_v25, 0.0 }
 0x564   :  { %v3945_v52 = vsel %vm3855_vm1, %v3935_v49, 0  ;;  %v3940_v47 = vsel %vm3855_vm1, %v3933_v41, %v3935_v49  ;;  %v3904_v25 = vmax.f32 %v3896_v24, 0.0  ;;  %v10512_v49 = vld [vmem:[%s14013_s3 + $0x24] ss:$8 sps:$4 sm:$0xff]   ;;  %v10513_v24 = vld [vmem:[%s14013_s3 + $0x30] ss:$8 sps:$4 sm:$0xff]  }
 0x565   :  { %v3892_v61 = vadd.f32 %v3885_v12, %v3872_v28  ;;  %v3894_v46 = vadd.f32 %v3885_v12, %v3874_v13  ;;  %v3951_v34 = vmax.bf16 %v3945_v52, %v14133_v42  ;;  %v12590_v56 = vpack.c.bf16 %v3903_v1, %v3901_v22  ;;  %v10504_v42 = vld [vmem:[%s14013_s3] ss:$8 sps:$4 sm:$0xff]   ;;  %v3937_v45 = vpop.permute.xlu1 %3936  ;;  %v10507_v12 = vld [vmem:[%s14013_s3 + $0x10] ss:$8 sps:$4 sm:$0xff]  }
 0x566   :  { %v3950_v39 = vmax.bf16 %v3940_v47, %v14141_v5  ;;  %v3967_v13 = vrot.slane %v3962_v0, %v12579_v23  ;;  %v14142_v41 = vld [vmem:[#allocation38_spill] sm:$0xff]  ;;  %v10515_v47 = vld [vmem:[%s14013_s3 + $0x34] ss:$8 sps:$4 sm:$0xff]  }
 0x567   :  { %v3900_v40 = vmax.f32 %v3892_v61, 0.0  ;;  %v3902_v16 = vmax.f32 %v3894_v46, 0.0  ;;  %v3955_v2 = vunpack.c.l.bf16 %v3951_v34  ;;  %v3939_v53 = vpop.permute.xlu0 %3938  ;;  %v3957_v17 = vunpack.c.h.bf16 %v3951_v34  ;;  %4783 = vmatprep.mubr.bf16.mxu1 %v12590_v56  ;;  %v10510_v46 = vld [vmem:[%s14013_s3 + $0x20] ss:$8 sps:$4 sm:$0xff]  }
 0x568   :  { %v3948_v43 = vsel %vm3855_vm1, %v3939_v53, 0  ;;  %v3954_v54 = vunpack.c.l.bf16 %v3950_v39  ;;  %v3956_v28 = vunpack.c.h.bf16 %v3950_v39  ;;  %v12622_v34 = vpack.c.bf16 %v3906_v15, %v3904_v25  ;;  %v14143_v15 = vld [vmem:[#allocation40_spill] sm:$0xff] }
 0x569   :  { %v12598_v59 = vpack.c.bf16 %v3902_v16, %v3900_v40  ;;  %v3953_v36 = vmax.bf16 %v3948_v43, %v14134_v20  ;;  %v3975_v58 = vadd.f32 %v3971_v27, %v3955_v2  ;;  %v3977_v37 = vadd.f32 %v3971_v27, %v3957_v17  ;;  %v4015_v17 = vpop.permute.xlu1 %4014 }
 0x56a   :  { %v3941_v20 = vsel %vm3855_vm1, %v3937_v45, %v3939_v53  ;;  %v3974_v0 = vadd.f32 %v3967_v13, %v3954_v54  ;;  %v3976_v31 = vadd.f32 %v3967_v13, %v3956_v28 }
 0x56b   :  { %4784 = vmatmul.mubr.bf16.vlgmr.msra.gmra.mrb[124].mxu1 %v12598_v59  ;;  %v4017_v35 = vpop.permute.xlu0 %4016  ;;  %v3959_v22 = vunpack.c.l.bf16 %v3953_v36  ;;  %v3961_v1 = vunpack.c.h.bf16 %v3953_v36  ;;  %v3983_v4 = vmax.f32 %v3975_v58, 0.0  ;;  %v3985_v10 = vmax.f32 %v3977_v37, 0.0 }
 0x56c   :  { %4793 = vmatprep.mubr.bf16.mxu1 %v12605_v30  ;;  %5105 = vmatpush1.bf16.msra.mxu1 %v10504_v42  ;;  %v4027_v52 = vsel %vm3855_vm1, %v4017_v35, 0  ;;  %v3952_v61 = vmax.bf16 %v3941_v20, %v14142_v41  ;;  %v3982_v39 = vmax.f32 %v3974_v0, 0.0 }
 0x56d   :  { %5106 = vmatprep.subr.bf16.mxu1 %v10509_v60  ;;  %v4033_v40 = vmax.bf16 %v4027_v52, %v14135_v48  ;;  %v12631_v16 = vpack.c.bf16 %v3985_v10, %v3983_v4  ;;  %v3979_v2 = vadd.f32 %v3971_v27, %v3959_v22  ;;  %v3981_v53 = vadd.f32 %v3971_v27, %v3961_v1  ;;  %v10518_v27 = vld [vmem:[%s14013_s3 + $0x44] ss:$8 sps:$4 sm:$0xff]   ;;  %v4019_v52 = vpop.permute.xlu1 %4018 }
 0x56e   :  { %v3958_v43 = vunpack.c.l.bf16 %v3952_v61  ;;  %v3960_v5 = vunpack.c.h.bf16 %v3952_v61  ;;  %v4022_v48 = vsel %vm3855_vm1, %v4015_v17, %v4017_v35  ;;  %v3984_v60 = vmax.f32 %v3976_v31, 0.0  ;;  %v10516_v35 = vld [vmem:[%s14013_s3 + $0x40] ss:$8 sps:$4 sm:$0xff]  }
 0x56f   :  { %v4021_v42 = vpop.permute.xlu0 %4020  ;;  %v4037_v36 = vunpack.c.l.bf16 %v4033_v40  ;;  %v4039_v58 = vunpack.c.h.bf16 %v4033_v40  ;;  %v3987_v37 = vmax.f32 %v3979_v2, 0.0  ;;  %v3989_v45 = vmax.f32 %v3981_v53, 0.0  ;;  %v10524_v40 = vld [vmem:[%s14013_s3 + $0x64] ss:$8 sps:$4 sm:$0xff]  }
 0x570   :  { %5107 = vmatpush1.bf16.msra.mxu1 %v10507_v12  ;;  %v4030_v25 = vsel %vm3855_vm1, %v4021_v42, 0  ;;  %v4032_v12 = vmax.bf16 %v4022_v48, %v14143_v15  ;;  %v12648_v54 = vpack.c.bf16 %v3984_v60, %v3982_v39  ;;  %v3978_v28 = vadd.f32 %v3967_v13, %v3958_v43 }
 0x571   :  { %5108 = vmatprep.subr.bf16.mxu1 %v10512_v49  ;;  %v3980_v20 = vadd.f32 %v3967_v13, %v3960_v5  ;;  %v10521_v49 = vld [vmem:[%s14013_s3 + $0x54] ss:$8 sps:$4 sm:$0xff]   ;;  %v4035_v22 = vmax.bf16 %v4030_v25, %v14136_v33  ;;  %v12654_v1 = vpack.c.bf16 %v3989_v45, %v3987_v37  ;;  %v4057_v4 = vadd.f32 %v4053_v6, %v4037_v36  ;;  %v4097_v15 = vpop.permute.xlu1 %4096 }
 0x572   :  { %v4059_v10 = vadd.f32 %v4053_v6, %v4039_v58  ;;  %v4036_v41 = vunpack.c.l.bf16 %v4032_v12  ;;  %v4049_v13 = vrot.slane %v4044_v8, %v12579_v23  ;;  %v4038_v0 = vunpack.c.h.bf16 %v4032_v12  ;;  %v10527_v36 = vld [vmem:[%s14013_s3 + $0x74] ss:$8 sps:$4 sm:$0xff]  }
 0x573   :  { %4794 = vmatmul.mubr.bf16.gmra.mrb[128].mxu1 %v12622_v34  ;;  %v4099_v61 = vpop.permute.xlu0 %4098  ;;  %v4023_v33 = vsel %vm3855_vm1, %v4019_v52, %v4021_v42  ;;  %v3986_v31 = vmax.f32 %v3978_v28, 0.0  ;;  %v4041_v2 = vunpack.c.l.bf16 %v4035_v22  ;;  %v4043_v53 = vunpack.c.h.bf16 %v4035_v22  ;;  %v10522_v42 = vld [vmem:[%s14013_s3 + $0x60] ss:$8 sps:$4 sm:$0xff]  }
 0x574   :  { %4803 = vmatprep.mubr.bf16.mxu1 %v12631_v16  ;;  %5109 = vmatpush1.bf16.msra.mxu1 %v10510_v46  ;;  %v10519_v46 = vld [vmem:[%s14013_s3 + $0x50] ss:$8 sps:$4 sm:$0xff]   ;;  %v4065_v17 = vmax.f32 %v4057_v4, 0.0  ;;  %v4067_v43 = vmax.f32 %v4059_v10, 0.0  ;;  %v4109_v8 = vsel %vm3855_vm1, %v4099_v61, 0  ;;  %v4056_v39 = vadd.f32 %v4049_v13, %v4036_v41 }
 0x575   :  { %5110 = vmatprep.subr.bf16.mxu1 %v10515_v47  ;;  %v3988_v47 = vmax.f32 %v3980_v20, 0.0  ;;  %v4058_v60 = vadd.f32 %v4049_v13, %v4038_v0  ;;  %v4115_v58 = vmax.bf16 %v4109_v8, %v14137_v44  ;;  %v4061_v45 = vadd.f32 %v4053_v6, %v4041_v2  ;;  %v10525_v20 = vld [vmem:[%s14013_s3 + $0x70] ss:$8 sps:$4 sm:$0xff]  }
 0x576   :  { %v12680_v37 = vpack.c.bf16 %v4067_v43, %v4065_v17  ;;  %v4063_v25 = vadd.f32 %v4053_v6, %v4043_v53  ;;  %v4104_v44 = vsel %vm3855_vm1, %v4097_v15, %v4099_v61  ;;  %v4064_v22 = vmax.f32 %v4056_v39, 0.0  ;;  %v10530_v6 = vld [vmem:[%s14013_s3 + $0x84] ss:$8 sps:$4 sm:$0xff]   ;;  %v10528_v61 = vld [vmem:[%s14013_s3 + $0x80] ss:$8 sps:$4 sm:$0xff]  }
 0x577   :  { %v12671_v48 = vpack.c.bf16 %v3988_v47, %v3986_v31  ;;  %v4066_v4 = vmax.f32 %v4058_v60, 0.0  ;;  %v4119_v10 = vunpack.c.l.bf16 %v4115_v58  ;;  %v4121_v52 = vunpack.c.h.bf16 %v4115_v58  ;;  %v10533_v53 = vld [vmem:[%s14013_s3 + $0x94] ss:$8 sps:$4 sm:$0xff]   ;;  %v10531_v60 = vld [vmem:[%s14013_s3 + $0x90] ss:$8 sps:$4 sm:$0xff]  }
 0x578   :  { %5111 = vmatpush1.bf16.msra.mxu1 %v10513_v24  ;;  %v14144_v24 = vld [vmem:[#allocation42_spill] sm:$0xff]  ;;  %v4069_v41 = vmax.f32 %v4061_v45, 0.0 }
 0x579   :  { %5112 = vmatprep.subr.bf16.mxu1 %v10518_v27  ;;  %v4034_v5 = vmax.bf16 %v4023_v33, %v14144_v24  ;;  %v4126_v27 = vld [vmem:[%s14014_s2] sm:$0x3]  ;;  %v12697_v47 = vpack.c.bf16 %v4066_v4, %v4064_v22 }
 0x57a   :  { %v4135_v28 = vrot.slane %v4126_v27, %v12571_v18  ;;  %v14145_v33 = vld [vmem:[#allocation13_spill] sm:$0xff] }
 0x57b   :  { %4804 = vmatmul.mubr.bf16.gmra.mrb[132].mxu1 %v12648_v54  ;;  %v4040_v12 = vunpack.c.l.bf16 %v4034_v5  ;;  %v4114_v31 = vmax.bf16 %v4104_v44, %v14145_v33  ;;  %v14146_v44 = vld [vmem:[#allocation18_spill] sm:$0xff] }
 0x57c   :  { %4813 = vmatprep.mubr.bf16.mxu1 %v12654_v1  ;;  %5113 = vmatpush1.bf16.msra.mxu1 %v10516_v35  ;;  %v4103_v35 = vpop.permute.xlu0 %4102  ;;  %v4139_v8 = vadd.f32 %v4135_v28, %v4119_v10  ;;  %v4141_v24 = vadd.f32 %v4135_v28, %v4121_v52  ;;  %v4208_v52 = vld [vmem:[%s14014_s2] sm:$0x3] }
 0x57d   :  { %5114 = vmatprep.subr.bf16.mxu1 %v10521_v49  ;;  %v4042_v49 = vunpack.c.h.bf16 %v4034_v5  ;;  %v4112_v0 = vsel %vm3855_vm1, %v4103_v35, 0  ;;  %v4101_v5 = vpop.permute.xlu1 %4100 }
 0x57e   :  { %v4117_v17 = vmax.bf16 %v4112_v0, %v14138_v62  ;;  %v4105_v62 = vsel %vm3855_vm1, %v4101_v5, %v4103_v35  ;;  %v10534_v35 = vld [vmem:[%s14013_s3 + $0xa0] ss:$8 sps:$4 sm:$0xff]  }
 0x57f   :  { %v4062_v2 = vadd.f32 %v4049_v13, %v4042_v49  ;;  %v4149_v49 = vmax.f32 %v4141_v24, 0.0  ;;  %v4116_v22 = vmax.bf16 %v4105_v62, %v14146_v44 }
 0x580   :  { %5115 = vmatpush1.bf16.msra.mxu1 %v10519_v46  ;;  %v4071_v46 = vmax.f32 %v4063_v25, 0.0  ;;  %v4181_v39 = vpop.permute.xlu0 %4180  ;;  %v10536_v25 = vld [vmem:[%s14013_s3 + $0xa4] ss:$8 sps:$4 sm:$0xff]   ;;  %v4123_v15 = vunpack.c.l.bf16 %v4117_v17 }
 0x581   :  { %5116 = vmatprep.subr.bf16.mxu1 %v10524_v40  ;;  %v4060_v40 = vadd.f32 %v4049_v13, %v4040_v12  ;;  %v4131_v13 = vrot.slane %v4126_v27, %v12579_v23  ;;  %v4070_v45 = vmax.f32 %v4062_v2, 0.0  ;;  %v4125_v12 = vunpack.c.h.bf16 %v4117_v17  ;;  %v10537_v17 = vld [vmem:[%s14013_s3 + $0xb0] ss:$8 sps:$4 sm:$0xff]  }
 0x582   :  { %v12703_v43 = vpack.c.bf16 %v4071_v46, %v4069_v41  ;;  %v4191_v27 = vsel %vm3855_vm1, %v4181_v39, 0  ;;  %v10539_v41 = vld [vmem:[%s14013_s3 + $0xb4] ss:$8 sps:$4 sm:$0xff]   ;;  %v4143_v33 = vadd.f32 %v4135_v28, %v4123_v15 }
 0x583   :  { %4814 = vmatmul.mubr.bf16.gmra.mrb[136].mxu1 %v12671_v48  ;;  %v4068_v58 = vmax.f32 %v4060_v40, 0.0  ;;  %v4197_v46 = vmax.bf16 %v4191_v27, %v12390_v21  ;;  %v4122_v40 = vunpack.c.l.bf16 %v4116_v22 }
 0x584   :  { %4823 = vmatprep.mubr.bf16.mxu1 %v12680_v37  ;;  %5117 = vmatpush1.bf16.msra.mxu1 %v10522_v42  ;;  %v4118_v42 = vunpack.c.l.bf16 %v4114_v31  ;;  %v4185_v2 = vpop.permute.xlu0 %4184 }
 0x585   :  { %5118 = vmatprep.subr.bf16.mxu1 %v10527_v36  ;;  %v4120_v36 = vunpack.c.h.bf16 %v4114_v31  ;;  %v12720_v4 = vpack.c.bf16 %v4070_v45, %v4068_v58  ;;  %v4145_v31 = vadd.f32 %v4135_v28, %v4125_v12  ;;  %v10542_v28 = vld [vmem:[%s14013_s3 + $0xc4] ss:$8 sps:$4 sm:$0xff]   ;;  %v4194_v58 = vsel %vm3855_vm1, %v4185_v2, 0 }
 0x586   :  { %v4142_v15 = vadd.f32 %v4131_v13, %v4122_v40 }
 0x587   :  { %v4140_v10 = vadd.f32 %v4131_v13, %v4120_v36  ;;  %v4151_v36 = vmax.f32 %v4143_v33, 0.0  ;;  %v4153_v62 = vmax.f32 %v4145_v31, 0.0  ;;  %v10548_v31 = vld [vmem:[%s14013_s3 + $0xe4] ss:$8 sps:$4 sm:$0xff]  }
 0x588   :  { %5119 = vmatpush1.bf16.msra.mxu1 %v10525_v20  ;;  %v4147_v20 = vmax.f32 %v4139_v8, 0.0  ;;  %v4124_v8 = vunpack.c.h.bf16 %v4116_v22 }
 0x589   :  { %5120 = vmatprep.subr.bf16.mxu1 %v10530_v6  ;;  %v4138_v6 = vadd.f32 %v4131_v13, %v4118_v42  ;;  %v4148_v5 = vmax.f32 %v4140_v10, 0.0  ;;  %v4201_v42 = vunpack.c.l.bf16 %v4197_v46  ;;  %v12752_v27 = vpack.c.bf16 %v4153_v62, %v4151_v36  ;;  %v10543_v10 = vld [vmem:[%s14013_s3 + $0xd0] ss:$8 sps:$4 sm:$0xff]  }
 0x58a   :  { %v12729_v0 = vpack.c.bf16 %v4149_v49, %v4147_v20  ;;  %v4144_v12 = vadd.f32 %v4131_v13, %v4124_v8  ;;  %v10545_v20 = vld [vmem:[%s14013_s3 + $0xd4] ss:$8 sps:$4 sm:$0xff]   ;;  %v4199_v49 = vmax.bf16 %v4194_v58, %v12406_v29  ;;  %v4213_v13 = vrot.slane %v4208_v52, %v12579_v23 }
 0x58b   :  { %4824 = vmatmul.mubr.bf16.gmra.mrb[140].mxu1 %v12697_v47  ;;  %v4146_v24 = vmax.f32 %v4138_v6, 0.0  ;;  %v4263_v6 = vpop.permute.xlu0 %4262 }
 0x58c   :  { %4833 = vmatprep.mubr.bf16.mxu1 %v12703_v43  ;;  %5121 = vmatpush1.bf16.msra.mxu1 %v10528_v61  ;;  %v4179_v61 = vpop.permute.xlu1 %4178  ;;  %v4152_v33 = vmax.f32 %v4144_v12, 0.0  ;;  %v4207_v40 = vunpack.c.h.bf16 %v4199_v49 }
 0x58d   :  { %5122 = vmatprep.subr.bf16.mxu1 %v10533_v53  ;;  %v4217_v53 = vrot.slane %v4208_v52, %v12571_v18  ;;  %v4186_v21 = vsel %vm3855_vm1, %v4179_v61, %v4181_v39  ;;  %v10540_v39 = vld [vmem:[%s14013_s3 + $0xc0] ss:$8 sps:$4 sm:$0xff]   ;;  %v4205_v61 = vunpack.c.l.bf16 %v4199_v49  ;;  %v4273_v52 = vsel %vm3855_vm1, %v4263_v6, 0 }
 0x58e   :  { %v4196_v45 = vmax.bf16 %v4186_v21, %v12388_v63 }
 0x58f   :  { %v4221_v44 = vadd.f32 %v4217_v53, %v4201_v42  ;;  %v4290_v42 = vld [vmem:[%s14014_s2] sm:$0x3]  ;;  %v4225_v62 = vadd.f32 %v4217_v53, %v4205_v61  ;;  %v4227_v58 = vadd.f32 %v4217_v53, %v4207_v40 }
 0x590   :  { %5123 = vmatpush1.bf16.msra.mxu1 %v10531_v60  ;;  %v4203_v60 = vunpack.c.h.bf16 %v4197_v46  ;;  %v4183_v22 = vpop.permute.xlu1 %4182  ;;  %v4150_v46 = vmax.f32 %v4142_v15, 0.0  ;;  %v4267_v15 = vpop.permute.xlu0 %4266  ;;  %v4299_v12 = vrot.slane %v4290_v42, %v12571_v18 }
 0x591   :  { %5124 = vmatprep.subr.bf16.mxu1 %v10536_v25  ;;  %v12746_v25 = vpack.c.bf16 %v4148_v5, %v4146_v24  ;;  %v4187_v29 = vsel %vm3855_vm1, %v4183_v22, %v4185_v2  ;;  %v10546_v2 = vld [vmem:[%s14013_s3 + $0xe0] ss:$8 sps:$4 sm:$0xff]  }
 0x592   :  { %v4223_v63 = vadd.f32 %v4217_v53, %v4203_v60  ;;  %v4198_v21 = vmax.bf16 %v4187_v29, %v12404_v3  ;;  %v12769_v24 = vpack.c.bf16 %v4152_v33, %v4150_v46  ;;  %v10551_v60 = vld [vmem:[%s14013_s3 + $0xf4] ss:$8 sps:$4 sm:$0xff]   ;;  %v4279_v3 = vmax.bf16 %v4273_v52, %v12430_v14  ;;  %v10554_v53 = vld [vmem:[%s14013_s3 + $0x204] ss:$8 sps:$4 sm:$0xff]  }
 0x593   :  { %4834 = vmatmul.mubr.bf16.gmra.mrb[144].mxu1 %v12720_v4  ;;  %v4276_v29 = vsel %vm3855_vm1, %v4267_v15, 0 }
 0x594   :  { %4843 = vmatprep.mubr.bf16.mxu1 %v12729_v0  ;;  %5125 = vmatpush1.bf16.msra.mxu1 %v10534_v35  ;;  %v4200_v35 = vunpack.c.l.bf16 %v4196_v45  ;;  %v4231_v8 = vmax.f32 %v4223_v63, 0.0  ;;  %v4206_v49 = vunpack.c.h.bf16 %v4198_v21  ;;  %v4283_v22 = vunpack.c.l.bf16 %v4279_v3 }
 0x595   :  { %5126 = vmatprep.subr.bf16.mxu1 %v10539_v41  ;;  %v4202_v41 = vunpack.c.h.bf16 %v4196_v45  ;;  %v4261_v45 = vpop.permute.xlu1 %4260  ;;  %v4281_v61 = vmax.bf16 %v4276_v29, %v12446_v51 }
 0x596   :  { %v4220_v5 = vadd.f32 %v4213_v13, %v4200_v35  ;;  %v4268_v14 = vsel %vm3855_vm1, %v4261_v45, %v4263_v6  ;;  %v4285_v35 = vunpack.c.h.bf16 %v4279_v3  ;;  %v4226_v6 = vadd.f32 %v4213_v13, %v4206_v49 }
 0x597   :  { %v4278_v46 = vmax.bf16 %v4268_v14, %v12428_v55  ;;  %v4295_v55 = vrot.slane %v4290_v42, %v12579_v23  ;;  %v4287_v3 = vunpack.c.l.bf16 %v4281_v61  ;;  %v4289_v51 = vunpack.c.h.bf16 %v4281_v61  ;;  %v4372_v42 = vld [vmem:[%s14014_s2] sm:$0x3] }
 0x598   :  { %5127 = vmatpush1.bf16.msra.mxu1 %v10537_v17  ;;  %v4229_v17 = vmax.f32 %v4221_v44, 0.0  ;;  %v4228_v44 = vmax.f32 %v4220_v5, 0.0 }
 0x599   :  { %5128 = vmatprep.subr.bf16.mxu1 %v10542_v28  ;;  %v4222_v28 = vadd.f32 %v4213_v13, %v4202_v41  ;;  %v4235_v41 = vmax.f32 %v4227_v58, 0.0  ;;  %v4265_v52 = vpop.permute.xlu1 %4264  ;;  %v4284_v5 = vunpack.c.h.bf16 %v4278_v46 }
 0x59a   :  { %v12778_v36 = vpack.c.bf16 %v4231_v8, %v4229_v17  ;;  %v4303_v17 = vadd.f32 %v4299_v12, %v4283_v22  ;;  %v4305_v8 = vadd.f32 %v4299_v12, %v4285_v35 }
 0x59b   :  { %4844 = vmatmul.mubr.bf16.gmra.mrb[148].mxu1 %v12746_v25  ;;  %v4230_v63 = vmax.f32 %v4222_v28, 0.0  ;;  %v4269_v28 = vsel %vm3855_vm1, %v4265_v52, %v4267_v15  ;;  %v4304_v14 = vadd.f32 %v4295_v55, %v4284_v5 }
 0x59c   :  { %4853 = vmatprep.mubr.bf16.mxu1 %v12752_v27  ;;  %5129 = vmatpush1.bf16.msra.mxu1 %v10540_v39  ;;  %v4204_v39 = vunpack.c.l.bf16 %v4198_v21  ;;  %v4282_v21 = vunpack.c.l.bf16 %v4278_v46  ;;  %v4313_v58 = vmax.f32 %v4305_v8, 0.0 }
 0x59d   :  { %5130 = vmatprep.subr.bf16.mxu1 %v10545_v20  ;;  %v10549_v20 = vld [vmem:[%s14013_s3 + $0xf0] ss:$8 sps:$4 sm:$0xff]   ;;  %v12792_v33 = vpack.c.bf16 %v4230_v63, %v4228_v44  ;;  %v4307_v63 = vadd.f32 %v4299_v12, %v4287_v3  ;;  %v4343_v22 = vpop.permute.xlu1 %4342 }
 0x59e   :  { %v4302_v49 = vadd.f32 %v4295_v55, %v4282_v21 }
 0x59f   :  { %v4315_v61 = vmax.f32 %v4307_v63, 0.0 }
 0x5a0   :  { %5131 = vmatpush1.bf16.msra.mxu1 %v10543_v10  ;;  %v4233_v10 = vmax.f32 %v4225_v62, 0.0  ;;  %v4311_v62 = vmax.f32 %v4303_v17, 0.0  ;;  %v4310_v46 = vmax.f32 %v4302_v49, 0.0 }
 0x5a1   :  { %5132 = vmatprep.subr.bf16.mxu1 %v10548_v31  ;;  %v4224_v31 = vadd.f32 %v4213_v13, %v4204_v39  ;;  %v4280_v39 = vmax.bf16 %v4269_v28, %v12444_v19  ;;  %v4381_v19 = vrot.slane %v4372_v42, %v12571_v18  ;;  %v4347_v3 = vpop.permute.xlu1 %4346 }
 0x5a2   :  { %v12795_v40 = vpack.c.bf16 %v4235_v41, %v4233_v10  ;;  %v12809_v44 = vpack.c.bf16 %v4313_v58, %v4311_v62  ;;  %v4377_v58 = vrot.slane %v4372_v42, %v12579_v23  ;;  %v4454_v42 = vld [vmem:[%s14014_s2] sm:$0x3] }
 0x5a3   :  { %4854 = vmatmul.mubr.bf16.gmra.mrb[152].mxu1 %v12769_v24  ;;  %v4232_v13 = vmax.f32 %v4224_v31, 0.0  ;;  %v4286_v35 = vunpack.c.l.bf16 %v4280_v39  ;;  %v4288_v41 = vunpack.c.h.bf16 %v4280_v39  ;;  %v4312_v31 = vmax.f32 %v4304_v14, 0.0 }
 0x5a4   :  { %4863 = vmatprep.mubr.bf16.mxu1 %v12778_v36  ;;  %5133 = vmatpush1.bf16.msra.mxu1 %v10546_v2  ;;  %v4345_v2 = vpop.permute.xlu0 %4344 }
 0x5a5   :  { %5134 = vmatprep.subr.bf16.mxu1 %v10551_v60  ;;  %v4234_v60 = vmax.f32 %v4226_v6, 0.0  ;;  %v4355_v45 = vsel %vm3855_vm1, %v4345_v2, 0  ;;  %v4350_v29 = vsel %vm3855_vm1, %v4343_v22, %v4345_v2  ;;  %v12817_v52 = vpack.c.bf16 %v4312_v31, %v4310_v46 }
 0x5a6   :  { %v4361_v15 = vmax.bf16 %v4355_v45, %v12482_v9  ;;  %v4360_v8 = vmax.bf16 %v4350_v29, %v12480_v11  ;;  %v4306_v21 = vadd.f32 %v4295_v55, %v4286_v35  ;;  %v4308_v5 = vadd.f32 %v4295_v55, %v4288_v41 }
 0x5a8   :  { %5135 = vmatpush1.bf16.msra.mxu1 %v10549_v20  ;;  %v12803_v20 = vpack.c.bf16 %v4234_v60, %v4232_v13  ;;  %v4349_v10 = vpop.permute.xlu0 %4348  ;;  %v4365_v6 = vunpack.c.l.bf16 %v4361_v15  ;;  %v4367_v9 = vunpack.c.h.bf16 %v4361_v15  ;;  %v4366_v11 = vunpack.c.h.bf16 %v4360_v8 }
 0x5a9   :  { %5522 = vmatprep.subr.bf16.mxu1 %v10554_v53  ;;  %v4309_v53 = vadd.f32 %v4299_v12, %v4289_v51  ;;  %v4358_v12 = vsel %vm3855_vm1, %v4349_v10, 0  ;;  %v4364_v51 = vunpack.c.l.bf16 %v4360_v8  ;;  %v4351_v45 = vsel %vm3855_vm1, %v4347_v3, %v4349_v10 }
 0x5aa   :  { %v4363_v28 = vmax.bf16 %v4358_v12, %v12492_v50  ;;  %v4385_v60 = vadd.f32 %v4381_v19, %v4365_v6  ;;  %v4387_v2 = vadd.f32 %v4381_v19, %v4367_v9  ;;  %v4314_v39 = vmax.f32 %v4306_v21, 0.0  ;;  %v4425_v6 = vpop.permute.xlu1 %4424 }
 0x5ab   :  { %4864 = vmatmul.mubr.bf16.gmra.mrb[156].mxu1 %v12792_v33  ;;  %v4317_v17 = vmax.f32 %v4309_v53, 0.0  ;;  %v4316_v55 = vmax.f32 %v4308_v5, 0.0  ;;  %v4362_v53 = vmax.bf16 %v4351_v45, %v12490_v38  ;;  %v4384_v35 = vadd.f32 %v4377_v58, %v4364_v51 }
 0x5ac   :  { %4873 = vmatprep.mubr.bf16.mxu1 %v12795_v40  ;;  %v4427_v62 = vpop.permute.xlu0 %4426  ;;  %v4369_v49 = vunpack.c.l.bf16 %v4363_v28  ;;  %v4371_v50 = vunpack.c.h.bf16 %v4363_v28  ;;  %v4393_v14 = vmax.f32 %v4385_v60, 0.0  ;;  %v4395_v15 = vmax.f32 %v4387_v2, 0.0 }
 0x5ad   :  { %v12820_v13 = vpack.c.bf16 %v4317_v17, %v4315_v61  ;;  %v4437_v63 = vsel %vm3855_vm1, %v4427_v62, 0  ;;  %v12828_v22 = vpack.c.bf16 %v4316_v55, %v4314_v39  ;;  %v4386_v41 = vadd.f32 %v4377_v58, %v4366_v11 }
 0x5ae   :  { %v4443_v10 = vmax.bf16 %v4437_v63, %v12510_v26  ;;  %v12834_v29 = vpack.c.bf16 %v4395_v15, %v4393_v14  ;;  %v4389_v46 = vadd.f32 %v4381_v19, %v4369_v49  ;;  %v4391_v31 = vadd.f32 %v4381_v19, %v4371_v50  ;;  %v4429_v49 = vpop.permute.xlu1 %4428 }
 0x5af   :  { %v4368_v9 = vunpack.c.l.bf16 %v4362_v53  ;;  %v4463_v38 = vrot.slane %v4454_v42, %v12571_v18  ;;  %v4370_v17 = vunpack.c.h.bf16 %v4362_v53  ;;  %v4432_v12 = vsel %vm3855_vm1, %v4425_v6, %v4427_v62 }
 0x5b0   :  { %v4431_v61 = vpop.permute.xlu0 %4430  ;;  %v4392_v8 = vmax.f32 %v4384_v35, 0.0  ;;  %v4394_v21 = vmax.f32 %v4386_v41, 0.0  ;;  %v4447_v5 = vunpack.c.l.bf16 %v4443_v10  ;;  %v4449_v26 = vunpack.c.h.bf16 %v4443_v10 }
 0x5b1   :  { %v4397_v28 = vmax.f32 %v4389_v46, 0.0  ;;  %v4399_v60 = vmax.f32 %v4391_v31, 0.0  ;;  %v4440_v19 = vsel %vm3855_vm1, %v4431_v61, 0  ;;  %v4442_v2 = vmax.bf16 %v4432_v12, %v12508_v32 }
 0x5b2   :  { %v12842_v3 = vpack.c.bf16 %v4394_v21, %v4392_v8  ;;  %v4388_v51 = vadd.f32 %v4377_v58, %v4368_v9  ;;  %v4390_v11 = vadd.f32 %v4377_v58, %v4370_v17  ;;  %v4445_v45 = vmax.bf16 %v4440_v19, %v12526_v7 }
 0x5b3   :  { %4874 = vmatmul.mubr.bf16.gmra.mrb[160].mxu1 %v12803_v20  ;;  %v12845_v39 = vpack.c.bf16 %v4399_v60, %v4397_v28  ;;  %v4467_v55 = vadd.f32 %v4463_v38, %v4447_v5  ;;  %v4469_v62 = vadd.f32 %v4463_v38, %v4449_v26  ;;  %v4446_v50 = vunpack.c.l.bf16 %v4442_v2 }
 0x5b4   :  { %4883 = vmatprep.mubr.bf16.mxu1 %v12809_v44  ;;  %v4459_v14 = vrot.slane %v4454_v42, %v12579_v23  ;;  %v4448_v15 = vunpack.c.h.bf16 %v4442_v2  ;;  %v4433_v32 = vsel %vm3855_vm1, %v4429_v49, %v4431_v61  ;;  %v4396_v63 = vmax.f32 %v4388_v51, 0.0  ;;  %v10560_v49 = vld [vmem:[%s14013_s3 + $0x224] ss:$8 sps:$4 sm:$0xff]  }
 0x5b5   :  { %v4398_v53 = vmax.f32 %v4390_v11, 0.0  ;;  %v4451_v58 = vunpack.c.l.bf16 %v4445_v45  ;;  %v4453_v35 = vunpack.c.h.bf16 %v4445_v45  ;;  %v4475_v7 = vmax.f32 %v4467_v55, 0.0  ;;  %v10552_v45 = vld [vmem:[%s14013_s3 + $0x200] ss:$8 sps:$4 sm:$0xff]   ;;  %v10557_v55 = vld [vmem:[%s14013_s3 + $0x214] ss:$8 sps:$4 sm:$0xff]  }
 0x5b6   :  { %v4477_v41 = vmax.f32 %v4469_v62, 0.0  ;;  %v4444_v10 = vmax.bf16 %v4433_v32, %v12524_v57  ;;  %v4466_v31 = vadd.f32 %v4459_v14, %v4446_v50  ;;  %v4468_v6 = vadd.f32 %v4459_v14, %v4448_v15  ;;  %v10555_v62 = vld [vmem:[%s14013_s3 + $0x210] ss:$8 sps:$4 sm:$0xff]   ;;  %v10558_v50 = vld [vmem:[%s14013_s3 + $0x220] ss:$8 sps:$4 sm:$0xff]  }
 0x5b7   :  { %v12852_v46 = vpack.c.bf16 %v4398_v53, %v4396_v63  ;;  %v4471_v17 = vadd.f32 %v4463_v38, %v4451_v58  ;;  %v4473_v12 = vadd.f32 %v4463_v38, %v4453_v35  ;;  %v14147_v11 = vmov 0   ;;  %v10561_v15 = vld [vmem:[%s14013_s3 + $0x230] ss:$8 sps:$4 sm:$0xff]   ;;  %v10566_v32 = vld [vmem:[%s14013_s3 + $0x244] ss:$8 sps:$4 sm:$0xff]  }
 0x5b8   :  { %v12854_v9 = vpack.c.bf16 %v4477_v41, %v4475_v7  ;;  %v4450_v42 = vunpack.c.l.bf16 %v4444_v10  ;;  %v4452_v61 = vunpack.c.h.bf16 %v4444_v10  ;;  %v4474_v8 = vmax.f32 %v4466_v31, 0.0  ;;  %v10564_v63 = vld [vmem:[%s14013_s3 + $0x240] ss:$8 sps:$4 sm:$0xff]   ;;  %v10567_v53 = vld [vmem:[%s14013_s3 + $0x250] ss:$8 sps:$4 sm:$0xff]  }
 0x5b9   :  { %v4476_v21 = vmax.f32 %v4468_v6, 0.0  ;;  %v4479_v5 = vmax.f32 %v4471_v17, 0.0  ;;  %v4481_v26 = vmax.f32 %v4473_v12, 0.0  ;;  %v10572_v58 = vld [vmem:[%s14013_s3 + $0x264] ss:$8 sps:$4 sm:$0xff]  }
 0x5ba   :  { %v4470_v57 = vadd.f32 %v4459_v14, %v4450_v42  ;;  %v4472_v60 = vadd.f32 %v4459_v14, %v4452_v61  ;;  %v10563_v14 = vld [vmem:[%s14013_s3 + $0x234] ss:$8 sps:$4 sm:$0xff]   ;;  %v10570_v35 = vld [vmem:[%s14013_s3 + $0x260] ss:$8 sps:$4 sm:$0xff]   ;;  %v10578_v7 = vld [vmem:[%s14013_s3 + $0x284] ss:$8 sps:$4 sm:$0xff]  }
 0x5bb   :  { %4884 = vmatmul.mubr.bf16.gmra.mrb[164].mxu1 %v12817_v52  ;;  %v12858_v28 = vpack.c.bf16 %v4476_v21, %v4474_v8  ;;  %v12860_v19 = vpack.c.bf16 %v4481_v26, %v4479_v5  ;;  %v10576_v41 = vld [vmem:[%s14013_s3 + $0x280] ss:$8 sps:$4 sm:$0xff]   ;;  %v10579_v10 = vld [vmem:[%s14013_s3 + $0x290] ss:$8 sps:$4 sm:$0xff]   ;;  %v10584_v31 = vld [vmem:[%s14013_s3 + $0x2a4] ss:$8 sps:$4 sm:$0xff]  }
 0x5bc   :  { %4893 = vmatprep.mubr.bf16.mxu1 %v12820_v13  ;;  %v4478_v38 = vmax.f32 %v4470_v57, 0.0  ;;  %v4480_v2 = vmax.f32 %v4472_v60, 0.0  ;;  %v10582_v6 = vld [vmem:[%s14013_s3 + $0x2a0] ss:$8 sps:$4 sm:$0xff]   ;;  %v10587_v17 = vld [vmem:[%s14013_s3 + $0x2b4] ss:$8 sps:$4 sm:$0xff]  }
 0x5bd   :  { %v10585_v12 = vld [vmem:[%s14013_s3 + $0x2b0] ss:$8 sps:$4 sm:$0xff]   ;;  %v10590_v42 = vld [vmem:[%s14013_s3 + $0x2c4] ss:$8 sps:$4 sm:$0xff]   ;;  %v10588_v61 = vld [vmem:[%s14013_s3 + $0x2c0] ss:$8 sps:$4 sm:$0xff]  }
 0x5be   :  { %v12864_v51 = vpack.c.bf16 %v4480_v2, %v4478_v38  ;;  %v10593_v8 = vld [vmem:[%s14013_s3 + $0x2d4] ss:$8 sps:$4 sm:$0xff]   ;;  %v10591_v21 = vld [vmem:[%s14013_s3 + $0x2d0] ss:$8 sps:$4 sm:$0xff]   ;;  %v10596_v5 = vld [vmem:[%s14013_s3 + $0x2e4] ss:$8 sps:$4 sm:$0xff]  }
 0x5bf   :  { %v10594_v26 = vld [vmem:[%s14013_s3 + $0x2e0] ss:$8 sps:$4 sm:$0xff]   ;;  %v10599_v57 = vld [vmem:[%s14013_s3 + $0x2f4] ss:$8 sps:$4 sm:$0xff]   ;;  %v10597_v60 = vld [vmem:[%s14013_s3 + $0x2f0] ss:$8 sps:$4 sm:$0xff]  }
 0x5c3   :  { %4894 = vmatmul.mubr.bf16.gmra.mrb[168].mxu1 %v12828_v22 }
 0x5c4   :  { %4903 = vmatprep.mubr.bf16.mxu1 %v12834_v29 }
 0x5cb   :  { %4904 = vmatmul.mubr.bf16.gmra.mrb[172].mxu1 %v12842_v3 }
 0x5cc   :  { %4913 = vmatprep.mubr.bf16.mxu1 %v12845_v39 }
 0x5d3   :  { %4914 = vmatmul.mubr.bf16.gmra.mrb[176].mxu1 %v12852_v46 }
 0x5d4   :  { %4923 = vmatprep.mubr.bf16.mxu1 %v12854_v9 }
 0x5db   :  { %4924 = vmatmul.mubr.bf16.gmra.mrb[180].mxu1 %v12858_v28 }
 0x5dc   :  { %4933 = vmatprep.mubr.bf16.mxu1 %v12860_v19 }
 0x5e3   :  { %4934 = vmatmul.mubr.bf16.gmra.mrb[184].mxu1 %v12864_v51 }
 0x5e4   :  { %5136 = vmatprep.mubr.bf16.mxu1 %v14147_v11 }
 0x5eb   :  { %5137 = vmatmul.mubr.bf16.vlgmr.msra.gmra.mrb[124].mxu1 %v14147_v11 }
 0x5ec   :  { %5523 = vmatpush1.bf16.msra.mxu1 %v10552_v45  ;;  %5146 = vmatprep.mubr.bf16.mxu1 %v14147_v11  ;;  %v10638_v45 = vld [vmem:[%s14015_s5 + $0x1c4] ss:$8 sps:$4 sm:$0xff]  }
 0x5ed   :  { %5524 = vmatprep.subr.bf16.mxu1 %v10557_v55 }
 0x5f0   :  { %5525 = vmatpush1.bf16.msra.mxu1 %v10555_v62 }
 0x5f1   :  { %5526 = vmatprep.subr.bf16.mxu1 %v10560_v49  ;;  %v10636_v49 = vld [vmem:[%s14015_s5 + $0x1c0] ss:$8 sps:$4 sm:$0xff]  }
 0x5f3   :  { %5147 = vmatmul.mubr.bf16.gmra.mrb[128].mxu1 %v14147_v11 }
 0x5f4   :  { %5156 = vmatprep.mubr.bf16.mxu1 %v12590_v56  ;;  %5527 = vmatpush1.bf16.msra.mxu1 %v10558_v50  ;;  %v10569_v56 = vld [vmem:[%s14013_s3 + $0x254] ss:$8 sps:$4 sm:$0xff]  }
 0x5f5   :  { %5528 = vmatprep.subr.bf16.mxu1 %v10563_v14 }
 0x5f8   :  { %5529 = vmatpush1.bf16.msra.mxu1 %v10561_v15 }
 0x5f9   :  { %5530 = vmatprep.subr.bf16.mxu1 %v10566_v32 }
 0x5fb   :  { %5157 = vmatmul.mubr.bf16.gmra.mrb[132].mxu1 %v12598_v59  ;;  %v10575_v59 = vld [vmem:[%s14013_s3 + $0x274] ss:$8 sps:$4 sm:$0xff]  }
 0x5fc   :  { %5166 = vmatprep.mubr.bf16.mxu1 %v12605_v30  ;;  %5531 = vmatpush1.bf16.msra.mxu1 %v10564_v63  ;;  %v10573_v30 = vld [vmem:[%s14013_s3 + $0x270] ss:$8 sps:$4 sm:$0xff]  }
 0x5fd   :  { %5532 = vmatprep.subr.bf16.mxu1 %v10569_v56 }
 0x600   :  { %5533 = vmatpush1.bf16.msra.mxu1 %v10567_v53 }
 0x601   :  { %5534 = vmatprep.subr.bf16.mxu1 %v10572_v58 }
 0x603   :  { %5167 = vmatmul.mubr.bf16.gmra.mrb[136].mxu1 %v12622_v34  ;;  %v10581_v34 = vld [vmem:[%s14013_s3 + $0x294] ss:$8 sps:$4 sm:$0xff]  }
 0x604   :  { %5176 = vmatprep.mubr.bf16.mxu1 %v12631_v16  ;;  %5535 = vmatpush1.bf16.msra.mxu1 %v10570_v35 }
 0x605   :  { %5536 = vmatprep.subr.bf16.mxu1 %v10575_v59 }
 0x608   :  { %5537 = vmatpush1.bf16.msra.mxu1 %v10573_v30  ;;  %v10639_v30 = vld [vmem:[%s14015_s5 + $0x1d0] ss:$8 sps:$4 sm:$0xff]  }
 0x609   :  { %5538 = vmatprep.subr.bf16.mxu1 %v10578_v7  ;;  %v10641_v7 = vld [vmem:[%s14015_s5 + $0x1d4] ss:$8 sps:$4 sm:$0xff]  }
 0x60b   :  { %5177 = vmatmul.mubr.bf16.gmra.mrb[140].mxu1 %v12648_v54 }
 0x60c   :  { %5186 = vmatprep.mubr.bf16.mxu1 %v12654_v1  ;;  %5539 = vmatpush1.bf16.msra.mxu1 %v10576_v41 }
 0x60d   :  { %5540 = vmatprep.subr.bf16.mxu1 %v10581_v34  ;;  %v10644_v34 = vld [vmem:[%s14015_s5 + $0x1e4] ss:$8 sps:$4 sm:$0xff]  }
 0x610   :  { %5541 = vmatpush1.bf16.msra.mxu1 %v10579_v10 }
 0x611   :  { %5542 = vmatprep.subr.bf16.mxu1 %v10584_v31  ;;  %v10642_v31 = vld [vmem:[%s14015_s5 + $0x1e0] ss:$8 sps:$4 sm:$0xff]  }
 0x613   :  { %5187 = vmatmul.mubr.bf16.gmra.mrb[144].mxu1 %v12671_v48 }
 0x614   :  { %5196 = vmatprep.mubr.bf16.mxu1 %v12680_v37  ;;  %5543 = vmatpush1.bf16.msra.mxu1 %v10582_v6 }
 0x615   :  { %5544 = vmatprep.subr.bf16.mxu1 %v10587_v17  ;;  %v10647_v17 = vld [vmem:[%s14015_s5 + $0x1f4] ss:$8 sps:$4 sm:$0xff]  }
 0x618   :  { %5545 = vmatpush1.bf16.msra.mxu1 %v10585_v12 }
 0x619   :  { %5546 = vmatprep.subr.bf16.mxu1 %v10590_v42 }
 0x61b   :  { %5197 = vmatmul.mubr.bf16.gmra.mrb[148].mxu1 %v12697_v47 }
 0x61c   :  { %5206 = vmatprep.mubr.bf16.mxu1 %v12703_v43  ;;  %5547 = vmatpush1.bf16.msra.mxu1 %v10588_v61 }
 0x61d   :  { %5548 = vmatprep.subr.bf16.mxu1 %v10593_v8 }
 0x620   :  { %5549 = vmatpush1.bf16.msra.mxu1 %v10591_v21  ;;  %v10645_v21 = vld [vmem:[%s14015_s5 + $0x1f0] ss:$8 sps:$4 sm:$0xff]  }
 0x621   :  { %5550 = vmatprep.subr.bf16.mxu1 %v10596_v5 }
 0x623   :  { %5207 = vmatmul.mubr.bf16.gmra.mrb[152].mxu1 %v12720_v4 }
 0x624   :  { %5216 = vmatprep.mubr.bf16.mxu1 %v12729_v0  ;;  %5551 = vmatpush1.bf16.msra.mxu1 %v10594_v26 }
 0x625   :  { %5552 = vmatprep.subr.bf16.mxu1 %v10599_v57 }
 0x628   :  { %5553 = vmatpush1.bf16.msra.mxu1 %v10597_v60 }
 0x62b   :  { %5217 = vmatmul.mubr.bf16.gmra.mrb[156].mxu1 %v12746_v25 }
 0x62c   :  { %5226 = vmatprep.mubr.bf16.mxu1 %v12752_v27 }
 0x633   :  { %5227 = vmatmul.mubr.bf16.gmra.mrb[160].mxu1 %v12769_v24 }
 0x634   :  { %5236 = vmatprep.mubr.bf16.mxu1 %v12778_v36 }
 0x63b   :  { %5237 = vmatmul.mubr.bf16.gmra.mrb[164].mxu1 %v12792_v33 }
 0x63c   :  { %5246 = vmatprep.mubr.bf16.mxu1 %v12795_v40 }
 0x643   :  { %5247 = vmatmul.mubr.bf16.gmra.mrb[168].mxu1 %v12803_v20 }
 0x644   :  { %5256 = vmatprep.mubr.bf16.mxu1 %v12809_v44 }
 0x64b   :  { %5257 = vmatmul.mubr.bf16.gmra.mrb[172].mxu1 %v12817_v52 }
 0x64c   :  { %5266 = vmatprep.mubr.bf16.mxu1 %v12820_v13 }
 0x653   :  { %5267 = vmatmul.mubr.bf16.gmra.mrb[176].mxu1 %v12828_v22 }
 0x654   :  { %5276 = vmatprep.mubr.bf16.mxu1 %v12834_v29 }
 0x65b   :  { %5277 = vmatmul.mubr.bf16.gmra.mrb[180].mxu1 %v12842_v3 }
 0x65c   :  { %5286 = vmatprep.mubr.bf16.mxu1 %v12845_v39 }
 0x663   :  { %5287 = vmatmul.mubr.bf16.gmra.mrb[184].mxu1 %v12852_v46 }
 0x664   :  { %5554 = vmatprep.mubr.bf16.mxu1 %v12631_v16  ;;  %v10600_v16 = vld [vmem:[%s14015_s5 + $0x100] ss:$8 sps:$4 sm:$0xff]  }
 0x66b   :  { %5555 = vmatmul.mubr.bf16.vlgmr.msra.gmra.mrb[124].mxu1 %v12648_v54  ;;  %v10602_v54 = vld [vmem:[%s14015_s5 + $0x104] ss:$8 sps:$4 sm:$0xff]  }
 0x66c   :  { %5564 = vmatprep.mubr.bf16.mxu1 %v12654_v1  ;;  %6418 = vmatprep.subr.bf16.mxu1 %v10602_v54  ;;  %v10603_v1 = vld [vmem:[%s14015_s5 + $0x110] ss:$8 sps:$4 sm:$0xff]  }
 0x66d   :  { %6419 = vmatpush1.bf16.msra.mxu1 %v10600_v16 }
 0x673   :  { %5565 = vmatmul.mubr.bf16.gmra.mrb[128].mxu1 %v12671_v48  ;;  %v10605_v48 = vld [vmem:[%s14015_s5 + $0x114] ss:$8 sps:$4 sm:$0xff]  }
 0x674   :  { %5574 = vmatprep.mubr.bf16.mxu1 %v12680_v37  ;;  %6420 = vmatprep.subr.bf16.mxu1 %v10605_v48  ;;  %v10606_v37 = vld [vmem:[%s14015_s5 + $0x120] ss:$8 sps:$4 sm:$0xff]  }
 0x675   :  { %6421 = vmatpush1.bf16.msra.mxu1 %v10603_v1 }
 0x67b   :  { %5575 = vmatmul.mubr.bf16.gmra.mrb[132].mxu1 %v12697_v47  ;;  %v10608_v47 = vld [vmem:[%s14015_s5 + $0x124] ss:$8 sps:$4 sm:$0xff]  }
 0x67c   :  { %5584 = vmatprep.mubr.bf16.mxu1 %v12703_v43  ;;  %6422 = vmatprep.subr.bf16.mxu1 %v10608_v47  ;;  %v10609_v43 = vld [vmem:[%s14015_s5 + $0x130] ss:$8 sps:$4 sm:$0xff]  }
 0x67d   :  { %6423 = vmatpush1.bf16.msra.mxu1 %v10606_v37 }
 0x683   :  { %5585 = vmatmul.mubr.bf16.gmra.mrb[136].mxu1 %v12720_v4  ;;  %v10611_v4 = vld [vmem:[%s14015_s5 + $0x134] ss:$8 sps:$4 sm:$0xff]  }
 0x684   :  { %5594 = vmatprep.mubr.bf16.mxu1 %v12729_v0  ;;  %6424 = vmatprep.subr.bf16.mxu1 %v10611_v4  ;;  %v10612_v0 = vld [vmem:[%s14015_s5 + $0x140] ss:$8 sps:$4 sm:$0xff]  }
 0x685   :  { %6425 = vmatpush1.bf16.msra.mxu1 %v10609_v43 }
 0x68b   :  { %5595 = vmatmul.mubr.bf16.gmra.mrb[140].mxu1 %v12746_v25  ;;  %v10614_v25 = vld [vmem:[%s14015_s5 + $0x144] ss:$8 sps:$4 sm:$0xff]  }
 0x68c   :  { %5604 = vmatprep.mubr.bf16.mxu1 %v12752_v27  ;;  %6426 = vmatprep.subr.bf16.mxu1 %v10614_v25  ;;  %v10615_v27 = vld [vmem:[%s14015_s5 + $0x150] ss:$8 sps:$4 sm:$0xff]  }
 0x68d   :  { %6427 = vmatpush1.bf16.msra.mxu1 %v10612_v0 }
 0x693   :  { %5605 = vmatmul.mubr.bf16.gmra.mrb[144].mxu1 %v12769_v24  ;;  %v10617_v24 = vld [vmem:[%s14015_s5 + $0x154] ss:$8 sps:$4 sm:$0xff]  }
 0x694   :  { %5614 = vmatprep.mubr.bf16.mxu1 %v12778_v36  ;;  %v10620_v36 = vld [vmem:[%s14015_s5 + $0x164] ss:$8 sps:$4 sm:$0xff]   ;;  %6428 = vmatprep.subr.bf16.mxu1 %v10617_v24 }
 0x695   :  { %6429 = vmatpush1.bf16.msra.mxu1 %v10615_v27 }
 0x696   :  { %6430 = vmatprep.subr.bf16.mxu1 %v10620_v36 }
 0x69b   :  { %5615 = vmatmul.mubr.bf16.gmra.mrb[148].mxu1 %v12792_v33  ;;  %v10618_v33 = vld [vmem:[%s14015_s5 + $0x160] ss:$8 sps:$4 sm:$0xff]  }
 0x69c   :  { %5624 = vmatprep.mubr.bf16.mxu1 %v12795_v40  ;;  %6431 = vmatpush1.bf16.msra.mxu1 %v10618_v33  ;;  %v10621_v40 = vld [vmem:[%s14015_s5 + $0x170] ss:$8 sps:$4 sm:$0xff]  }
 0x6a3   :  { %5625 = vmatmul.mubr.bf16.gmra.mrb[152].mxu1 %v12803_v20  ;;  %v10623_v20 = vld [vmem:[%s14015_s5 + $0x174] ss:$8 sps:$4 sm:$0xff]  }
 0x6a4   :  { %5634 = vmatprep.mubr.bf16.mxu1 %v12809_v44  ;;  %v10626_v44 = vld [vmem:[%s14015_s5 + $0x184] ss:$8 sps:$4 sm:$0xff]   ;;  %6432 = vmatprep.subr.bf16.mxu1 %v10623_v20 }
 0x6a5   :  { %6433 = vmatpush1.bf16.msra.mxu1 %v10621_v40 }
 0x6a6   :  { %6434 = vmatprep.subr.bf16.mxu1 %v10626_v44 }
 0x6ab   :  { %5635 = vmatmul.mubr.bf16.gmra.mrb[156].mxu1 %v12817_v52  ;;  %v10624_v52 = vld [vmem:[%s14015_s5 + $0x180] ss:$8 sps:$4 sm:$0xff]  }
 0x6ac   :  { %5644 = vmatprep.mubr.bf16.mxu1 %v12820_v13  ;;  %6435 = vmatpush1.bf16.msra.mxu1 %v10624_v52  ;;  %v10627_v13 = vld [vmem:[%s14015_s5 + $0x190] ss:$8 sps:$4 sm:$0xff]  }
 0x6b3   :  { %5645 = vmatmul.mubr.bf16.gmra.mrb[160].mxu1 %v12828_v22  ;;  %v10629_v22 = vld [vmem:[%s14015_s5 + $0x194] ss:$8 sps:$4 sm:$0xff]  }
 0x6b4   :  { %5654 = vmatprep.mubr.bf16.mxu1 %v12834_v29  ;;  %v10632_v29 = vld [vmem:[%s14015_s5 + $0x1a4] ss:$8 sps:$4 sm:$0xff]   ;;  %6436 = vmatprep.subr.bf16.mxu1 %v10629_v22 }
 0x6b5   :  { %6437 = vmatpush1.bf16.msra.mxu1 %v10627_v13 }
 0x6b6   :  { %6438 = vmatprep.subr.bf16.mxu1 %v10632_v29 }
 0x6bb   :  { %5655 = vmatmul.mubr.bf16.gmra.mrb[164].mxu1 %v12842_v3 }
 0x6bc   :  { %5664 = vmatprep.mubr.bf16.mxu1 %v12845_v39 }
 0x6c3   :  { %5665 = vmatmul.mubr.bf16.gmra.mrb[168].mxu1 %v12852_v46  ;;  %v10630_v46 = vld [vmem:[%s14015_s5 + $0x1a0] ss:$8 sps:$4 sm:$0xff]  }
 0x6c4   :  { %5674 = vmatprep.mubr.bf16.mxu1 %v12854_v9  ;;  %6439 = vmatpush1.bf16.msra.mxu1 %v10630_v46 }
 0x6cb   :  { %5675 = vmatmul.mubr.bf16.gmra.mrb[172].mxu1 %v12858_v28  ;;  %v10635_v28 = vld [vmem:[%s14015_s5 + $0x1b4] ss:$8 sps:$4 sm:$0xff]  }
 0x6cc   :  { %5684 = vmatprep.mubr.bf16.mxu1 %v12860_v19  ;;  %6440 = vmatprep.subr.bf16.mxu1 %v10635_v28 }
 0x6d3   :  { %5685 = vmatmul.mubr.bf16.gmra.mrb[176].mxu1 %v12864_v51  ;;  %v10633_v51 = vld [vmem:[%s14015_s5 + $0x1b0] ss:$8 sps:$4 sm:$0xff]  }
 0x6d4   :  { %5694 = vmatprep.mubr.bf16.mxu1 %v14147_v11  ;;  %6441 = vmatpush1.bf16.msra.mxu1 %v10633_v51 }
 0x6d5   :  { %6442 = vmatprep.subr.bf16.mxu1 %v10638_v45 }
 0x6d8   :  { %6443 = vmatpush1.bf16.msra.mxu1 %v10636_v49 }
 0x6d9   :  { %6444 = vmatprep.subr.bf16.mxu1 %v10641_v7 }
 0x6db   :  { %5695 = vmatmul.mubr.bf16.gmra.mrb[180].mxu1 %v14147_v11 }
 0x6dc   :  { %5704 = vmatprep.mubr.bf16.mxu1 %v14147_v11  ;;  %6445 = vmatpush1.bf16.msra.mxu1 %v10639_v30 }
 0x6dd   :  { %6446 = vmatprep.subr.bf16.mxu1 %v10644_v34 }
 0x6e0   :  { %6447 = vmatpush1.bf16.msra.mxu1 %v10642_v31 }
 0x6e1   :  { %6448 = vmatprep.subr.bf16.mxu1 %v10647_v17 }
 0x6e3   :  { %5705 = vmatmul.mubr.bf16.gmra.mrb[184].mxu1 %v14147_v11 }
 0x6e4   :  { %6449 = vmatpush1.bf16.msra.mxu1 %v10645_v21 }
 0x73e   :  { %v5556_v3 = vpop.f32.mrb[124].mxu1 }
 0x73f   :  { %v5558_v39 = vpop.f32.mrb[125].mxu1 }
 0x740   :  { %v5560_v9 = vpop.f32.mrb[126].mxu1 }
 0x741   :  { %v5779_v19 = vpack.c.bf16 %v5560_v9, %v5556_v3  ;;  %v5562_v38 = vpop.f32.mrb[127].mxu1 }
 0x742   :  { %v5780_v2 = vpack.c.bf16 %v5562_v38, %v5558_v39  ;;  %v10650_v38 = vld [vmem:[%s14015_s5 + $0x4] ss:$8 sps:$4 sm:$0xff]  }
 0x743   :  { %6691 = vmatprep.subr.bf16.mxu1 %v10650_v38 }
 0x746   :  { %v5566_v55 = vpop.f32.mrb[128].mxu1 }
 0x747   :  { %v5568_v62 = vpop.f32.mrb[129].mxu1 }
 0x748   :  { %v5570_v50 = vpop.f32.mrb[130].mxu1 }
 0x749   :  { %v5781_v14 = vpack.c.bf16 %v5570_v50, %v5566_v55  ;;  %v5572_v15 = vpop.f32.mrb[131].mxu1 }
 0x74a   :  { %v5782_v32 = vpack.c.bf16 %v5572_v15, %v5568_v62 }
 0x74e   :  { %v5576_v63 = vpop.f32.mrb[132].mxu1 }
 0x74f   :  { %v5578_v56 = vpop.f32.mrb[133].mxu1 }
 0x750   :  { %v5580_v53 = vpop.f32.mrb[134].mxu1 }
 0x751   :  { %v5783_v58 = vpack.c.bf16 %v5580_v53, %v5576_v63  ;;  %v5582_v35 = vpop.f32.mrb[135].mxu1 }
 0x752   :  { %v5784_v59 = vpack.c.bf16 %v5582_v35, %v5578_v56 }
 0x753   :  { %v13108_v41 = vmax.bf16 %v5783_v58, %v5779_v19 }
 0x754   :  { %v13113_v10 = vmax.bf16 %v5784_v59, %v5780_v2 }
 0x755   :  { %5859 = vrot.lane.b32.xlu1 %v13108_v41, %s10946_s25 }
 0x756   :  { %5861 = vrot.lane.b32.xlu0 %v13113_v10, %s10946_s25  ;;  %v5586_v6 = vpop.f32.mrb[136].mxu1 }
 0x757   :  { %v5588_v12 = vpop.f32.mrb[137].mxu1 }
 0x758   :  { %v5590_v42 = vpop.f32.mrb[138].mxu1 }
 0x759   :  { %v5785_v61 = vpack.c.bf16 %v5590_v42, %v5586_v6  ;;  %v5592_v8 = vpop.f32.mrb[139].mxu1 }
 0x75a   :  { %v5786_v5 = vpack.c.bf16 %v5592_v8, %v5588_v12 }
 0x75b   :  { %v13128_v26 = vmax.bf16 %v5785_v61, %v5781_v14 }
 0x75c   :  { %v13130_v57 = vmax.bf16 %v5786_v5, %v5782_v32 }
 0x75d   :  { %5863 = vrot.lane.b32.xlu1 %v13128_v26, %s10946_s25 }
 0x75e   :  { %5865 = vrot.lane.b32.xlu0 %v13130_v57, %s10946_s25  ;;  %v5596_v60 = vpop.f32.mrb[140].mxu1 }
 0x75f   :  { %v5598_v16 = vpop.f32.mrb[141].mxu1 }
 0x760   :  { %v5600_v54 = vpop.f32.mrb[142].mxu1 }
 0x761   :  { %v5787_v1 = vpack.c.bf16 %v5600_v54, %v5596_v60  ;;  %v5602_v48 = vpop.f32.mrb[143].mxu1 }
 0x762   :  { %v5788_v37 = vpack.c.bf16 %v5602_v48, %v5598_v16 }
 0x766   :  { %v5606_v47 = vpop.f32.mrb[144].mxu1 }
 0x767   :  { %v5608_v43 = vpop.f32.mrb[145].mxu1 }
 0x768   :  { %v5610_v4 = vpop.f32.mrb[146].mxu1 }
 0x769   :  { %v5789_v0 = vpack.c.bf16 %v5610_v4, %v5606_v47  ;;  %v5612_v25 = vpop.f32.mrb[147].mxu1 }
 0x76a   :  { %v5790_v27 = vpack.c.bf16 %v5612_v25, %v5608_v43 }
 0x76e   :  { %v5616_v24 = vpop.f32.mrb[148].mxu1 }
 0x76f   :  { %v5618_v36 = vpop.f32.mrb[149].mxu1 }
 0x770   :  { %v5620_v33 = vpop.f32.mrb[150].mxu1 }
 0x771   :  { %v5791_v40 = vpack.c.bf16 %v5620_v33, %v5616_v24  ;;  %v5622_v20 = vpop.f32.mrb[151].mxu1 }
 0x772   :  { %v5792_v44 = vpack.c.bf16 %v5622_v20, %v5618_v36 }
 0x773   :  { %v13136_v52 = vmax.bf16 %v5791_v40, %v5787_v1 }
 0x774   :  { %v13138_v13 = vmax.bf16 %v5792_v44, %v5788_v37 }
 0x775   :  { %5943 = vrot.lane.b32.xlu1 %v13136_v52, %s10946_s25 }
 0x776   :  { %5945 = vrot.lane.b32.xlu0 %v13138_v13, %s10946_s25  ;;  %v5626_v22 = vpop.f32.mrb[152].mxu1 }
 0x777   :  { %v5628_v29 = vpop.f32.mrb[153].mxu1 }
 0x778   :  { %v5630_v3 = vpop.f32.mrb[154].mxu1 }
 0x779   :  { %v5793_v39 = vpack.c.bf16 %v5630_v3, %v5626_v22  ;;  %v5632_v46 = vpop.f32.mrb[155].mxu1 }
 0x77a   :  { %v5794_v9 = vpack.c.bf16 %v5632_v46, %v5628_v29 }
 0x77b   :  { %v13144_v28 = vmax.bf16 %v5793_v39, %v5789_v0 }
 0x77c   :  { %v13146_v19 = vmax.bf16 %v5794_v9, %v5790_v27 }
 0x77d   :  { %5947 = vrot.lane.b32.xlu1 %v13144_v28, %s10946_s25 }
 0x77e   :  { %5949 = vrot.lane.b32.xlu0 %v13146_v19, %s10946_s25  ;;  %v5636_v2 = vpop.f32.mrb[156].mxu1 }
 0x77f   :  { %v5638_v51 = vpop.f32.mrb[157].mxu1 }
 0x780   :  { %v5640_v45 = vpop.f32.mrb[158].mxu1 }
 0x781   :  { %v5795_v55 = vpack.c.bf16 %v5640_v45, %v5636_v2  ;;  %v5642_v62 = vpop.f32.mrb[159].mxu1 }
 0x782   :  { %v5796_v49 = vpack.c.bf16 %v5642_v62, %v5638_v51  ;;  %v5891_v62 = vld [vmem:[%s14016_s4] sm:$0x3] }
 0x786   :  { %v5646_v50 = vpop.f32.mrb[160].mxu1 }
 0x787   :  { %v5648_v14 = vpop.f32.mrb[161].mxu1 }
 0x788   :  { %v5650_v15 = vpop.f32.mrb[162].mxu1 }
 0x789   :  { %v5797_v32 = vpack.c.bf16 %v5650_v15, %v5646_v50  ;;  %v5652_v63 = vpop.f32.mrb[163].mxu1  ;;  %v5896_v15 = vrot.slane %v5891_v62, %v12579_v23 }
 0x78a   :  { %v5798_v56 = vpack.c.bf16 %v5652_v63, %v5648_v14 }
 0x78e   :  { %v5656_v53 = vpop.f32.mrb[164].mxu1 }
 0x78f   :  { %v5658_v58 = vpop.f32.mrb[165].mxu1 }
 0x790   :  { %v5660_v35 = vpop.f32.mrb[166].mxu1 }
 0x791   :  { %v5799_v59 = vpack.c.bf16 %v5660_v35, %v5656_v53  ;;  %v5662_v30 = vpop.f32.mrb[167].mxu1 }
 0x792   :  { %v5800_v7 = vpack.c.bf16 %v5662_v30, %v5658_v58 }
 0x793   :  { %v13155_v34 = vmax.bf16 %v5799_v59, %v5795_v55 }
 0x794   :  { %v13157_v31 = vmax.bf16 %v5800_v7, %v5796_v49 }
 0x795   :  { %6025 = vrot.lane.b32.xlu1 %v13155_v34, %s10946_s25 }
 0x796   :  { %6027 = vrot.lane.b32.xlu0 %v13157_v31, %s10946_s25  ;;  %v5666_v6 = vpop.f32.mrb[168].mxu1 }
 0x797   :  { %v5668_v17 = vpop.f32.mrb[169].mxu1 }
 0x798   :  { %v5670_v12 = vpop.f32.mrb[170].mxu1 }
 0x799   :  { %v5801_v42 = vpack.c.bf16 %v5670_v12, %v5666_v6  ;;  %v5672_v61 = vpop.f32.mrb[171].mxu1 }
 0x79a   :  { %v5802_v8 = vpack.c.bf16 %v5672_v61, %v5668_v17 }
 0x79b   :  { %v13163_v21 = vmax.bf16 %v5801_v42, %v5797_v32 }
 0x79c   :  { %v13165_v5 = vmax.bf16 %v5802_v8, %v5798_v56  ;;  %v5900_v56 = vrot.slane %v5891_v62, %v12571_v18  ;;  %v10662_v62 = vld [vmem:[%s14015_s5 + $0x44] ss:$8 sps:$4 sm:$0xff]  }
 0x79d   :  { %6029 = vrot.lane.b32.xlu1 %v13163_v21, %s10946_s25 }
 0x79e   :  { %6031 = vrot.lane.b32.xlu0 %v13165_v5, %s10946_s25  ;;  %v5676_v60 = vpop.f32.mrb[172].mxu1 }
 0x79f   :  { %v5678_v16 = vpop.f32.mrb[173].mxu1 }
 0x7a0   :  { %v5680_v54 = vpop.f32.mrb[174].mxu1 }
 0x7a1   :  { %v5803_v1 = vpack.c.bf16 %v5680_v54, %v5676_v60  ;;  %v5682_v48 = vpop.f32.mrb[175].mxu1 }
 0x7a2   :  { %v5804_v37 = vpack.c.bf16 %v5682_v48, %v5678_v16 }
 0x7a6   :  { %v5686_v47 = vpop.f32.mrb[176].mxu1 }
 0x7a7   :  { %v5688_v43 = vpop.f32.mrb[177].mxu1 }
 0x7a8   :  { %v5690_v4 = vpop.f32.mrb[178].mxu1 }
 0x7a9   :  { %v5805_v0 = vpack.c.bf16 %v5690_v4, %v5686_v47  ;;  %v5692_v25 = vpop.f32.mrb[179].mxu1  ;;  %v10648_v47 = vld [vmem:[%s14015_s5] ss:$8 sps:$4 sm:$0xff]  }
 0x7aa   :  { %v5806_v27 = vpack.c.bf16 %v5692_v25, %v5688_v43  ;;  %v10653_v43 = vld [vmem:[%s14015_s5 + $0x14] ss:$8 sps:$4 sm:$0xff]  }
 0x7ae   :  { %v5696_v24 = vpop.f32.mrb[180].mxu1 }
 0x7af   :  { %v5698_v36 = vpop.f32.mrb[181].mxu1 }
 0x7b0   :  { %v5700_v33 = vpop.f32.mrb[182].mxu1 }
 0x7b1   :  { %v5807_v40 = vpack.c.bf16 %v5700_v33, %v5696_v24  ;;  %v5702_v20 = vpop.f32.mrb[183].mxu1  ;;  %v10651_v33 = vld [vmem:[%s14015_s5 + $0x10] ss:$8 sps:$4 sm:$0xff]  }
 0x7b2   :  { %v5808_v44 = vpack.c.bf16 %v5702_v20, %v5698_v36 }
 0x7b3   :  { %v13171_v22 = vmax.bf16 %v5807_v40, %v5803_v1  ;;  %v10656_v40 = vld [vmem:[%s14015_s5 + $0x24] ss:$8 sps:$4 sm:$0xff]  }
 0x7b4   :  { %v13173_v29 = vmax.bf16 %v5808_v44, %v5804_v37 }
 0x7b5   :  { %6107 = vrot.lane.b32.xlu1 %v13171_v22, %s10946_s25 }
 0x7b6   :  { %6109 = vrot.lane.b32.xlu0 %v13173_v29, %s10946_s25  ;;  %v5706_v3 = vpop.f32.mrb[184].mxu1 }
 0x7b7   :  { %v5708_v39 = vpop.f32.mrb[185].mxu1 }
 0x7b8   :  { %v5710_v46 = vpop.f32.mrb[186].mxu1 }
 0x7b9   :  { %v5809_v9 = vpack.c.bf16 %v5710_v46, %v5706_v3  ;;  %v5712_v38 = vpop.f32.mrb[187].mxu1 }
 0x7ba   :  { %v5810_v2 = vpack.c.bf16 %v5712_v38, %v5708_v39  ;;  %v10654_v38 = vld [vmem:[%s14015_s5 + $0x20] ss:$8 sps:$4 sm:$0xff]  }
 0x7bb   :  { %v13179_v51 = vmax.bf16 %v5809_v9, %v5805_v0 }
 0x7bc   :  { %v13181_v45 = vmax.bf16 %v5810_v2, %v5806_v27  ;;  %v10659_v2 = vld [vmem:[%s14015_s5 + $0x34] ss:$8 sps:$4 sm:$0xff]  }
 0x7bd   :  { %6111 = vrot.lane.b32.xlu1 %v13179_v51, %s10946_s25 }
 0x7be   :  { %6113 = vrot.lane.b32.xlu0 %v13181_v45, %s10946_s25 }
 0x7c7   :  { %v5860_v55 = vpop.permute.xlu1 %5859 }
 0x7c8   :  { %v5862_v49 = vpop.permute.xlu0 %5861 }
 0x7c9   :  { %v5868_v50 = vsel %vm5867_vm2, %v5860_v55, %v5862_v49  ;;  %v5874_v14 = vsel %vm5867_vm2, %v5862_v49, 0  ;;  %v10657_v55 = vld [vmem:[%s14015_s5 + $0x30] ss:$8 sps:$4 sm:$0xff]   ;;  %v10660_v49 = vld [vmem:[%s14015_s5 + $0x40] ss:$8 sps:$4 sm:$0xff]  }
 0x7ca   :  { %v5879_v32 = vmax.bf16 %v5868_v50, %v13108_v41  ;;  %v5880_v63 = vmax.bf16 %v5874_v14, %v13113_v10  ;;  %v10665_v50 = vld [vmem:[%s14015_s5 + $0x54] ss:$8 sps:$4 sm:$0xff]   ;;  %v10663_v14 = vld [vmem:[%s14015_s5 + $0x50] ss:$8 sps:$4 sm:$0xff]  }
 0x7cc   :  { %v5883_v53 = vunpack.c.l.bf16 %v5879_v32  ;;  %v5884_v58 = vunpack.c.l.bf16 %v5880_v63  ;;  %v5885_v35 = vunpack.c.h.bf16 %v5879_v32  ;;  %v5886_v59 = vunpack.c.h.bf16 %v5880_v63  ;;  %v5973_v32 = vld [vmem:[%s14016_s4] sm:$0x3]  ;;  %v10668_v63 = vld [vmem:[%s14015_s5 + $0x64] ss:$8 sps:$4 sm:$0xff]  }
 0x7ce   :  { %v5903_v30 = vadd.f32 %v5896_v15, %v5883_v53  ;;  %v5905_v7 = vadd.f32 %v5896_v15, %v5885_v35  ;;  %v5904_v6 = vadd.f32 %v5900_v56, %v5884_v58  ;;  %v5906_v17 = vadd.f32 %v5900_v56, %v5886_v59 }
 0x7cf   :  { %v5864_v12 = vpop.permute.xlu1 %5863 }
 0x7d0   :  { %v5911_v42 = vmax.f32 %v5903_v30, 0.0  ;;  %v5913_v61 = vmax.f32 %v5905_v7, 0.0  ;;  %v5866_v8 = vpop.permute.xlu0 %5865  ;;  %v5912_v60 = vmax.f32 %v5904_v6, 0.0  ;;  %v5914_v16 = vmax.f32 %v5906_v17, 0.0  ;;  %v10666_v6 = vld [vmem:[%s14015_s5 + $0x60] ss:$8 sps:$4 sm:$0xff]  }
 0x7d1   :  { %v5869_v41 = vsel %vm5867_vm2, %v5864_v12, %v5866_v8  ;;  %v5877_v10 = vsel %vm5867_vm2, %v5866_v8, 0  ;;  %v5982_v30 = vrot.slane %v5973_v32, %v12571_v18  ;;  %v5978_v7 = vrot.slane %v5973_v32, %v12579_v23  ;;  %v10671_v17 = vld [vmem:[%s14015_s5 + $0x74] ss:$8 sps:$4 sm:$0xff]  }
 0x7d2   :  { %v13198_v54 = vpack.c.bf16 %v5913_v61, %v5911_v42  ;;  %v5881_v1 = vmax.bf16 %v5869_v41, %v13128_v26  ;;  %v5882_v48 = vmax.bf16 %v5877_v10, %v13130_v57  ;;  %v13202_v37 = vpack.c.bf16 %v5914_v16, %v5912_v60  ;;  %v10669_v41 = vld [vmem:[%s14015_s5 + $0x70] ss:$8 sps:$4 sm:$0xff]  }
 0x7d4   :  { %v5887_v4 = vunpack.c.l.bf16 %v5881_v1  ;;  %v5888_v0 = vunpack.c.l.bf16 %v5882_v48  ;;  %v5889_v25 = vunpack.c.h.bf16 %v5881_v1  ;;  %v5890_v27 = vunpack.c.h.bf16 %v5882_v48  ;;  %6450 = vmatprep.mubr.bf16.mxu1 %v13202_v37  ;;  %v10674_v1 = vld [vmem:[%s14015_s5 + $0x84] ss:$8 sps:$4 sm:$0xff]  }
 0x7d5   :  { %6451 = vmatmul.mubr.bf16.vlgmr.msra.gmra.mrb[188].mxu1 %v13198_v54 }
 0x7d6   :  { %v5908_v26 = vadd.f32 %v5900_v56, %v5888_v0  ;;  %v5910_v57 = vadd.f32 %v5900_v56, %v5890_v27  ;;  %v5907_v24 = vadd.f32 %v5896_v15, %v5887_v4  ;;  %v5909_v36 = vadd.f32 %v5896_v15, %v5889_v25  ;;  %6692 = vmatpush1.bf16.msra.mxu1 %v10648_v47 }
 0x7d7   :  { %6693 = vmatprep.subr.bf16.mxu1 %v10653_v43 }
 0x7d8   :  { %v5916_v20 = vmax.f32 %v5908_v26, 0.0  ;;  %v5918_v44 = vmax.f32 %v5910_v57, 0.0  ;;  %v5915_v3 = vmax.f32 %v5907_v24, 0.0  ;;  %v5917_v39 = vmax.f32 %v5909_v36, 0.0 }
 0x7da   :  { %v13218_v46 = vpack.c.bf16 %v5918_v44, %v5916_v20  ;;  %v13220_v9 = vpack.c.bf16 %v5917_v39, %v5915_v3  ;;  %6694 = vmatpush1.bf16.msra.mxu1 %v10651_v33  ;;  %v10672_v33 = vld [vmem:[%s14015_s5 + $0x80] ss:$8 sps:$4 sm:$0xff]  }
 0x7db   :  { %6695 = vmatprep.subr.bf16.mxu1 %v10656_v40  ;;  %v10677_v40 = vld [vmem:[%s14015_s5 + $0x94] ss:$8 sps:$4 sm:$0xff]  }
 0x7dc   :  { %6460 = vmatprep.mubr.bf16.mxu1 %v13218_v46 }
 0x7dd   :  { %6461 = vmatmul.mubr.bf16.gmra.mrb[192].mxu1 %v13220_v9 }
 0x7de   :  { %6696 = vmatpush1.bf16.msra.mxu1 %v10654_v38 }
 0x7df   :  { %6697 = vmatprep.subr.bf16.mxu1 %v10659_v2 }
 0x7e2   :  { %6698 = vmatpush1.bf16.msra.mxu1 %v10657_v55  ;;  %v10675_v55 = vld [vmem:[%s14015_s5 + $0x90] ss:$8 sps:$4 sm:$0xff]  }
 0x7e3   :  { %6699 = vmatprep.subr.bf16.mxu1 %v10662_v62  ;;  %v10680_v62 = vld [vmem:[%s14015_s5 + $0xa4] ss:$8 sps:$4 sm:$0xff]  }
 0x7e6   :  { %6700 = vmatpush1.bf16.msra.mxu1 %v10660_v49 }
 0x7e7   :  { %v5944_v15 = vpop.permute.xlu1 %5943  ;;  %6701 = vmatprep.subr.bf16.mxu1 %v10665_v50 }
 0x7e8   :  { %v5946_v56 = vpop.permute.xlu0 %5945 }
 0x7e9   :  { %v5951_v53 = vsel %vm5867_vm2, %v5944_v15, %v5946_v56  ;;  %v5956_v58 = vsel %vm5867_vm2, %v5946_v56, 0  ;;  %v10678_v56 = vld [vmem:[%s14015_s5 + $0xa0] ss:$8 sps:$4 sm:$0xff]  }
 0x7ea   :  { %v5961_v35 = vmax.bf16 %v5951_v53, %v13136_v52  ;;  %v5962_v59 = vmax.bf16 %v5956_v58, %v13138_v13  ;;  %6702 = vmatpush1.bf16.msra.mxu1 %v10663_v14  ;;  %v10683_v53 = vld [vmem:[%s14015_s5 + $0xb4] ss:$8 sps:$4 sm:$0xff]   ;;  %v10681_v58 = vld [vmem:[%s14015_s5 + $0xb0] ss:$8 sps:$4 sm:$0xff]  }
 0x7eb   :  { %6703 = vmatprep.subr.bf16.mxu1 %v10668_v63 }
 0x7ec   :  { %v5965_v12 = vunpack.c.l.bf16 %v5961_v35  ;;  %v5966_v42 = vunpack.c.l.bf16 %v5962_v59  ;;  %v5967_v61 = vunpack.c.h.bf16 %v5961_v35  ;;  %v5968_v52 = vunpack.c.h.bf16 %v5962_v59  ;;  %v10686_v35 = vld [vmem:[%s14015_s5 + $0xc4] ss:$8 sps:$4 sm:$0xff]   ;;  %v10684_v59 = vld [vmem:[%s14015_s5 + $0xc0] ss:$8 sps:$4 sm:$0xff]  }
 0x7ee   :  { %v5986_v8 = vadd.f32 %v5982_v30, %v5966_v42  ;;  %v5988_v13 = vadd.f32 %v5982_v30, %v5968_v52  ;;  %v5985_v60 = vadd.f32 %v5978_v7, %v5965_v12  ;;  %v5987_v16 = vadd.f32 %v5978_v7, %v5967_v61  ;;  %6704 = vmatpush1.bf16.msra.mxu1 %v10666_v6  ;;  %v10692_v12 = vld [vmem:[%s14015_s5 + $0xe4] ss:$8 sps:$4 sm:$0xff]  }
 0x7ef   :  { %v5948_v10 = vpop.permute.xlu1 %5947  ;;  %6705 = vmatprep.subr.bf16.mxu1 %v10671_v17  ;;  %v6055_v17 = vld [vmem:[%s14016_s4] sm:$0x3] }
 0x7f0   :  { %v5950_v48 = vpop.permute.xlu0 %5949  ;;  %v5994_v47 = vmax.f32 %v5986_v8, 0.0  ;;  %v5996_v43 = vmax.f32 %v5988_v13, 0.0  ;;  %v5993_v4 = vmax.f32 %v5985_v60, 0.0  ;;  %v5995_v0 = vmax.f32 %v5987_v16, 0.0 }
 0x7f1   :  { %v5952_v25 = vsel %vm5867_vm2, %v5948_v10, %v5950_v48  ;;  %v5959_v27 = vsel %vm5867_vm2, %v5950_v48, 0  ;;  %v6064_v60 = vrot.slane %v6055_v17, %v12571_v18  ;;  %v6060_v16 = vrot.slane %v6055_v17, %v12579_v23  ;;  %v10695_v10 = vld [vmem:[%s14015_s5 + $0xf4] ss:$8 sps:$4 sm:$0xff]  }
 0x7f2   :  { %v5963_v26 = vmax.bf16 %v5952_v25, %v13144_v28  ;;  %v5964_v57 = vmax.bf16 %v5959_v27, %v13146_v19  ;;  %v13273_v24 = vpack.c.bf16 %v5996_v43, %v5994_v47  ;;  %v13275_v36 = vpack.c.bf16 %v5995_v0, %v5993_v4  ;;  %6706 = vmatpush1.bf16.msra.mxu1 %v10669_v41  ;;  %v10690_v41 = vld [vmem:[%s14015_s5 + $0xe0] ss:$8 sps:$4 sm:$0xff]   ;;  %v10693_v25 = vld [vmem:[%s14015_s5 + $0xf0] ss:$8 sps:$4 sm:$0xff]  }
 0x7f3   :  { %6707 = vmatprep.subr.bf16.mxu1 %v10674_v1 }
 0x7f4   :  { %v5969_v20 = vunpack.c.l.bf16 %v5963_v26  ;;  %v5970_v44 = vunpack.c.l.bf16 %v5964_v57  ;;  %v5971_v3 = vunpack.c.h.bf16 %v5963_v26  ;;  %v5972_v28 = vunpack.c.h.bf16 %v5964_v57  ;;  %6470 = vmatprep.mubr.bf16.mxu1 %v13273_v24  ;;  %v10698_v26 = vld [vmem:[%s14015_s5 + $0x204] ss:$8 sps:$4 sm:$0xff]  }
 0x7f5   :  { %6471 = vmatmul.mubr.bf16.gmra.mrb[196].mxu1 %v13275_v36 }
 0x7f6   :  { %v5990_v19 = vadd.f32 %v5982_v30, %v5970_v44  ;;  %v5992_v39 = vadd.f32 %v5982_v30, %v5972_v28  ;;  %v5989_v38 = vadd.f32 %v5978_v7, %v5969_v20  ;;  %v5991_v2 = vadd.f32 %v5978_v7, %v5971_v3  ;;  %6708 = vmatpush1.bf16.msra.mxu1 %v10672_v33  ;;  %v10689_v30 = vld [vmem:[%s14015_s5 + $0xd4] ss:$8 sps:$4 sm:$0xff]   ;;  %v10687_v7 = vld [vmem:[%s14015_s5 + $0xd0] ss:$8 sps:$4 sm:$0xff]  }
 0x7f7   :  { %6709 = vmatprep.subr.bf16.mxu1 %v10677_v40 }
 0x7f8   :  { %v5998_v49 = vmax.f32 %v5990_v19, 0.0  ;;  %v6000_v50 = vmax.f32 %v5992_v39, 0.0  ;;  %v5997_v14 = vmax.f32 %v5989_v38, 0.0  ;;  %v5999_v15 = vmax.f32 %v5991_v2, 0.0 }
 0x7fa   :  { %v13291_v32 = vpack.c.bf16 %v6000_v50, %v5998_v49  ;;  %v13293_v63 = vpack.c.bf16 %v5999_v15, %v5997_v14  ;;  %6710 = vmatpush1.bf16.msra.mxu1 %v10675_v55 }
 0x7fb   :  { %6711 = vmatprep.subr.bf16.mxu1 %v10680_v62 }
 0x7fc   :  { %6480 = vmatprep.mubr.bf16.mxu1 %v13291_v32 }
 0x7fd   :  { %6481 = vmatmul.mubr.bf16.gmra.mrb[200].mxu1 %v13293_v63 }
 0x7fe   :  { %6712 = vmatpush1.bf16.msra.mxu1 %v10678_v56 }
 0x7ff   :  { %6713 = vmatprep.subr.bf16.mxu1 %v10683_v53 }
 0x802   :  { %6714 = vmatpush1.bf16.msra.mxu1 %v10681_v58 }
 0x803   :  { %6715 = vmatprep.subr.bf16.mxu1 %v10686_v35 }
 0x806   :  { %6716 = vmatpush1.bf16.msra.mxu1 %v10684_v59 }
 0x807   :  { %v6026_v6 = vpop.permute.xlu1 %6025  ;;  %6717 = vmatprep.subr.bf16.mxu1 %v10689_v30 }
 0x808   :  { %v6028_v42 = vpop.permute.xlu0 %6027 }
 0x809   :  { %v6033_v61 = vsel %vm5867_vm2, %v6026_v6, %v6028_v42  ;;  %v6038_v52 = vsel %vm5867_vm2, %v6028_v42, 0  ;;  %v6137_v6 = vld [vmem:[%s14016_s4] sm:$0x3] }
 0x80a   :  { %v6043_v8 = vmax.bf16 %v6033_v61, %v13155_v34  ;;  %v6044_v13 = vmax.bf16 %v6038_v52, %v13157_v31  ;;  %6718 = vmatpush1.bf16.msra.mxu1 %v10687_v7 }
 0x80b   :  { %6719 = vmatprep.subr.bf16.mxu1 %v10692_v12 }
 0x80c   :  { %v6047_v1 = vunpack.c.l.bf16 %v6043_v8  ;;  %v6048_v48 = vunpack.c.l.bf16 %v6044_v13  ;;  %v6049_v47 = vunpack.c.h.bf16 %v6043_v8  ;;  %v6050_v34 = vunpack.c.h.bf16 %v6044_v13 }
 0x80d   :  { %v6146_v8 = vrot.slane %v6137_v6, %v12571_v18  ;;  %v6142_v13 = vrot.slane %v6137_v6, %v12579_v23  ;;  %v10710_v6 = vld [vmem:[%s14015_s5 + $0x244] ss:$8 sps:$4 sm:$0xff]  }
 0x80e   :  { %v6068_v43 = vadd.f32 %v6064_v60, %v6048_v48  ;;  %v6070_v31 = vadd.f32 %v6064_v60, %v6050_v34  ;;  %v6067_v4 = vadd.f32 %v6060_v16, %v6047_v1  ;;  %v6069_v0 = vadd.f32 %v6060_v16, %v6049_v47  ;;  %6720 = vmatpush1.bf16.msra.mxu1 %v10690_v41 }
 0x80f   :  { %v6030_v27 = vpop.permute.xlu1 %6029  ;;  %6721 = vmatprep.subr.bf16.mxu1 %v10695_v10 }
 0x810   :  { %v6032_v57 = vpop.permute.xlu0 %6031  ;;  %v6076_v33 = vmax.f32 %v6068_v43, 0.0  ;;  %v6078_v40 = vmax.f32 %v6070_v31, 0.0  ;;  %v6075_v20 = vmax.f32 %v6067_v4, 0.0  ;;  %v6077_v44 = vmax.f32 %v6069_v0, 0.0 }
 0x811   :  { %v6034_v3 = vsel %vm5867_vm2, %v6030_v27, %v6032_v57  ;;  %v6041_v28 = vsel %vm5867_vm2, %v6032_v57, 0 }
 0x812   :  { %v6045_v19 = vmax.bf16 %v6034_v3, %v13163_v21  ;;  %v6046_v39 = vmax.bf16 %v6041_v28, %v13165_v5  ;;  %v13346_v38 = vpack.c.bf16 %v6078_v40, %v6076_v33  ;;  %v13348_v2 = vpack.c.bf16 %v6077_v44, %v6075_v20  ;;  %6722 = vmatpush1.bf16.msra.mxu1 %v10693_v25 }
 0x813   :  { %7013 = vmatprep.subr.bf16.mxu1 %v10698_v26 }
 0x814   :  { %v6051_v55 = vunpack.c.l.bf16 %v6045_v19  ;;  %v6052_v62 = vunpack.c.l.bf16 %v6046_v39  ;;  %v6053_v49 = vunpack.c.h.bf16 %v6045_v19  ;;  %v6054_v50 = vunpack.c.h.bf16 %v6046_v39  ;;  %6490 = vmatprep.mubr.bf16.mxu1 %v13346_v38 }
 0x815   :  { %6491 = vmatmul.mubr.bf16.gmra.mrb[204].mxu1 %v13348_v2 }
 0x816   :  { %v6072_v14 = vadd.f32 %v6064_v60, %v6052_v62  ;;  %v6074_v15 = vadd.f32 %v6064_v60, %v6054_v50  ;;  %v6071_v56 = vadd.f32 %v6060_v16, %v6051_v55  ;;  %v6073_v21 = vadd.f32 %v6060_v16, %v6053_v49 }
 0x818   :  { %v6080_v53 = vmax.f32 %v6072_v14, 0.0  ;;  %v6082_v5 = vmax.f32 %v6074_v15, 0.0  ;;  %v6079_v58 = vmax.f32 %v6071_v56, 0.0  ;;  %v6081_v35 = vmax.f32 %v6073_v21, 0.0  ;;  %v10696_v56 = vld [vmem:[%s14015_s5 + $0x200] ss:$8 sps:$4 sm:$0xff]  }
 0x819   :  { %v10701_v21 = vld [vmem:[%s14015_s5 + $0x214] ss:$8 sps:$4 sm:$0xff]  }
 0x81a   :  { %v13352_v59 = vpack.c.bf16 %v6082_v5, %v6080_v53  ;;  %v13354_v30 = vpack.c.bf16 %v6081_v35, %v6079_v58  ;;  %v10699_v53 = vld [vmem:[%s14015_s5 + $0x210] ss:$8 sps:$4 sm:$0xff]   ;;  %v10704_v5 = vld [vmem:[%s14015_s5 + $0x224] ss:$8 sps:$4 sm:$0xff]   ;;  %v10702_v58 = vld [vmem:[%s14015_s5 + $0x220] ss:$8 sps:$4 sm:$0xff]  }
 0x81b   :  { %v10707_v35 = vld [vmem:[%s14015_s5 + $0x234] ss:$8 sps:$4 sm:$0xff]  }
 0x81c   :  { %6500 = vmatprep.mubr.bf16.mxu1 %v13352_v59 }
 0x81d   :  { %6501 = vmatmul.mubr.bf16.gmra.mrb[208].mxu1 %v13354_v30 }
 0x827   :  { %v6108_v7 = vpop.permute.xlu1 %6107 }
 0x828   :  { %v6110_v17 = vpop.permute.xlu0 %6109 }
 0x829   :  { %v6115_v12 = vsel %vm5867_vm2, %v6108_v7, %v6110_v17  ;;  %v6120_v42 = vsel %vm5867_vm2, %v6110_v17, 0  ;;  %v10705_v7 = vld [vmem:[%s14015_s5 + $0x230] ss:$8 sps:$4 sm:$0xff]   ;;  %v10708_v17 = vld [vmem:[%s14015_s5 + $0x240] ss:$8 sps:$4 sm:$0xff]  }
 0x82a   :  { %v6125_v61 = vmax.bf16 %v6115_v12, %v13171_v22  ;;  %v6126_v52 = vmax.bf16 %v6120_v42, %v13173_v29  ;;  %v10711_v12 = vld [vmem:[%s14015_s5 + $0x250] ss:$8 sps:$4 sm:$0xff]   ;;  %v10716_v42 = vld [vmem:[%s14015_s5 + $0x264] ss:$8 sps:$4 sm:$0xff]  }
 0x82c   :  { %v6129_v60 = vunpack.c.l.bf16 %v6125_v61  ;;  %v6130_v16 = vunpack.c.l.bf16 %v6126_v52  ;;  %v6131_v41 = vunpack.c.h.bf16 %v6125_v61  ;;  %v6132_v10 = vunpack.c.h.bf16 %v6126_v52  ;;  %v10714_v61 = vld [vmem:[%s14015_s5 + $0x260] ss:$8 sps:$4 sm:$0xff]   ;;  %v10722_v52 = vld [vmem:[%s14015_s5 + $0x284] ss:$8 sps:$4 sm:$0xff]  }
 0x82e   :  { %v6150_v1 = vadd.f32 %v6146_v8, %v6130_v16  ;;  %v6152_v48 = vadd.f32 %v6146_v8, %v6132_v10  ;;  %v6149_v47 = vadd.f32 %v6142_v13, %v6129_v60  ;;  %v6151_v34 = vadd.f32 %v6142_v13, %v6131_v41  ;;  %v10728_v60 = vld [vmem:[%s14015_s5 + $0x2a4] ss:$8 sps:$4 sm:$0xff]   ;;  %v10726_v16 = vld [vmem:[%s14015_s5 + $0x2a0] ss:$8 sps:$4 sm:$0xff]   ;;  %v10731_v41 = vld [vmem:[%s14015_s5 + $0x2b4] ss:$8 sps:$4 sm:$0xff]  }
 0x82f   :  { %v6112_v43 = vpop.permute.xlu1 %6111  ;;  %v10729_v10 = vld [vmem:[%s14015_s5 + $0x2b0] ss:$8 sps:$4 sm:$0xff]  }
 0x830   :  { %v6114_v31 = vpop.permute.xlu0 %6113  ;;  %v6158_v4 = vmax.f32 %v6150_v1, 0.0  ;;  %v6160_v0 = vmax.f32 %v6152_v48, 0.0  ;;  %v6157_v25 = vmax.f32 %v6149_v47, 0.0  ;;  %v6159_v22 = vmax.f32 %v6151_v34, 0.0  ;;  %v10734_v1 = vld [vmem:[%s14015_s5 + $0x2c4] ss:$8 sps:$4 sm:$0xff]  }
 0x831   :  { %v6116_v29 = vsel %vm5867_vm2, %v6112_v43, %v6114_v31  ;;  %v6123_v27 = vsel %vm5867_vm2, %v6114_v31, 0  ;;  %v10732_v48 = vld [vmem:[%s14015_s5 + $0x2c0] ss:$8 sps:$4 sm:$0xff]   ;;  %v10737_v47 = vld [vmem:[%s14015_s5 + $0x2d4] ss:$8 sps:$4 sm:$0xff]  }
 0x832   :  { %v6127_v26 = vmax.bf16 %v6116_v29, %v13179_v51  ;;  %v6128_v57 = vmax.bf16 %v6123_v27, %v13181_v45  ;;  %v13371_v33 = vpack.c.bf16 %v6160_v0, %v6158_v4  ;;  %v13373_v40 = vpack.c.bf16 %v6159_v22, %v6157_v25  ;;  %v10735_v34 = vld [vmem:[%s14015_s5 + $0x2d0] ss:$8 sps:$4 sm:$0xff]   ;;  %v10740_v43 = vld [vmem:[%s14015_s5 + $0x2e4] ss:$8 sps:$4 sm:$0xff]   ;;  %v10738_v31 = vld [vmem:[%s14015_s5 + $0x2e0] ss:$8 sps:$4 sm:$0xff]  }
 0x833   :  { %v10743_v4 = vld [vmem:[%s14015_s5 + $0x2f4] ss:$8 sps:$4 sm:$0xff]   ;;  %v10741_v0 = vld [vmem:[%s14015_s5 + $0x2f0] ss:$8 sps:$4 sm:$0xff]   ;;  %v10758_v25 = vld [vmem:[%s14017_s7 + $0x144] ss:$8 sps:$4 sm:$0xff]  }
 0x834   :  { %v6133_v20 = vunpack.c.l.bf16 %v6127_v26  ;;  %v6134_v44 = vunpack.c.l.bf16 %v6128_v57  ;;  %v6135_v3 = vunpack.c.h.bf16 %v6127_v26  ;;  %v6136_v28 = vunpack.c.h.bf16 %v6128_v57  ;;  %6510 = vmatprep.mubr.bf16.mxu1 %v13371_v33  ;;  %v10756_v22 = vld [vmem:[%s14017_s7 + $0x140] ss:$8 sps:$4 sm:$0xff]   ;;  %v10761_v29 = vld [vmem:[%s14017_s7 + $0x154] ss:$8 sps:$4 sm:$0xff]   ;;  %v10759_v27 = vld [vmem:[%s14017_s7 + $0x150] ss:$8 sps:$4 sm:$0xff]  }
 0x835   :  { %6511 = vmatmul.mubr.bf16.gmra.mrb[212].mxu1 %v13373_v40  ;;  %v10764_v26 = vld [vmem:[%s14017_s7 + $0x164] ss:$8 sps:$4 sm:$0xff]   ;;  %v10762_v57 = vld [vmem:[%s14017_s7 + $0x160] ss:$8 sps:$4 sm:$0xff]  }
 0x836   :  { %v6154_v19 = vadd.f32 %v6146_v8, %v6134_v44  ;;  %v6156_v39 = vadd.f32 %v6146_v8, %v6136_v28  ;;  %v6153_v55 = vadd.f32 %v6142_v13, %v6133_v20  ;;  %v6155_v62 = vadd.f32 %v6142_v13, %v6135_v3  ;;  %v10720_v8 = vld [vmem:[%s14015_s5 + $0x280] ss:$8 sps:$4 sm:$0xff]   ;;  %v10723_v13 = vld [vmem:[%s14015_s5 + $0x290] ss:$8 sps:$4 sm:$0xff]   ;;  %v10770_v20 = vld [vmem:[%s14017_s7 + $0x184] ss:$8 sps:$4 sm:$0xff]  }
 0x837   :  { %v10768_v44 = vld [vmem:[%s14017_s7 + $0x180] ss:$8 sps:$4 sm:$0xff]   ;;  %v10773_v3 = vld [vmem:[%s14017_s7 + $0x194] ss:$8 sps:$4 sm:$0xff]   ;;  %v10771_v28 = vld [vmem:[%s14017_s7 + $0x190] ss:$8 sps:$4 sm:$0xff]  }
 0x838   :  { %v6162_v49 = vmax.f32 %v6154_v19, 0.0  ;;  %v6164_v51 = vmax.f32 %v6156_v39, 0.0  ;;  %v6161_v50 = vmax.f32 %v6153_v55, 0.0  ;;  %v6163_v45 = vmax.f32 %v6155_v62, 0.0  ;;  %v10776_v19 = vld [vmem:[%s14017_s7 + $0x1a4] ss:$8 sps:$4 sm:$0xff]  }
 0x839   :  { %v10774_v39 = vld [vmem:[%s14017_s7 + $0x1a0] ss:$8 sps:$4 sm:$0xff]   ;;  %v10779_v55 = vld [vmem:[%s14017_s7 + $0x1b4] ss:$8 sps:$4 sm:$0xff]   ;;  %v10777_v62 = vld [vmem:[%s14017_s7 + $0x1b0] ss:$8 sps:$4 sm:$0xff]  }
 0x83a   :  { %v13377_v14 = vpack.c.bf16 %v6164_v51, %v6162_v49  ;;  %v13379_v15 = vpack.c.bf16 %v6163_v45, %v6161_v50  ;;  %v10782_v49 = vld [vmem:[%s14017_s7 + $0x1c4] ss:$8 sps:$4 sm:$0xff]   ;;  %v10780_v51 = vld [vmem:[%s14017_s7 + $0x1c0] ss:$8 sps:$4 sm:$0xff]  }
 0x83c   :  { %6520 = vmatprep.mubr.bf16.mxu1 %v13377_v14 }
 0x83d   :  { %6521 = vmatmul.mubr.bf16.gmra.mrb[216].mxu1 %v13379_v15 }
 0x83e   :  { %6723 = vmatprep.mubr.bf16.mxu1 %v14147_v11 }
 0x845   :  { %6724 = vmatmul.mubr.bf16.vlgmr.msra.gmra.mrb[188].mxu1 %v14147_v11 }
 0x846   :  { %7014 = vmatpush1.bf16.msra.mxu1 %v10696_v56  ;;  %6733 = vmatprep.mubr.bf16.mxu1 %v14147_v11 }
 0x847   :  { %7015 = vmatprep.subr.bf16.mxu1 %v10701_v21 }
 0x84a   :  { %7016 = vmatpush1.bf16.msra.mxu1 %v10699_v53 }
 0x84b   :  { %7017 = vmatprep.subr.bf16.mxu1 %v10704_v5 }
 0x84d   :  { %6734 = vmatmul.mubr.bf16.gmra.mrb[192].mxu1 %v14147_v11 }
 0x84e   :  { %6743 = vmatprep.mubr.bf16.mxu1 %v13202_v37  ;;  %7018 = vmatpush1.bf16.msra.mxu1 %v10702_v58  ;;  %v10713_v37 = vld [vmem:[%s14015_s5 + $0x254] ss:$8 sps:$4 sm:$0xff]   ;;  %v10783_v58 = vld [vmem:[%s14017_s7 + $0x1d0] ss:$8 sps:$4 sm:$0xff]  }
 0x84f   :  { %7019 = vmatprep.subr.bf16.mxu1 %v10707_v35  ;;  %v10785_v35 = vld [vmem:[%s14017_s7 + $0x1d4] ss:$8 sps:$4 sm:$0xff]  }
 0x852   :  { %7020 = vmatpush1.bf16.msra.mxu1 %v10705_v7 }
 0x853   :  { %7021 = vmatprep.subr.bf16.mxu1 %v10710_v6 }
 0x855   :  { %6744 = vmatmul.mubr.bf16.gmra.mrb[196].mxu1 %v13198_v54  ;;  %v10719_v54 = vld [vmem:[%s14015_s5 + $0x274] ss:$8 sps:$4 sm:$0xff]  }
 0x856   :  { %6753 = vmatprep.mubr.bf16.mxu1 %v13218_v46  ;;  %7022 = vmatpush1.bf16.msra.mxu1 %v10708_v17  ;;  %v10717_v46 = vld [vmem:[%s14015_s5 + $0x270] ss:$8 sps:$4 sm:$0xff]  }
 0x857   :  { %7023 = vmatprep.subr.bf16.mxu1 %v10713_v37 }
 0x85a   :  { %7024 = vmatpush1.bf16.msra.mxu1 %v10711_v12 }
 0x85b   :  { %7025 = vmatprep.subr.bf16.mxu1 %v10716_v42 }
 0x85d   :  { %6754 = vmatmul.mubr.bf16.gmra.mrb[200].mxu1 %v13220_v9  ;;  %v10725_v9 = vld [vmem:[%s14015_s5 + $0x294] ss:$8 sps:$4 sm:$0xff]  }
 0x85e   :  { %6763 = vmatprep.mubr.bf16.mxu1 %v13273_v24  ;;  %7026 = vmatpush1.bf16.msra.mxu1 %v10714_v61 }
 0x85f   :  { %7027 = vmatprep.subr.bf16.mxu1 %v10719_v54 }
 0x862   :  { %7028 = vmatpush1.bf16.msra.mxu1 %v10717_v46 }
 0x863   :  { %7029 = vmatprep.subr.bf16.mxu1 %v10722_v52 }
 0x865   :  { %6764 = vmatmul.mubr.bf16.gmra.mrb[204].mxu1 %v13275_v36 }
 0x866   :  { %6773 = vmatprep.mubr.bf16.mxu1 %v13291_v32  ;;  %7030 = vmatpush1.bf16.msra.mxu1 %v10720_v8  ;;  %v10786_v8 = vld [vmem:[%s14017_s7 + $0x1e0] ss:$8 sps:$4 sm:$0xff]  }
 0x867   :  { %7031 = vmatprep.subr.bf16.mxu1 %v10725_v9  ;;  %v10788_v9 = vld [vmem:[%s14017_s7 + $0x1e4] ss:$8 sps:$4 sm:$0xff]  }
 0x86a   :  { %7032 = vmatpush1.bf16.msra.mxu1 %v10723_v13 }
 0x86b   :  { %7033 = vmatprep.subr.bf16.mxu1 %v10728_v60  ;;  %v10791_v60 = vld [vmem:[%s14017_s7 + $0x1f4] ss:$8 sps:$4 sm:$0xff]  }
 0x86d   :  { %6774 = vmatmul.mubr.bf16.gmra.mrb[208].mxu1 %v13293_v63 }
 0x86e   :  { %6783 = vmatprep.mubr.bf16.mxu1 %v13346_v38  ;;  %7034 = vmatpush1.bf16.msra.mxu1 %v10726_v16 }
 0x86f   :  { %7035 = vmatprep.subr.bf16.mxu1 %v10731_v41  ;;  %v10789_v41 = vld [vmem:[%s14017_s7 + $0x1f0] ss:$8 sps:$4 sm:$0xff]  }
 0x872   :  { %7036 = vmatpush1.bf16.msra.mxu1 %v10729_v10 }
 0x873   :  { %7037 = vmatprep.subr.bf16.mxu1 %v10734_v1  ;;  %v10794_v1 = vld [vmem:[%s14017_s7 + $0x4] ss:$8 sps:$4 sm:$0xff]  }
 0x875   :  { %6784 = vmatmul.mubr.bf16.gmra.mrb[212].mxu1 %v13348_v2 }
 0x876   :  { %6793 = vmatprep.mubr.bf16.mxu1 %v13352_v59  ;;  %7038 = vmatpush1.bf16.msra.mxu1 %v10732_v48 }
 0x877   :  { %7039 = vmatprep.subr.bf16.mxu1 %v10737_v47 }
 0x87a   :  { %7040 = vmatpush1.bf16.msra.mxu1 %v10735_v34 }
 0x87b   :  { %7041 = vmatprep.subr.bf16.mxu1 %v10740_v43 }
 0x87d   :  { %6794 = vmatmul.mubr.bf16.gmra.mrb[216].mxu1 %v13354_v30 }
 0x87e   :  { %7042 = vmatpush1.bf16.msra.mxu1 %v10738_v31  ;;  %7045 = vmatprep.mubr.bf16.mxu1 %v13273_v24  ;;  %v10744_v24 = vld [vmem:[%s14017_s7 + $0x100] ss:$8 sps:$4 sm:$0xff]  }
 0x87f   :  { %7043 = vmatprep.subr.bf16.mxu1 %v10743_v4 }
 0x882   :  { %7044 = vmatpush1.bf16.msra.mxu1 %v10741_v0 }
 0x885   :  { %7046 = vmatmul.mubr.bf16.vlgmr.msra.gmra.mrb[188].mxu1 %v13275_v36  ;;  %v10746_v36 = vld [vmem:[%s14017_s7 + $0x104] ss:$8 sps:$4 sm:$0xff]  }
 0x886   :  { %7055 = vmatprep.mubr.bf16.mxu1 %v13291_v32  ;;  %v10749_v32 = vld [vmem:[%s14017_s7 + $0x114] ss:$8 sps:$4 sm:$0xff]   ;;  %7593 = vmatprep.subr.bf16.mxu1 %v10746_v36 }
 0x887   :  { %7594 = vmatpush1.bf16.msra.mxu1 %v10744_v24 }
 0x888   :  { %7595 = vmatprep.subr.bf16.mxu1 %v10749_v32 }
 0x88d   :  { %7056 = vmatmul.mubr.bf16.gmra.mrb[192].mxu1 %v13293_v63  ;;  %v10747_v63 = vld [vmem:[%s14017_s7 + $0x110] ss:$8 sps:$4 sm:$0xff]  }
 0x88e   :  { %7065 = vmatprep.mubr.bf16.mxu1 %v13346_v38  ;;  %v10752_v38 = vld [vmem:[%s14017_s7 + $0x124] ss:$8 sps:$4 sm:$0xff]   ;;  %7596 = vmatpush1.bf16.msra.mxu1 %v10747_v63 }
 0x88f   :  { %7597 = vmatprep.subr.bf16.mxu1 %v10752_v38 }
 0x895   :  { %7066 = vmatmul.mubr.bf16.gmra.mrb[196].mxu1 %v13348_v2  ;;  %v10750_v2 = vld [vmem:[%s14017_s7 + $0x120] ss:$8 sps:$4 sm:$0xff]  }
 0x896   :  { %7075 = vmatprep.mubr.bf16.mxu1 %v13352_v59  ;;  %v10755_v59 = vld [vmem:[%s14017_s7 + $0x134] ss:$8 sps:$4 sm:$0xff]   ;;  %7598 = vmatpush1.bf16.msra.mxu1 %v10750_v2 }
 0x897   :  { %7599 = vmatprep.subr.bf16.mxu1 %v10755_v59 }
 0x89d   :  { %7076 = vmatmul.mubr.bf16.gmra.mrb[200].mxu1 %v13354_v30  ;;  %v10753_v30 = vld [vmem:[%s14017_s7 + $0x130] ss:$8 sps:$4 sm:$0xff]  }
 0x89e   :  { %7085 = vmatprep.mubr.bf16.mxu1 %v13371_v33  ;;  %7600 = vmatpush1.bf16.msra.mxu1 %v10753_v30  ;;  %v10767_v33 = vld [vmem:[%s14017_s7 + $0x174] ss:$8 sps:$4 sm:$0xff]  }
 0x89f   :  { %7601 = vmatprep.subr.bf16.mxu1 %v10758_v25 }
 0x8a2   :  { %7602 = vmatpush1.bf16.msra.mxu1 %v10756_v22 }
 0x8a3   :  { %7603 = vmatprep.subr.bf16.mxu1 %v10761_v29 }
 0x8a5   :  { %7086 = vmatmul.mubr.bf16.gmra.mrb[204].mxu1 %v13373_v40  ;;  %v10765_v40 = vld [vmem:[%s14017_s7 + $0x170] ss:$8 sps:$4 sm:$0xff]  }
 0x8a6   :  { %7095 = vmatprep.mubr.bf16.mxu1 %v13377_v14  ;;  %7604 = vmatpush1.bf16.msra.mxu1 %v10759_v27 }
 0x8a7   :  { %7605 = vmatprep.subr.bf16.mxu1 %v10764_v26 }
 0x8aa   :  { %7606 = vmatpush1.bf16.msra.mxu1 %v10762_v57 }
 0x8ab   :  { %7607 = vmatprep.subr.bf16.mxu1 %v10767_v33 }
 0x8ad   :  { %7096 = vmatmul.mubr.bf16.gmra.mrb[208].mxu1 %v13379_v15 }
 0x8ae   :  { %7105 = vmatprep.mubr.bf16.mxu1 %v14147_v11  ;;  %7608 = vmatpush1.bf16.msra.mxu1 %v10765_v40 }
 0x8af   :  { %7609 = vmatprep.subr.bf16.mxu1 %v10770_v20 }
 0x8b2   :  { %7610 = vmatpush1.bf16.msra.mxu1 %v10768_v44 }
 0x8b3   :  { %7611 = vmatprep.subr.bf16.mxu1 %v10773_v3 }
 0x8b5   :  { %7106 = vmatmul.mubr.bf16.gmra.mrb[212].mxu1 %v14147_v11 }
 0x8b6   :  { %7115 = vmatprep.mubr.bf16.mxu1 %v14147_v11  ;;  %7612 = vmatpush1.bf16.msra.mxu1 %v10771_v28 }
 0x8b7   :  { %7613 = vmatprep.subr.bf16.mxu1 %v10776_v19 }
 0x8ba   :  { %7614 = vmatpush1.bf16.msra.mxu1 %v10774_v39 }
 0x8bb   :  { %7615 = vmatprep.subr.bf16.mxu1 %v10779_v55 }
 0x8bd   :  { %7116 = vmatmul.mubr.bf16.gmra.mrb[216].mxu1 %v14147_v11 }
 0x8be   :  { %7616 = vmatpush1.bf16.msra.mxu1 %v10777_v62 }
 0x8bf   :  { %7617 = vmatprep.subr.bf16.mxu1 %v10782_v49 }
 0x8c2   :  { %7618 = vmatpush1.bf16.msra.mxu1 %v10780_v51 }
 0x8c3   :  { %7619 = vmatprep.subr.bf16.mxu1 %v10785_v35 }
 0x8c6   :  { %7620 = vmatpush1.bf16.msra.mxu1 %v10783_v58 }
 0x8c7   :  { %7621 = vmatprep.subr.bf16.mxu1 %v10788_v9 }
 0x8ca   :  { %7622 = vmatpush1.bf16.msra.mxu1 %v10786_v8 }
 0x8cb   :  { %7623 = vmatprep.subr.bf16.mxu1 %v10791_v60 }
 0x8ce   :  { %7624 = vmatpush1.bf16.msra.mxu1 %v10789_v41 }
 0x8cf   :  { %7826 = vmatprep.subr.bf16.mxu1 %v10794_v1 }
 0x958   :  { %v7047_v50 = vpop.f32.mrb[188].mxu1 }
 0x959   :  { %v7049_v45 = vpop.f32.mrb[189].mxu1 }
 0x95a   :  { %v7051_v14 = vpop.f32.mrb[190].mxu1 }
 0x95b   :  { %v7158_v15 = vpack.c.bf16 %v7051_v14, %v7047_v50  ;;  %v7053_v56 = vpop.f32.mrb[191].mxu1 }
 0x95c   :  { %v7159_v21 = vpack.c.bf16 %v7053_v56, %v7049_v45 }
 0x960   :  { %v7057_v53 = vpop.f32.mrb[192].mxu1 }
 0x961   :  { %v7059_v5 = vpop.f32.mrb[193].mxu1 }
 0x962   :  { %v7061_v7 = vpop.f32.mrb[194].mxu1 }
 0x963   :  { %v7160_v6 = vpack.c.bf16 %v7061_v7, %v7057_v53  ;;  %v7063_v17 = vpop.f32.mrb[195].mxu1 }
 0x964   :  { %v7161_v37 = vpack.c.bf16 %v7063_v17, %v7059_v5 }
 0x968   :  { %v7067_v12 = vpop.f32.mrb[196].mxu1 }
 0x969   :  { %v7069_v42 = vpop.f32.mrb[197].mxu1 }
 0x96a   :  { %v7071_v61 = vpop.f32.mrb[198].mxu1 }
 0x96b   :  { %v7162_v54 = vpack.c.bf16 %v7071_v61, %v7067_v12  ;;  %v7073_v46 = vpop.f32.mrb[199].mxu1 }
 0x96c   :  { %v7163_v52 = vpack.c.bf16 %v7073_v46, %v7069_v42 }
 0x96d   :  { %v13598_v13 = vmax.bf16 %v7162_v54, %v7158_v15  ;;  %v7238_v15 = vld [vmem:[%s14018_s6] sm:$0x3] }
 0x96e   :  { %v7199_v16 = vmax.bf16 %v7163_v52, %v7159_v21  ;;  %v7243_v5 = vrot.slane %v7238_v15, %v12579_v23  ;;  %v7247_v7 = vrot.slane %v7238_v15, %v12571_v18 }
 0x96f   :  { %7206 = vrot.lane.b32.xlu1 %v13598_v13, %s10947_s29 }
 0x970   :  { %7208 = vrot.lane.b32.xlu0 %v7199_v16, %s10947_s29  ;;  %v7077_v10 = vpop.f32.mrb[200].mxu1 }
 0x971   :  { %v7079_v48 = vpop.f32.mrb[201].mxu1 }
 0x972   :  { %v7081_v47 = vpop.f32.mrb[202].mxu1 }
 0x973   :  { %v7164_v34 = vpack.c.bf16 %v7081_v47, %v7077_v10  ;;  %v7083_v43 = vpop.f32.mrb[203].mxu1 }
 0x974   :  { %v7165_v31 = vpack.c.bf16 %v7083_v43, %v7079_v48  ;;  %v10792_v43 = vld [vmem:[%s14017_s7] ss:$8 sps:$4 sm:$0xff]  }
 0x975   :  { %v13612_v4 = vmax.bf16 %v7164_v34, %v7160_v6 }
 0x976   :  { %v13614_v0 = vmax.bf16 %v7165_v31, %v7161_v37  ;;  %v10797_v31 = vld [vmem:[%s14017_s7 + $0x14] ss:$8 sps:$4 sm:$0xff]  }
 0x977   :  { %7210 = vrot.lane.b32.xlu1 %v13612_v4, %s10947_s29 }
 0x978   :  { %7212 = vrot.lane.b32.xlu0 %v13614_v0, %s10947_s29  ;;  %v7087_v24 = vpop.f32.mrb[204].mxu1 }
 0x979   :  { %v7089_v36 = vpop.f32.mrb[205].mxu1 }
 0x97a   :  { %v7091_v32 = vpop.f32.mrb[206].mxu1 }
 0x97b   :  { %v7166_v63 = vpack.c.bf16 %v7091_v32, %v7087_v24  ;;  %v7093_v38 = vpop.f32.mrb[207].mxu1 }
 0x97c   :  { %v7167_v2 = vpack.c.bf16 %v7093_v38, %v7089_v36 }
 0x980   :  { %v7097_v59 = vpop.f32.mrb[208].mxu1 }
 0x981   :  { %v7099_v30 = vpop.f32.mrb[209].mxu1 }
 0x982   :  { %v7101_v25 = vpop.f32.mrb[210].mxu1 }
 0x983   :  { %v7168_v22 = vpack.c.bf16 %v7101_v25, %v7097_v59  ;;  %v7103_v29 = vpop.f32.mrb[211].mxu1 }
 0x984   :  { %v7169_v27 = vpack.c.bf16 %v7103_v29, %v7099_v30  ;;  %v10800_v30 = vld [vmem:[%s14017_s7 + $0x24] ss:$8 sps:$4 sm:$0xff]  }
 0x988   :  { %v7107_v26 = vpop.f32.mrb[212].mxu1 }
 0x989   :  { %v7109_v57 = vpop.f32.mrb[213].mxu1 }
 0x98a   :  { %v7111_v33 = vpop.f32.mrb[214].mxu1 }
 0x98b   :  { %v7170_v40 = vpack.c.bf16 %v7111_v33, %v7107_v26  ;;  %v7113_v20 = vpop.f32.mrb[215].mxu1 }
 0x98c   :  { %v7171_v44 = vpack.c.bf16 %v7113_v20, %v7109_v57  ;;  %v10798_v57 = vld [vmem:[%s14017_s7 + $0x20] ss:$8 sps:$4 sm:$0xff]   ;;  %v10801_v20 = vld [vmem:[%s14017_s7 + $0x30] ss:$8 sps:$4 sm:$0xff]  }
 0x98d   :  { %v13620_v3 = vmax.bf16 %v7170_v40, %v7166_v63  ;;  %v10803_v40 = vld [vmem:[%s14017_s7 + $0x34] ss:$8 sps:$4 sm:$0xff]  }
 0x98e   :  { %v13622_v28 = vmax.bf16 %v7171_v44, %v7167_v2  ;;  %v10806_v44 = vld [vmem:[%s14017_s7 + $0x44] ss:$8 sps:$4 sm:$0xff]  }
 0x98f   :  { %7290 = vrot.lane.b32.xlu1 %v13620_v3, %s10947_s29 }
 0x990   :  { %7292 = vrot.lane.b32.xlu0 %v13622_v28, %s10947_s29  ;;  %v7117_v19 = vpop.f32.mrb[216].mxu1 }
 0x991   :  { %v7119_v39 = vpop.f32.mrb[217].mxu1 }
 0x992   :  { %v7121_v55 = vpop.f32.mrb[218].mxu1 }
 0x993   :  { %v7172_v62 = vpack.c.bf16 %v7121_v55, %v7117_v19  ;;  %v7123_v49 = vpop.f32.mrb[219].mxu1  ;;  %v10804_v19 = vld [vmem:[%s14017_s7 + $0x40] ss:$8 sps:$4 sm:$0xff]   ;;  %v10807_v55 = vld [vmem:[%s14017_s7 + $0x50] ss:$8 sps:$4 sm:$0xff]  }
 0x994   :  { %v7173_v51 = vpack.c.bf16 %v7123_v49, %v7119_v39  ;;  %v10809_v39 = vld [vmem:[%s14017_s7 + $0x54] ss:$8 sps:$4 sm:$0xff]   ;;  %v10812_v49 = vld [vmem:[%s14017_s7 + $0x64] ss:$8 sps:$4 sm:$0xff]  }
 0x995   :  { %v13628_v50 = vmax.bf16 %v7172_v62, %v7168_v22 }
 0x996   :  { %v13630_v45 = vmax.bf16 %v7173_v51, %v7169_v27  ;;  %v7320_v51 = vld [vmem:[%s14018_s6] sm:$0x3] }
 0x997   :  { %7294 = vrot.lane.b32.xlu1 %v13628_v50, %s10947_s29 }
 0x998   :  { %7296 = vrot.lane.b32.xlu0 %v13630_v45, %s10947_s29 }
 0x9e1   :  { %v7207_v14 = vpop.permute.xlu1 %7206 }
 0x9e2   :  { %v7209_v56 = vpop.permute.xlu0 %7208 }
 0x9e3   :  { %v7215_v21 = vsel %vm7214_vm3, %v7207_v14, %v7209_v56  ;;  %v7221_v53 = vsel %vm7214_vm3, %v7209_v56, 0 }
 0x9e4   :  { %v7226_v58 = vmax.bf16 %v7215_v21, %v13598_v13  ;;  %v7227_v35 = vmax.bf16 %v7221_v53, %v7199_v16 }
 0x9e6   :  { %v7230_v6 = vunpack.c.l.bf16 %v7226_v58  ;;  %v7231_v17 = vunpack.c.l.bf16 %v7227_v35  ;;  %v7232_v37 = vunpack.c.h.bf16 %v7226_v58  ;;  %v7233_v12 = vunpack.c.h.bf16 %v7227_v35 }
 0x9e7   :  { %v7329_v58 = vrot.slane %v7320_v51, %v12571_v18  ;;  %v7325_v35 = vrot.slane %v7320_v51, %v12579_v23  ;;  %v10836_v51 = vld [vmem:[%s14017_s7 + $0xe4] ss:$8 sps:$4 sm:$0xff]  }
 0x9e8   :  { %v7250_v42 = vadd.f32 %v7243_v5, %v7230_v6  ;;  %v7252_v61 = vadd.f32 %v7243_v5, %v7232_v37  ;;  %v7251_v54 = vadd.f32 %v7247_v7, %v7231_v17  ;;  %v7253_v46 = vadd.f32 %v7247_v7, %v7233_v12 }
 0x9e9   :  { %v7211_v52 = vpop.permute.xlu1 %7210 }
 0x9ea   :  { %v7258_v8 = vmax.f32 %v7250_v42, 0.0  ;;  %v7260_v9 = vmax.f32 %v7252_v61, 0.0  ;;  %v7213_v60 = vpop.permute.xlu0 %7212  ;;  %v7259_v41 = vmax.f32 %v7251_v54, 0.0  ;;  %v7261_v10 = vmax.f32 %v7253_v46, 0.0 }
 0x9eb   :  { %v7216_v1 = vsel %vm7214_vm3, %v7211_v52, %v7213_v60  ;;  %v7224_v13 = vsel %vm7214_vm3, %v7213_v60, 0  ;;  %v10818_v52 = vld [vmem:[%s14017_s7 + $0x84] ss:$8 sps:$4 sm:$0xff]  }
 0x9ec   :  { %v13646_v16 = vpack.c.bf16 %v7260_v9, %v7258_v8  ;;  %v7228_v48 = vmax.bf16 %v7216_v1, %v13612_v4  ;;  %v7229_v47 = vmax.bf16 %v7224_v13, %v13614_v0  ;;  %v13650_v34 = vpack.c.bf16 %v7261_v10, %v7259_v41  ;;  %v10795_v4 = vld [vmem:[%s14017_s7 + $0x10] ss:$8 sps:$4 sm:$0xff]  }
 0x9ee   :  { %v7234_v24 = vunpack.c.l.bf16 %v7228_v48  ;;  %v7235_v36 = vunpack.c.l.bf16 %v7229_v47  ;;  %v7236_v32 = vunpack.c.h.bf16 %v7228_v48  ;;  %v7237_v63 = vunpack.c.h.bf16 %v7229_v47  ;;  %7625 = vmatprep.mubr.bf16.mxu1 %v13650_v34 }
 0x9ef   :  { %7626 = vmatmul.mubr.bf16.vlgmr.msra.gmra.mrb[220].mxu1 %v13646_v16 }
 0x9f0   :  { %7827 = vmatpush1.bf16.msra.mxu1 %v10792_v43  ;;  %v7255_v0 = vadd.f32 %v7247_v7, %v7235_v36  ;;  %v7257_v38 = vadd.f32 %v7247_v7, %v7237_v63  ;;  %v7254_v2 = vadd.f32 %v7243_v5, %v7234_v24  ;;  %v7256_v59 = vadd.f32 %v7243_v5, %v7236_v32  ;;  %v10810_v5 = vld [vmem:[%s14017_s7 + $0x60] ss:$8 sps:$4 sm:$0xff]   ;;  %v10815_v7 = vld [vmem:[%s14017_s7 + $0x74] ss:$8 sps:$4 sm:$0xff]  }
 0x9f1   :  { %7828 = vmatprep.subr.bf16.mxu1 %v10797_v31  ;;  %v10816_v31 = vld [vmem:[%s14017_s7 + $0x80] ss:$8 sps:$4 sm:$0xff]   ;;  %v10821_v36 = vld [vmem:[%s14017_s7 + $0x94] ss:$8 sps:$4 sm:$0xff]  }
 0x9f2   :  { %v7263_v25 = vmax.f32 %v7255_v0, 0.0  ;;  %v7265_v22 = vmax.f32 %v7257_v38, 0.0  ;;  %v7262_v29 = vmax.f32 %v7254_v2, 0.0  ;;  %v7264_v27 = vmax.f32 %v7256_v59, 0.0 }
 0x9f4   :  { %7829 = vmatpush1.bf16.msra.mxu1 %v10795_v4  ;;  %v13666_v26 = vpack.c.bf16 %v7265_v22, %v7263_v25  ;;  %v13671_v33 = vpack.c.bf16 %v7264_v27, %v7262_v29 }
 0x9f5   :  { %7830 = vmatprep.subr.bf16.mxu1 %v10800_v30  ;;  %v10824_v30 = vld [vmem:[%s14017_s7 + $0xa4] ss:$8 sps:$4 sm:$0xff]  }
 0x9f6   :  { %7635 = vmatprep.mubr.bf16.mxu1 %v13666_v26 }
 0x9f7   :  { %7636 = vmatmul.mubr.bf16.gmra.mrb[224].mxu1 %v13671_v33 }
 0x9f8   :  { %7831 = vmatpush1.bf16.msra.mxu1 %v10798_v57 }
 0x9f9   :  { %7832 = vmatprep.subr.bf16.mxu1 %v10803_v40  ;;  %v10822_v40 = vld [vmem:[%s14017_s7 + $0xa0] ss:$8 sps:$4 sm:$0xff]  }
 0x9fc   :  { %7833 = vmatpush1.bf16.msra.mxu1 %v10801_v20 }
 0x9fd   :  { %7834 = vmatprep.subr.bf16.mxu1 %v10806_v44  ;;  %v10827_v44 = vld [vmem:[%s14017_s7 + $0xb4] ss:$8 sps:$4 sm:$0xff]  }
 0xa00   :  { %7835 = vmatpush1.bf16.msra.mxu1 %v10804_v19  ;;  %v10825_v19 = vld [vmem:[%s14017_s7 + $0xb0] ss:$8 sps:$4 sm:$0xff]  }
 0xa01   :  { %v7291_v62 = vpop.permute.xlu1 %7290  ;;  %7836 = vmatprep.subr.bf16.mxu1 %v10809_v39  ;;  %v10830_v39 = vld [vmem:[%s14017_s7 + $0xc4] ss:$8 sps:$4 sm:$0xff]  }
 0xa02   :  { %v7293_v14 = vpop.permute.xlu0 %7292 }
 0xa03   :  { %v7298_v15 = vsel %vm7214_vm3, %v7291_v62, %v7293_v14  ;;  %v7303_v56 = vsel %vm7214_vm3, %v7293_v14, 0  ;;  %v10833_v62 = vld [vmem:[%s14017_s7 + $0xd4] ss:$8 sps:$4 sm:$0xff]   ;;  %v10834_v14 = vld [vmem:[%s14017_s7 + $0xe0] ss:$8 sps:$4 sm:$0xff]  }
 0xa04   :  { %v7308_v21 = vmax.bf16 %v7298_v15, %v13620_v3  ;;  %v7309_v53 = vmax.bf16 %v7303_v56, %v13622_v28  ;;  %7837 = vmatpush1.bf16.msra.mxu1 %v10807_v55  ;;  %v10813_v28 = vld [vmem:[%s14017_s7 + $0x70] ss:$8 sps:$4 sm:$0xff]   ;;  %v10828_v55 = vld [vmem:[%s14017_s7 + $0xc0] ss:$8 sps:$4 sm:$0xff]   ;;  %v10839_v15 = vld [vmem:[%s14017_s7 + $0xf4] ss:$8 sps:$4 sm:$0xff]  }
 0xa05   :  { %7838 = vmatprep.subr.bf16.mxu1 %v10812_v49  ;;  %v10831_v49 = vld [vmem:[%s14017_s7 + $0xd0] ss:$8 sps:$4 sm:$0xff]  }
 0xa06   :  { %v7312_v6 = vunpack.c.l.bf16 %v7308_v21  ;;  %v7313_v17 = vunpack.c.l.bf16 %v7309_v53  ;;  %v7314_v37 = vunpack.c.h.bf16 %v7308_v21  ;;  %v7315_v3 = vunpack.c.h.bf16 %v7309_v53  ;;  %v10837_v56 = vld [vmem:[%s14017_s7 + $0xf0] ss:$8 sps:$4 sm:$0xff]   ;;  %v10842_v21 = vld [vmem:[%s14017_s7 + $0x204] ss:$8 sps:$4 sm:$0xff]   ;;  %v10840_v53 = vld [vmem:[%s14017_s7 + $0x200] ss:$8 sps:$4 sm:$0xff]  }
 0xa08   :  { %7839 = vmatpush1.bf16.msra.mxu1 %v10810_v5  ;;  %v7333_v12 = vadd.f32 %v7329_v58, %v7313_v17  ;;  %v7335_v42 = vadd.f32 %v7329_v58, %v7315_v3  ;;  %v7332_v61 = vadd.f32 %v7325_v35, %v7312_v6  ;;  %v7334_v54 = vadd.f32 %v7325_v35, %v7314_v37  ;;  %v10845_v5 = vld [vmem:[%s14017_s7 + $0x214] ss:$8 sps:$4 sm:$0xff]   ;;  %v10849_v17 = vld [vmem:[%s14017_s7 + $0x230] ss:$8 sps:$4 sm:$0xff]   ;;  %v10854_v37 = vld [vmem:[%s14017_s7 + $0x244] ss:$8 sps:$4 sm:$0xff]  }
 0xa09   :  { %v7295_v46 = vpop.permute.xlu1 %7294  ;;  %7840 = vmatprep.subr.bf16.mxu1 %v10815_v7  ;;  %v10846_v7 = vld [vmem:[%s14017_s7 + $0x220] ss:$8 sps:$4 sm:$0xff]   ;;  %v10851_v6 = vld [vmem:[%s14017_s7 + $0x234] ss:$8 sps:$4 sm:$0xff]  }
 0xa0a   :  { %v7297_v8 = vpop.permute.xlu0 %7296  ;;  %v7341_v9 = vmax.f32 %v7333_v12, 0.0  ;;  %v7343_v60 = vmax.f32 %v7335_v42, 0.0  ;;  %v7340_v41 = vmax.f32 %v7332_v61, 0.0  ;;  %v7342_v10 = vmax.f32 %v7334_v54, 0.0  ;;  %v10852_v3 = vld [vmem:[%s14017_s7 + $0x240] ss:$8 sps:$4 sm:$0xff]  }
 0xa0b   :  { %v7299_v1 = vsel %vm7214_vm3, %v7295_v46, %v7297_v8  ;;  %v7306_v13 = vsel %vm7214_vm3, %v7297_v8, 0  ;;  %v10860_v12 = vld [vmem:[%s14017_s7 + $0x264] ss:$8 sps:$4 sm:$0xff]   ;;  %v10858_v42 = vld [vmem:[%s14017_s7 + $0x260] ss:$8 sps:$4 sm:$0xff]  }
 0xa0c   :  { %v7310_v48 = vmax.bf16 %v7299_v1, %v13628_v50  ;;  %v7311_v47 = vmax.bf16 %v7306_v13, %v13630_v45  ;;  %7841 = vmatpush1.bf16.msra.mxu1 %v10813_v28  ;;  %v13721_v43 = vpack.c.bf16 %v7343_v60, %v7341_v9  ;;  %v13726_v24 = vpack.c.bf16 %v7342_v10, %v7340_v41  ;;  %v10819_v45 = vld [vmem:[%s14017_s7 + $0x90] ss:$8 sps:$4 sm:$0xff]   ;;  %v10866_v61 = vld [vmem:[%s14017_s7 + $0x284] ss:$8 sps:$4 sm:$0xff]   ;;  %v10864_v54 = vld [vmem:[%s14017_s7 + $0x280] ss:$8 sps:$4 sm:$0xff]  }
 0xa0d   :  { %7842 = vmatprep.subr.bf16.mxu1 %v10818_v52  ;;  %v10855_v28 = vld [vmem:[%s14017_s7 + $0x250] ss:$8 sps:$4 sm:$0xff]   ;;  %v10872_v52 = vld [vmem:[%s14017_s7 + $0x2a4] ss:$8 sps:$4 sm:$0xff]   ;;  %v10870_v8 = vld [vmem:[%s14017_s7 + $0x2a0] ss:$8 sps:$4 sm:$0xff]  }
 0xa0e   :  { %v7316_v32 = vunpack.c.l.bf16 %v7310_v48  ;;  %v7317_v63 = vunpack.c.l.bf16 %v7311_v47  ;;  %v7318_v4 = vunpack.c.h.bf16 %v7310_v48  ;;  %v7319_v50 = vunpack.c.h.bf16 %v7311_v47  ;;  %7645 = vmatprep.mubr.bf16.mxu1 %v13721_v43  ;;  %v10867_v46 = vld [vmem:[%s14017_s7 + $0x290] ss:$8 sps:$4 sm:$0xff]   ;;  %v10875_v9 = vld [vmem:[%s14017_s7 + $0x2b4] ss:$8 sps:$4 sm:$0xff]   ;;  %v10878_v41 = vld [vmem:[%s14017_s7 + $0x2c4] ss:$8 sps:$4 sm:$0xff]  }
 0xa0f   :  { %7646 = vmatmul.mubr.bf16.gmra.mrb[228].mxu1 %v13726_v24  ;;  %v10873_v60 = vld [vmem:[%s14017_s7 + $0x2b0] ss:$8 sps:$4 sm:$0xff]   ;;  %v10876_v10 = vld [vmem:[%s14017_s7 + $0x2c0] ss:$8 sps:$4 sm:$0xff]   ;;  %v10881_v1 = vld [vmem:[%s14017_s7 + $0x2d4] ss:$8 sps:$4 sm:$0xff]  }
 0xa10   :  { %7843 = vmatpush1.bf16.msra.mxu1 %v10816_v31  ;;  %v7337_v0 = vadd.f32 %v7329_v58, %v7317_v63  ;;  %v7339_v38 = vadd.f32 %v7329_v58, %v7319_v50  ;;  %v7336_v2 = vadd.f32 %v7325_v35, %v7316_v32  ;;  %v7338_v59 = vadd.f32 %v7325_v35, %v7318_v4  ;;  %v10843_v58 = vld [vmem:[%s14017_s7 + $0x210] ss:$8 sps:$4 sm:$0xff]   ;;  %v10848_v35 = vld [vmem:[%s14017_s7 + $0x224] ss:$8 sps:$4 sm:$0xff]   ;;  %v10882_v47 = vld [vmem:[%s14017_s7 + $0x2e0] ss:$8 sps:$4 sm:$0xff]  }
 0xa11   :  { %7844 = vmatprep.subr.bf16.mxu1 %v10821_v36  ;;  %v10879_v13 = vld [vmem:[%s14017_s7 + $0x2d0] ss:$8 sps:$4 sm:$0xff]   ;;  %v10884_v48 = vld [vmem:[%s14017_s7 + $0x2e4] ss:$8 sps:$4 sm:$0xff]   ;;  %v10888_v36 = vld [vmem:[%s14019_s9] ss:$8 sps:$4 sm:$0xff]  }
 0xa12   :  { %v7345_v25 = vmax.f32 %v7337_v0, 0.0  ;;  %v7347_v22 = vmax.f32 %v7339_v38, 0.0  ;;  %v7344_v29 = vmax.f32 %v7336_v2, 0.0  ;;  %v7346_v27 = vmax.f32 %v7338_v59, 0.0  ;;  %v10885_v31 = vld [vmem:[%s14017_s7 + $0x2f0] ss:$8 sps:$4 sm:$0xff]  }
 0xa13   :  { %v10891_v32 = vld [vmem:[%s14019_s9 + $0x10] ss:$8 sps:$4 sm:$0xff]   ;;  %v10893_v63 = vld [vmem:[%s14019_s9 + $0x14] ss:$8 sps:$4 sm:$0xff]   ;;  %v10896_v4 = vld [vmem:[%s14019_s9 + $0x24] ss:$8 sps:$4 sm:$0xff]  }
 0xa14   :  { %7845 = vmatpush1.bf16.msra.mxu1 %v10819_v45  ;;  %v13739_v57 = vpack.c.bf16 %v7347_v22, %v7345_v25  ;;  %v13744_v20 = vpack.c.bf16 %v7346_v27, %v7344_v29  ;;  %v10894_v50 = vld [vmem:[%s14019_s9 + $0x20] ss:$8 sps:$4 sm:$0xff]   ;;  %v10899_v45 = vld [vmem:[%s14019_s9 + $0x34] ss:$8 sps:$4 sm:$0xff]   ;;  %v10897_v0 = vld [vmem:[%s14019_s9 + $0x30] ss:$8 sps:$4 sm:$0xff]  }
 0xa15   :  { %7846 = vmatprep.subr.bf16.mxu1 %v10824_v30  ;;  %v10900_v38 = vld [vmem:[%s14019_s9 + $0x40] ss:$8 sps:$4 sm:$0xff]   ;;  %v10902_v2 = vld [vmem:[%s14019_s9 + $0x44] ss:$8 sps:$4 sm:$0xff]   ;;  %v10903_v59 = vld [vmem:[%s14019_s9 + $0x50] ss:$8 sps:$4 sm:$0xff]  }
 0xa16   :  { %7655 = vmatprep.mubr.bf16.mxu1 %v13739_v57  ;;  %v10905_v30 = vld [vmem:[%s14019_s9 + $0x54] ss:$8 sps:$4 sm:$0xff]   ;;  %v10908_v25 = vld [vmem:[%s14019_s9 + $0x64] ss:$8 sps:$4 sm:$0xff]   ;;  %v10906_v22 = vld [vmem:[%s14019_s9 + $0x60] ss:$8 sps:$4 sm:$0xff]  }
 0xa17   :  { %7656 = vmatmul.mubr.bf16.gmra.mrb[232].mxu1 %v13744_v20  ;;  %v10911_v29 = vld [vmem:[%s14019_s9 + $0x74] ss:$8 sps:$4 sm:$0xff]   ;;  %v10909_v27 = vld [vmem:[%s14019_s9 + $0x70] ss:$8 sps:$4 sm:$0xff]  }
 0xa18   :  { %7847 = vmatpush1.bf16.msra.mxu1 %v10822_v40  ;;  %7858 = vmatprep.mubr.bf16.mxu1 %v14147_v11 }
 0xa19   :  { %7848 = vmatprep.subr.bf16.mxu1 %v10827_v44 }
 0xa1c   :  { %7849 = vmatpush1.bf16.msra.mxu1 %v10825_v19 }
 0xa1d   :  { %7850 = vmatprep.subr.bf16.mxu1 %v10830_v39 }
 0xa20   :  { %7851 = vmatpush1.bf16.msra.mxu1 %v10828_v55 }
 0xa21   :  { %7852 = vmatprep.subr.bf16.mxu1 %v10833_v62 }
 0xa24   :  { %7853 = vmatpush1.bf16.msra.mxu1 %v10831_v49 }
 0xa25   :  { %7854 = vmatprep.subr.bf16.mxu1 %v10836_v51 }
 0xa28   :  { %7855 = vmatpush1.bf16.msra.mxu1 %v10834_v14 }
 0xa29   :  { %7856 = vmatprep.subr.bf16.mxu1 %v10839_v15 }
 0xa2c   :  { %7857 = vmatpush1.bf16.msra.mxu1 %v10837_v56 }
 0xa2d   :  { %8100 = vmatprep.subr.bf16.mxu1 %v10842_v21 }
 0xa2f   :  { %7859 = vmatmul.mubr.bf16.vlgmr.msra.gmra.mrb[220].mxu1 %v14147_v11 }
 0xa30   :  { %8101 = vmatpush1.bf16.msra.mxu1 %v10840_v53  ;;  %7868 = vmatprep.mubr.bf16.mxu1 %v14147_v11 }
 0xa31   :  { %8102 = vmatprep.subr.bf16.mxu1 %v10845_v5 }
 0xa34   :  { %8103 = vmatpush1.bf16.msra.mxu1 %v10843_v58 }
 0xa35   :  { %8104 = vmatprep.subr.bf16.mxu1 %v10848_v35 }
 0xa37   :  { %7869 = vmatmul.mubr.bf16.gmra.mrb[224].mxu1 %v14147_v11 }
 0xa38   :  { %7878 = vmatprep.mubr.bf16.mxu1 %v13650_v34  ;;  %8105 = vmatpush1.bf16.msra.mxu1 %v10846_v7  ;;  %v10857_v34 = vld [vmem:[%s14017_s7 + $0x254] ss:$8 sps:$4 sm:$0xff]  }
 0xa39   :  { %8106 = vmatprep.subr.bf16.mxu1 %v10851_v6 }
 0xa3c   :  { %8107 = vmatpush1.bf16.msra.mxu1 %v10849_v17 }
 0xa3d   :  { %8108 = vmatprep.subr.bf16.mxu1 %v10854_v37 }
 0xa3f   :  { %7879 = vmatmul.mubr.bf16.gmra.mrb[228].mxu1 %v13646_v16  ;;  %v10863_v16 = vld [vmem:[%s14017_s7 + $0x274] ss:$8 sps:$4 sm:$0xff]  }
 0xa40   :  { %7888 = vmatprep.mubr.bf16.mxu1 %v13666_v26  ;;  %8109 = vmatpush1.bf16.msra.mxu1 %v10852_v3  ;;  %v10861_v26 = vld [vmem:[%s14017_s7 + $0x270] ss:$8 sps:$4 sm:$0xff]  }
 0xa41   :  { %8110 = vmatprep.subr.bf16.mxu1 %v10857_v34  ;;  %v9473_v34 = vld [vmem:[%s14021_s8] ss:$0 sm:$0xff] }
 0xa44   :  { %8111 = vmatpush1.bf16.msra.mxu1 %v10855_v28 }
 0xa45   :  { %8112 = vmatprep.subr.bf16.mxu1 %v10860_v12 }
 0xa47   :  { %7889 = vmatmul.mubr.bf16.gmra.mrb[232].mxu1 %v13671_v33  ;;  %v10869_v33 = vld [vmem:[%s14017_s7 + $0x294] ss:$8 sps:$4 sm:$0xff]  }
 0xa48   :  { %8113 = vmatpush1.bf16.msra.mxu1 %v10858_v42  ;;  %8132 = vmatprep.mubr.bf16.mxu1 %v13721_v43  ;;  %v10887_v43 = vld [vmem:[%s14017_s7 + $0x2f4] ss:$8 sps:$4 sm:$0xff]  }
 0xa49   :  { %8114 = vmatprep.subr.bf16.mxu1 %v10863_v16 }
 0xa4c   :  { %8115 = vmatpush1.bf16.msra.mxu1 %v10861_v26 }
 0xa4d   :  { %8116 = vmatprep.subr.bf16.mxu1 %v10866_v61 }
 0xa50   :  { %8117 = vmatpush1.bf16.msra.mxu1 %v10864_v54 }
 0xa51   :  { %8118 = vmatprep.subr.bf16.mxu1 %v10869_v33 }
 0xa54   :  { %8119 = vmatpush1.bf16.msra.mxu1 %v10867_v46 }
 0xa55   :  { %8120 = vmatprep.subr.bf16.mxu1 %v10872_v52 }
 0xa58   :  { %8121 = vmatpush1.bf16.msra.mxu1 %v10870_v8 }
 0xa59   :  { %8122 = vmatprep.subr.bf16.mxu1 %v10875_v9 }
 0xa5c   :  { %8123 = vmatpush1.bf16.msra.mxu1 %v10873_v60 }
 0xa5d   :  { %8124 = vmatprep.subr.bf16.mxu1 %v10878_v41  ;;  %v10913_v41 = vld [vmem:[%s14020_s11] sm:$0xff]  }
 0xa60   :  { %8125 = vmatpush1.bf16.msra.mxu1 %v10876_v10 }
 0xa61   :  { %8126 = vmatprep.subr.bf16.mxu1 %v10881_v1 }
 0xa64   :  { %8127 = vmatpush1.bf16.msra.mxu1 %v10879_v13  ;;  %v10914_v13 = vld [vmem:[%s14020_s11 + $0x48] sm:$0xff]  }
 0xa65   :  { %8128 = vmatprep.subr.bf16.mxu1 %v10884_v48 }
 0xa68   :  { %8129 = vmatpush1.bf16.msra.mxu1 %v10882_v47 }
 0xa69   :  { %8130 = vmatprep.subr.bf16.mxu1 %v10887_v43  ;;  %v10915_v43 = vld [vmem:[%s14020_s11 + $0x8] sm:$0xff]  }
 0xa6c   :  { %8131 = vmatpush1.bf16.msra.mxu1 %v10885_v31 }
 0xa6f   :  { %8133 = vmatmul.mubr.bf16.vlgmr.msra.gmra.mrb[220].mxu1 %v13726_v24  ;;  %v10890_v24 = vld [vmem:[%s14019_s9 + $0x4] ss:$8 sps:$4 sm:$0xff]  }
 0xa70   :  { %8142 = vmatprep.mubr.bf16.mxu1 %v13739_v57  ;;  %8348 = vmatprep.subr.bf16.mxu1 %v10890_v24  ;;  %v10912_v57 = vld [vmem:[%s14020_s11 + $0x40] sm:$0xff]   ;;  %v10916_v24 = vld [vmem:[%s14020_s11 + $0x50] sm:$0xff]  }
 0xa71   :  { %8349 = vmatpush1.bf16.msra.mxu1 %v10888_v36 }
 0xa72   :  { %8350 = vmatprep.subr.bf16.mxu1 %v10893_v63 }
 0xa75   :  { %8351 = vmatpush1.bf16.msra.mxu1 %v10891_v32 }
 0xa76   :  { %8352 = vmatprep.subr.bf16.mxu1 %v10896_v4  ;;  %v10917_v4 = vld [vmem:[%s14020_s11 + $0x10] sm:$0xff]  }
 0xa77   :  { %8143 = vmatmul.mubr.bf16.gmra.mrb[224].mxu1 %v13744_v20 }
 0xa78   :  { %8152 = vmatprep.mubr.bf16.mxu1 %v14147_v11 }
 0xa79   :  { %8353 = vmatpush1.bf16.msra.mxu1 %v10894_v50  ;;  %v10918_v50 = vld [vmem:[%s14020_s11 + $0x58] sm:$0xff]  }
 0xa7a   :  { %8354 = vmatprep.subr.bf16.mxu1 %v10899_v45  ;;  %v10919_v45 = vld [vmem:[%s14020_s11 + $0x18] sm:$0xff]  }
 0xa7d   :  { %8355 = vmatpush1.bf16.msra.mxu1 %v10897_v0  ;;  %v10920_v0 = vld [vmem:[%s14020_s11 + $0x60] sm:$0xff]  }
 0xa7e   :  { %8356 = vmatprep.subr.bf16.mxu1 %v10902_v2  ;;  %v10922_v2 = vld [vmem:[%s14020_s11 + $0x68] sm:$0xff]  }
 0xa7f   :  { %8153 = vmatmul.mubr.bf16.gmra.mrb[228].mxu1 %v14147_v11 }
 0xa80   :  { %8162 = vmatprep.mubr.bf16.mxu1 %v14147_v11 }
 0xa81   :  { %8357 = vmatpush1.bf16.msra.mxu1 %v10900_v38  ;;  %v10921_v38 = vld [vmem:[%s14020_s11 + $0x20] sm:$0xff]  }
 0xa82   :  { %8358 = vmatprep.subr.bf16.mxu1 %v10905_v30  ;;  %v10924_v30 = vld [vmem:[%s14020_s11 + $0x70] sm:$0xff]  }
 0xa85   :  { %8359 = vmatpush1.bf16.msra.mxu1 %v10903_v59  ;;  %v10923_v59 = vld [vmem:[%s14020_s11 + $0x28] sm:$0xff]  }
 0xa86   :  { %8360 = vmatprep.subr.bf16.mxu1 %v10908_v25  ;;  %v10925_v25 = vld [vmem:[%s14020_s11 + $0x30] sm:$0xff]  }
 0xa87   :  { %8163 = vmatmul.mubr.bf16.gmra.mrb[232].mxu1 %v14147_v11 }
 0xa88   :  { %8380 = vmatprep.mubr.bf16.mxu1 %v14147_v11 }
 0xa89   :  { %8361 = vmatpush1.bf16.msra.mxu1 %v10906_v22  ;;  %v10926_v22 = vld [vmem:[%s14020_s11 + $0x78] sm:$0xff]  }
 0xa8a   :  { %8362 = vmatprep.subr.bf16.mxu1 %v10911_v29  ;;  %v10927_v29 = vld [vmem:[%s14020_s11 + $0x38] sm:$0xff]  }
 0xa8d   :  { %8363 = vmatpush1.bf16.msra.mxu1 %v10909_v27  ;;  %v8256_v27 = vld [vmem:[%s14022_s10] sm:$0x3] }
 0xa8e   :  { %9507 = vmatprep.subr.bf16.mxu1 %v10912_v57  ;;  %v8261_v57 = vrot.slane %v8256_v27, %v12579_v23 }
 0xb42   :  { %v8134_v40 = vpop.f32.mrb[220].mxu1 }
 0xb43   :  { %v8136_v20 = vpop.f32.mrb[221].mxu1 }
 0xb44   :  { %v8138_v44 = vpop.f32.mrb[222].mxu1 }
 0xb45   :  { %v8189_v19 = vpack.c.bf16 %v8138_v44, %v8134_v40  ;;  %v8140_v39 = vpop.f32.mrb[223].mxu1  ;;  %v8265_v40 = vrot.slane %v8256_v27, %v12571_v18 }
 0xb46   :  { %v8190_v55 = vpack.c.bf16 %v8140_v39, %v8136_v20 }
 0xb4a   :  { %v8144_v62 = vpop.f32.mrb[224].mxu1 }
 0xb4b   :  { %v8146_v49 = vpop.f32.mrb[225].mxu1 }
 0xb4c   :  { %v8148_v51 = vpop.f32.mrb[226].mxu1 }
 0xb4d   :  { %v8191_v14 = vpack.c.bf16 %v8148_v51, %v8144_v62  ;;  %v8150_v15 = vpop.f32.mrb[227].mxu1 }
 0xb4e   :  { %v8192_v56 = vpack.c.bf16 %v8150_v15, %v8146_v49 }
 0xb52   :  { %v8154_v21 = vpop.f32.mrb[228].mxu1 }
 0xb53   :  { %v8156_v53 = vpop.f32.mrb[229].mxu1 }
 0xb54   :  { %v8158_v5 = vpop.f32.mrb[230].mxu1 }
 0xb55   :  { %v8193_v58 = vpack.c.bf16 %v8158_v5, %v8154_v21  ;;  %v8160_v35 = vpop.f32.mrb[231].mxu1 }
 0xb56   :  { %v8194_v7 = vpack.c.bf16 %v8160_v35, %v8156_v53 }
 0xb57   :  { %v8213_v6 = vmax.bf16 %v8193_v58, %v8189_v19 }
 0xb58   :  { %v8214_v17 = vmax.bf16 %v8194_v7, %v8190_v55 }
 0xb5a   :  { %v8217_v37 = vmax.bf16 %v8214_v17, %v8213_v6  ;;  %v8164_v3 = vpop.f32.mrb[232].mxu1 }
 0xb5b   :  { %v8166_v28 = vpop.f32.mrb[233].mxu1 }
 0xb5c   :  { %v8219_v12 = vunpack.c.l.bf16 %v8217_v37  ;;  %v8220_v42 = vunpack.c.h.bf16 %v8217_v37  ;;  %v8168_v16 = vpop.f32.mrb[234].mxu1 }
 0xb5d   :  { %v8195_v26 = vpack.c.bf16 %v8168_v16, %v8164_v3  ;;  %v8170_v61 = vpop.f32.mrb[235].mxu1 }
 0xb5e   :  { %v8230_v54 = vadd.f32 %v9473_v34, %v8219_v12  ;;  %v8231_v33 = vadd.f32 %v9473_v34, %v8220_v42  ;;  %v8196_v46 = vpack.c.bf16 %v8170_v61, %v8166_v28  ;;  %v9490_v61 = vld [vmem:[%s14023_s12] ss:$0 sm:$0xff] }
 0xb5f   :  { %v8215_v52 = vmax.bf16 %v8195_v26, %v8191_v14 }
 0xb60   :  { %v8234_v8 = vmax.f32 %v8230_v54, 0.0  ;;  %v8235_v9 = vmax.f32 %v8231_v33, 0.0  ;;  %v8216_v60 = vmax.bf16 %v8196_v46, %v8192_v56 }
 0xb62   :  { %v8238_v10 = vpack.c.bf16 %v8235_v9, %v8234_v8  ;;  %v8218_v1 = vmax.bf16 %v8216_v60, %v8215_v52 }
 0xb64   :  { %v8221_v48 = vunpack.c.l.bf16 %v8218_v1  ;;  %v8222_v47 = vunpack.c.h.bf16 %v8218_v1  ;;  %8381 = vmatmul.mubr.bf16.vlgmr.msra.gmra.mrb[236].mxu1 %v8238_v10 }
 0xb65   :  { %8390 = vmatprep.mubr.bf16.mxu1 %v14147_v11  ;;  %9508 = vmatpush3.bf16.msra.mxu1 %v10913_v41 }
 0xb66   :  { %v8232_v31 = vadd.f32 %v9473_v34, %v8221_v48  ;;  %v8233_v36 = vadd.f32 %v9473_v34, %v8222_v47  ;;  %9509 = vmatprep.subr.bf16.mxu1 %v10914_v13 }
 0xb68   :  { %v8236_v32 = vmax.f32 %v8232_v31, 0.0  ;;  %v8237_v63 = vmax.f32 %v8233_v36, 0.0 }
 0xb69   :  { %9510 = vmatpush3.bf16.msra.mxu1 %v10915_v43 }
 0xb6a   :  { %v8239_v11 = vpack.c.bf16 %v8237_v63, %v8236_v32  ;;  %9511 = vmatprep.subr.bf16.mxu1 %v10916_v24 }
 0xb6c   :  { %8391 = vmatmul.mubr.bf16.gmra.mrb[240].mxu1 %v8239_v11 }
 0xb6d   :  { %9512 = vmatpush3.bf16.msra.mxu1 %v10917_v4 }
 0xb6e   :  { %9513 = vmatprep.subr.bf16.mxu1 %v10918_v50 }
 0xb71   :  { %9514 = vmatpush3.bf16.msra.mxu1 %v10919_v45 }
 0xb72   :  { %9515 = vmatprep.subr.bf16.mxu1 %v10920_v0 }
 0xb75   :  { %9516 = vmatpush3.bf16.msra.mxu1 %v10921_v38 }
 0xb76   :  { %9517 = vmatprep.subr.bf16.mxu1 %v10922_v2 }
 0xb79   :  { %9518 = vmatpush3.bf16.msra.mxu1 %v10923_v59 }
 0xb7a   :  { %9519 = vmatprep.subr.bf16.mxu1 %v10924_v30 }
 0xb7d   :  { %9520 = vmatpush3.bf16.msra.mxu1 %v10925_v25 }
 0xb7e   :  { %9521 = vmatprep.subr.bf16.mxu1 %v10926_v22 }
 0xb81   :  { %9522 = vmatpush3.bf16.msra.mxu1 %v10927_v29 }
 0xc37   :  { %v8382_v20 = vpop.f32.mrb[236].mxu1 }
 0xc38   :  { %v8383_v44 = vadd.f32 %v8382_v20, %v8261_v57  ;;  %v8384_v19 = vpop.f32.mrb[237].mxu1 }
 0xc39   :  { %v8385_v39 = vadd.f32 %v8384_v19, %v8265_v40  ;;  %v8386_v55 = vpop.f32.mrb[238].mxu1 }
 0xc3a   :  { %v8387_v62 = vadd.f32 %v8386_v55, %v8261_v57  ;;  %v8388_v49 = vpop.f32.mrb[239].mxu1  ;;  %v8401_v14 = vmax.f32 %v8383_v44, 0.0 }
 0xc3b   :  { %v8389_v51 = vadd.f32 %v8388_v49, %v8265_v40  ;;  %v8402_v56 = vmax.f32 %v8385_v39, 0.0 }
 0xc3c   :  { %v8403_v15 = vmax.f32 %v8387_v62, 0.0 }
 0xc3d   :  { %v8404_v21 = vmax.f32 %v8389_v51, 0.0 }
 0xc3e   :  { %v8409_v53 = vpack.c.bf16 %v8403_v15, %v8401_v14 }
 0xc3f   :  { %v8410_v5 = vpack.c.bf16 %v8404_v21, %v8402_v56  ;;  %v8392_v58 = vpop.f32.mrb[240].mxu1 }
 0xc40   :  { %v8393_v35 = vadd.f32 %v8392_v58, %v8261_v57  ;;  %v8394_v7 = vpop.f32.mrb[241].mxu1 }
 0xc41   :  { %v8395_v23 = vadd.f32 %v8394_v7, %v8265_v40  ;;  %v8396_v6 = vpop.f32.mrb[242].mxu1  ;;  %8580 = vmatprep.mubr.bf16.mxu1 %v8410_v5 }
 0xc42   :  { %v8397_v18 = vadd.f32 %v8396_v6, %v8261_v57  ;;  %v8398_v17 = vpop.f32.mrb[243].mxu1  ;;  %8581 = vmatmul.mubr.bf16.vlgmr.msra.gmra.mrb[244].mxu1 %v8409_v53  ;;  %v8405_v3 = vmax.f32 %v8393_v35, 0.0 }
 0xc43   :  { %v8399_v37 = vadd.f32 %v8398_v17, %v8265_v40  ;;  %v8406_v28 = vmax.f32 %v8395_v23, 0.0 }
 0xc44   :  { %v8407_v34 = vmax.f32 %v8397_v18, 0.0 }
 0xc45   :  { %v8408_v12 = vmax.f32 %v8399_v37, 0.0 }
 0xc46   :  { %v8411_v42 = vpack.c.bf16 %v8407_v34, %v8405_v3 }
 0xc47   :  { %v8412_v16 = vpack.c.bf16 %v8408_v12, %v8406_v28 }
 0xc49   :  { %8588 = vmatprep.mubr.bf16.mxu1 %v8412_v16 }
 0xc4a   :  { %8589 = vmatmul.mubr.bf16.gmra.mrb[248].mxu1 %v8411_v42 }
 0xd15   :  { %v9523_v26 = vpop.f32.mrb[244].mxu1 }
 0xd16   :  { %v9524_v54 = vpop.f32.mrb[245].mxu1 }
 0xd17   :  { %v9525_v33 = vadd.f32 %v9524_v54, %v9523_v26  ;;  %v9526_v46 = vpop.f32.mrb[246].mxu1 }
 0xd18   :  { %v9527_v52 = vpop.f32.mrb[247].mxu1 }
 0xd19   :  { %v8583_v8 = vadd.f32 %v9525_v33, %v9490_v61  ;;  %v9528_v9 = vadd.f32 %v9527_v52, %v9526_v46 }
 0xd1b   :  { %v8586_v60 = vadd.f32 %v9528_v9, %v9490_v61  ;;  %8597 = vmax.xlane.f32.xlu0 %v8583_v8 }
 0xd1d   :  { %8599 = vmax.xlane.f32.xlu1 %v8586_v60  ;;  %v9529_v41 = vpop.f32.mrb[248].mxu1 }
 0xd1e   :  { %v9530_v10 = vpop.f32.mrb[249].mxu1 }
 0xd1f   :  { %v9531_v1 = vadd.f32 %v9530_v10, %v9529_v41  ;;  %v9532_v13 = vpop.f32.mrb[250].mxu1 }
 0xd20   :  { %v9533_v48 = vpop.f32.mrb[251].mxu1 }
 0xd21   :  { %v8591_v47 = vadd.f32 %v9531_v1, %v9490_v61  ;;  %v9534_v43 = vadd.f32 %v9533_v48, %v9532_v13 }
 0xd23   :  { %8601 = vmax.xlane.f32.xlu0 %v8591_v47  ;;  %v8594_v31 = vadd.f32 %v9534_v43, %v9490_v61 }
 0xd27   :  { %8603 = vmax.xlane.f32.xlu0 %v8594_v31 }
 0xda8   :  { %v8598_v36 = vpop.xlane.xlu0 %8597 }
 0xda9   :  { %v8605_v24 = vsub.f32 %v8583_v8, %v8598_v36 }
 0xdaa   :  { %v8600_v32 = vpop.xlane.xlu1 %8599 }
 0xdab   :  { %v8609_v63 = vmul.f32 1.442695, %v8605_v24  ;;  %v8606_v4 = vsub.f32 %v8586_v60, %v8600_v32 }
 0xdad   :  { %10928 = vpow2.f32 %v8609_v63  ;;  %v8611_v11 = vmul.f32 1.442695, %v8606_v4 }
 0xdaf   :  { %10930 = vpow2.f32 %v8611_v11 }
 0xdb0   :  { %v8602_v50 = vpop.xlane.xlu0 %8601 }
 0xdb1   :  { %v8607_v45 = vsub.f32 %v8591_v47, %v8602_v50 }
 0xdb3   :  { %v8613_v0 = vmul.f32 1.442695, %v8607_v45 }
 0xdb4   :  { %v8604_v38 = vpop.xlane.xlu0 %8603 }
 0xdb5   :  { %10932 = vpow2.f32 %v8613_v0  ;;  %v8608_v2 = vsub.f32 %v8594_v31, %v8604_v38 }
 0xdb7   :  { %v10929_v59 = vpop.eup %10928  ;;  %v8615_v30 = vmul.f32 1.442695, %v8608_v2 }
 0xdb8   :  { %8617 = vadd.xlane.f32.xlu1 %v10929_v59 }
 0xdb9   :  { %v10931_v25 = vpop.eup %10930  ;;  %10934 = vpow2.f32 %v8615_v30 }
 0xdba   :  { %8619 = vadd.xlane.f32.xlu0 %v10931_v25 }
 0xdbf   :  { %v10933_v22 = vpop.eup %10932 }
 0xdc0   :  { %8621 = vadd.xlane.f32.xlu1 %v10933_v22 }
 0xdc3   :  { %v10935_v29 = vpop.eup %10934 }
 0xdc4   :  { %8623 = vadd.xlane.f32.xlu0 %v10935_v29 }
 0xe45   :  { %v8618_v27 = vpop.xlane.xlu1 %8617 }
 0xe46   :  { %10936 = vlog2.f32 %v8618_v27 }
 0xe47   :  { %v8620_v57 = vpop.xlane.xlu0 %8619 }
 0xe48   :  { %10938 = vlog2.f32 %v8620_v57 }
 0xe4d   :  { %v8622_v40 = vpop.xlane.xlu1 %8621 }
 0xe4e   :  { %10940 = vlog2.f32 %v8622_v40 }
 0xe50   :  { %v10937_v20 = vpop.eup %10936 }
 0xe51   :  { %v8626_v44 = vmul.f32 0.6931472, %v10937_v20  ;;  %v8624_v19 = vpop.xlane.xlu0 %8623 }
 0xe52   :  { %v10939_v39 = vpop.eup %10938  ;;  %10942 = vlog2.f32 %v8624_v19 }
 0xe53   :  { %v8633_v55 = vadd.f32 %v8626_v44, %v8598_v36  ;;  %v8628_v62 = vmul.f32 0.6931472, %v10939_v39 }
 0xe55   :  { %v8637_v49 = vsub.f32 %v8583_v8, %v8633_v55  ;;  %v8634_v51 = vadd.f32 %v8628_v62, %v8600_v32 }
 0xe57   :  { %8641 = vst [vmem:[%s14024_s13] sm:$0xff] %v8637_v49  ;;  %v8638_v14 = vsub.f32 %v8586_v60, %v8634_v51 }
 0xe58   :  { %v10941_v15 = vpop.eup %10940 }
 0xe59   :  { %8642 = vst [vmem:[%s14024_s13 + $0x8] sm:$0xff] %v8638_v14  ;;  %v8630_v56 = vmul.f32 0.6931472, %v10941_v15 }
 0xe5b   :  { %v8635_v21 = vadd.f32 %v8630_v56, %v8602_v50 }
 0xe5c   :  { %v10943_v53 = vpop.eup %10942 }
 0xe5d   :  { %v8639_v5 = vsub.f32 %v8591_v47, %v8635_v21  ;;  %v8632_v58 = vmul.f32 0.6931472, %v10943_v53 }
 0xe5f   :  { %8643 = vst [vmem:[%s14024_s13 + $0x10] sm:$0xff] %v8639_v5  ;;  %v8636_v35 = vadd.f32 %v8632_v58, %v8604_v38 }
 0xe61   :  { %v8640_v7 = vsub.f32 %v8594_v31, %v8636_v35 }
 0xe63   :  { %8644 = vst [vmem:[%s14024_s13 + $0x18] sm:$0xff] %v8640_v7 }

</bundles_post_ra>
